<compile_context>
chip_gen: v6e
topology: v6e:2x2x1
jax: 0.10.0
libtpu: 0.0.40
codegen_flags: <defaults>
</compile_context>

<pallas_src>
import functools

import jax
import jax.numpy as jnp
from jax.experimental import pallas as pl
from jax.experimental.pallas import tpu as pltpu

_LANE = 128


def _round_up(x, m):
    return ((x + m - 1) // m) * m


def _device_kind():
    try:
        return jax.devices()[0].device_kind.lower()
    except Exception:
        return ""


def _pick_tile_m(batch):
    """Pick the M (batch-row) tile for the kernel.

    - Small batches: round up only to the bf16 sublane pack (16).
    - v7x (2 TensorCores/chip): prefer tile_m=128 when that gives >=2 grid
      steps so the "parallel" batch axis can be sharded across both cores.
    - Large batches: MXU-native M (256 on v6e/v7x, 128 on v5e and older).
    """
    kind = _device_kind()
    two_tc = ("7x" in kind) or ("v7" in kind)
    mxu_m = 256 if (two_tc or "v6" in kind) else 128
    b16 = _round_up(max(batch, 1), 16)
    if two_tc and 128 < b16 <= 256:
        return 128          # two grid steps -> both TensorCores busy
    if b16 <= mxu_m:
        return b16          # single grid step, minimal row padding
    return mxu_m


def _mlp_kernel(x_ref, w1_ref, b1_ref, w2_ref, b2_ref, w3_ref, b3_ref,
                w4_ref, b4_ref, o_ref):
    # fc1 + ReLU   (bf16 operands -> f32 accumulate -> f32 epilogue)
    h = jnp.dot(x_ref[...], w1_ref[...], preferred_element_type=jnp.float32)
    h = jnp.maximum(h + b1_ref[...], 0.0)
    # fc2 + ReLU
    h = jnp.dot(h.astype(jnp.bfloat16), w2_ref[...],
                preferred_element_type=jnp.float32)
    h = jnp.maximum(h + b2_ref[...], 0.0)
    # fc3 + ReLU
    h = jnp.dot(h.astype(jnp.bfloat16), w3_ref[...],
                preferred_element_type=jnp.float32)
    h = jnp.maximum(h + b3_ref[...], 0.0)
    # fc4 (no activation); output block is lane-padded to 128 columns
    h = jnp.dot(h.astype(jnp.bfloat16), w4_ref[...],
                preferred_element_type=jnp.float32)
    o_ref[...] = (h + b4_ref[...]).astype(o_ref.dtype)


def prepare_params(params):
    """One-time conversion of f32 nn.Linear-style params for the kernel.

    Returns (prepared_params, num_classes).  Weights become bf16, biases stay
    f32, and the fc4 head (weights + bias) is zero-padded to 128 output lanes
    so the kernel's output store is an unmasked lane-dense vst.  Do this ONCE
    and reuse the result; re-converting per forward call costs 3-4x the
    kernel's own weight DMA.
    """
    num_classes = params["w4"].shape[1]
    c_pad = _round_up(max(num_classes, _LANE), _LANE)
    prep = {
        "w1": params["w1"].astype(jnp.bfloat16),
        "w2": params["w2"].astype(jnp.bfloat16),
        "w3": params["w3"].astype(jnp.bfloat16),
        "w4": jnp.pad(params["w4"],
                      ((0, 0), (0, c_pad - num_classes))).astype(jnp.bfloat16),
        "b1": params["b1"],
        "b2": params["b2"],
        "b3": params["b3"],
        "b4": jnp.pad(params["b4"], ((0, 0), (0, c_pad - num_classes))),
    }
    return prep, num_classes


@functools.partial(jax.jit, static_argnames=("tile_m", "num_classes"))
def _forward_impl(x_nchw, prep, *, tile_m, num_classes):
    B = x_nchw.shape[0]
    flat = x_nchw.reshape(B, -1).astype(jnp.bfloat16)   # nn.Flatten semantics
    F = flat.shape[1]
    C_pad = prep["w4"].shape[1]

    # Pad batch to the chosen M tile (small batches only round to 16 rows).
    B_pad = _round_up(B, tile_m)
    if B_pad != B:
        flat = jnp.pad(flat, ((0, B_pad - B), (0, 0)))

    grid = (B_pad // tile_m,)

    # Weights/biases never change across grid steps -> single buffer
    # (no duplicated weight slab in VMEM; matters most on v7x's 64 MiB).
    const = lambda shape: pl.BlockSpec(shape, lambda i: (0, 0),
                                       pipeline_mode=pl.Buffered(1))

    out = pl.pallas_call(
        _mlp_kernel,
        out_shape=jax.ShapeDtypeStruct((B_pad, C_pad), jnp.float32),
        grid_spec=pltpu.PrefetchScalarGridSpec(
            num_scalar_prefetch=0,
            grid=grid,
            in_specs=[
                pl.BlockSpec((tile_m, F), lambda i: (i, 0)),   # activations
                const(prep["w1"].shape), const(prep["b1"].shape),
                const(prep["w2"].shape), const(prep["b2"].shape),
                const(prep["w3"].shape), const(prep["b3"].shape),
                const(prep["w4"].shape), const(prep["b4"].shape),
            ],
            out_specs=pl.BlockSpec((tile_m, C_pad), lambda i: (i, 0)),
        ),
        compiler_params=pltpu.CompilerParams(
            dimension_semantics=("parallel",),
            vmem_limit_bytes=32 * 1024 * 1024),
    )(flat, prep["w1"], prep["b1"], prep["w2"], prep["b2"],
      prep["w3"], prep["b3"], prep["w4"], prep["b4"])

    return out[:B, :num_classes]


def image_ann_forward(x_nchw, prepared_params, num_classes, *, tile_m=None):
    """Forward pass of ImageANN.

    x_nchw:          (B, 3, H, W) float32
    prepared_params: output of prepare_params() (bf16 weights, padded head)
    num_classes:     logits width (pre-padding)
    returns:         (B, num_classes) float32
    """
    if tile_m is None:
        tile_m = _pick_tile_m(x_nchw.shape[0])
    return _forward_impl(x_nchw, prepared_params,
                         tile_m=tile_m, num_classes=num_classes)


def init_params(input_size, num_classes, key):
    """Deterministic synthetic parameters (shapes match nn.Linear layers)."""
    flat_size = input_size * input_size * 3
    dims = [flat_size, 1024, 512, 256, num_classes]
    params = {}
    keys = jax.random.split(key, 2 * (len(dims) - 1))
    for li in range(len(dims) - 1):
        fan_in, fan_out = dims[li], dims[li + 1]
        bound = 1.0 / jnp.sqrt(fan_in)
        # stored as (in, out): equals PyTorch weight (out, in) transposed
        params[f"w{li+1}"] = jax.random.uniform(
            keys[2 * li], (fan_in, fan_out), jnp.float32, -bound, bound)
        params[f"b{li+1}"] = jax.random.uniform(
            keys[2 * li + 1], (1, fan_out), jnp.float32, -bound, bound)
    return params


def _reference(x_nchw, params):
    """Pure-JAX reference matching the kernel's mixed precision
    (bf16 dot operands, f32 accumulation, f32 bias/ReLU)."""
    bf = jnp.bfloat16
    h = x_nchw.reshape(x_nchw.shape[0], -1).astype(bf)
    h = jnp.maximum(
        jnp.dot(h, params["w1"].astype(bf),
                preferred_element_type=jnp.float32) + params["b1"], 0.0)
    h = jnp.maximum(
        jnp.dot(h.astype(bf), params["w2"].astype(bf),
                preferred_element_type=jnp.float32) + params["b2"], 0.0)
    h = jnp.maximum(
        jnp.dot(h.astype(bf), params["w3"].astype(bf),
                preferred_element_type=jnp.float32) + params["b3"], 0.0)
    return jnp.dot(h.astype(bf), params["w4"].astype(bf),
                   preferred_element_type=jnp.float32) + params["b4"]


if __name__ == "__main__":
    input_size = 16          # images are (3, 16, 16)  -> flat_size = 768
    num_classes = 10
    batch = 2

    key = jax.random.PRNGKey(0)
    kx, kp = jax.random.split(key)
    x = jax.random.normal(kx, (batch, 3, input_size, input_size), jnp.float32)
    params = init_params(input_size, num_classes, kp)

    # One-time weight conversion (bf16 cast + head padding), reused per call.
    prepared, n_cls = prepare_params(params)
    prepared = jax.block_until_ready(prepared)

    out = image_ann_forward(x, prepared, n_cls)
    out = jax.block_until_ready(out)

    ref = _reference(x, params)
    assert out.shape == (batch, num_classes)
    assert jnp.allclose(out, ref, atol=2e-2, rtol=2e-2), "mismatch vs reference"

    print("KERNEL_OK")
</pallas_src>

<mosaic_0001>
module attributes {stable_mosaic.version = 11 : i64} {
  func.func @_mlp_kernel(%arg0: i32, %arg1: memref<16x768xbf16, #tpu.memory_space<vmem>>, %arg2: memref<768x1024xbf16, #tpu.memory_space<vmem>>, %arg3: memref<1x1024xf32, #tpu.memory_space<vmem>>, %arg4: memref<1024x512xbf16, #tpu.memory_space<vmem>>, %arg5: memref<1x512xf32, #tpu.memory_space<vmem>>, %arg6: memref<512x256xbf16, #tpu.memory_space<vmem>>, %arg7: memref<1x256xf32, #tpu.memory_space<vmem>>, %arg8: memref<256x128xbf16, #tpu.memory_space<vmem>>, %arg9: memref<1x128xf32, #tpu.memory_space<vmem>>, %arg10: memref<16x128xf32, #tpu.memory_space<vmem>>) attributes {dimension_semantics = [#tpu.dimension_semantics<parallel>], iteration_bounds = array<i64: 1>, scalar_prefetch = 0 : i64, scratch_operands = 0 : i64, tpu.core_type = #tpu.core_type<tc>, window_params = [{transform_indices = @transform_0, window_bounds = array<i64: 16, 768>}, {pipeline_mode = #tpu.pipeline_mode<synchronous>, transform_indices = @transform_1, window_bounds = array<i64: 768, 1024>}, {pipeline_mode = #tpu.pipeline_mode<synchronous>, transform_indices = @transform_2, window_bounds = array<i64: 1, 1024>}, {pipeline_mode = #tpu.pipeline_mode<synchronous>, transform_indices = @transform_3, window_bounds = array<i64: 1024, 512>}, {pipeline_mode = #tpu.pipeline_mode<synchronous>, transform_indices = @transform_4, window_bounds = array<i64: 1, 512>}, {pipeline_mode = #tpu.pipeline_mode<synchronous>, transform_indices = @transform_5, window_bounds = array<i64: 512, 256>}, {pipeline_mode = #tpu.pipeline_mode<synchronous>, transform_indices = @transform_6, window_bounds = array<i64: 1, 256>}, {pipeline_mode = #tpu.pipeline_mode<synchronous>, transform_indices = @transform_7, window_bounds = array<i64: 256, 128>}, {pipeline_mode = #tpu.pipeline_mode<synchronous>, transform_indices = @transform_8, window_bounds = array<i64: 1, 128>}, {transform_indices = @transform_9, window_bounds = array<i64: 16, 128>}]} {
    %c0 = arith.constant 0 : index
    %c0_0 = arith.constant 0 : index
    %0 = vector.load %arg1[%c0, %c0_0] : memref<16x768xbf16, #tpu.memory_space<vmem>>, vector<16x768xbf16>
    %c0_1 = arith.constant 0 : index
    %c0_2 = arith.constant 0 : index
    %1 = vector.load %arg2[%c0_1, %c0_2] : memref<768x1024xbf16, #tpu.memory_space<vmem>>, vector<768x1024xbf16>
    %cst = arith.constant dense<0.000000e+00> : vector<16x1024xf32>
    %2 = tpu.matmul %0, %1, %cst {dimension_numbers = #tpu.dot_dimension_numbers<[1], [0], [0], [1], [0, 0, 1, 1], [], []>} : vector<16x768xbf16>, vector<768x1024xbf16>, vector<16x1024xf32> -> vector<16x1024xf32>
    %c0_3 = arith.constant 0 : index
    %c0_4 = arith.constant 0 : index
    %3 = vector.load %arg3[%c0_3, %c0_4] : memref<1x1024xf32, #tpu.memory_space<vmem>>, vector<1x1024xf32>
    %4 = vector.broadcast %3 : vector<1x1024xf32> to vector<16x1024xf32>
    %5 = arith.addf %2, %4 : vector<16x1024xf32>
    %cst_5 = arith.constant 0.000000e+00 : f32
    %6 = vector.broadcast %cst_5 : f32 to vector<16x1024xf32>
    %7 = arith.maximumf %5, %6 : vector<16x1024xf32>
    %8 = arith.truncf %7 : vector<16x1024xf32> to vector<16x1024xbf16>
    %c0_6 = arith.constant 0 : index
    %c0_7 = arith.constant 0 : index
    %9 = vector.load %arg4[%c0_6, %c0_7] : memref<1024x512xbf16, #tpu.memory_space<vmem>>, vector<1024x512xbf16>
    %cst_8 = arith.constant dense<0.000000e+00> : vector<16x512xf32>
    %10 = tpu.matmul %8, %9, %cst_8 {dimension_numbers = #tpu.dot_dimension_numbers<[1], [0], [0], [1], [0, 0, 1, 1], [], []>} : vector<16x1024xbf16>, vector<1024x512xbf16>, vector<16x512xf32> -> vector<16x512xf32>
    %c0_9 = arith.constant 0 : index
    %c0_10 = arith.constant 0 : index
    %11 = vector.load %arg5[%c0_9, %c0_10] : memref<1x512xf32, #tpu.memory_space<vmem>>, vector<1x512xf32>
    %12 = vector.broadcast %11 : vector<1x512xf32> to vector<16x512xf32>
    %13 = arith.addf %10, %12 : vector<16x512xf32>
    %cst_11 = arith.constant 0.000000e+00 : f32
    %14 = vector.broadcast %cst_11 : f32 to vector<16x512xf32>
    %15 = arith.maximumf %13, %14 : vector<16x512xf32>
    %16 = arith.truncf %15 : vector<16x512xf32> to vector<16x512xbf16>
    %c0_12 = arith.constant 0 : index
    %c0_13 = arith.constant 0 : index
    %17 = vector.load %arg6[%c0_12, %c0_13] : memref<512x256xbf16, #tpu.memory_space<vmem>>, vector<512x256xbf16>
    %cst_14 = arith.constant dense<0.000000e+00> : vector<16x256xf32>
    %18 = tpu.matmul %16, %17, %cst_14 {dimension_numbers = #tpu.dot_dimension_numbers<[1], [0], [0], [1], [0, 0, 1, 1], [], []>} : vector<16x512xbf16>, vector<512x256xbf16>, vector<16x256xf32> -> vector<16x256xf32>
    %c0_15 = arith.constant 0 : index
    %c0_16 = arith.constant 0 : index
    %19 = vector.load %arg7[%c0_15, %c0_16] : memref<1x256xf32, #tpu.memory_space<vmem>>, vector<1x256xf32>
    %20 = vector.broadcast %19 : vector<1x256xf32> to vector<16x256xf32>
    %21 = arith.addf %18, %20 : vector<16x256xf32>
    %cst_17 = arith.constant 0.000000e+00 : f32
    %22 = vector.broadcast %cst_17 : f32 to vector<16x256xf32>
    %23 = arith.maximumf %21, %22 : vector<16x256xf32>
    %24 = arith.truncf %23 : vector<16x256xf32> to vector<16x256xbf16>
    %c0_18 = arith.constant 0 : index
    %c0_19 = arith.constant 0 : index
    %25 = vector.load %arg8[%c0_18, %c0_19] : memref<256x128xbf16, #tpu.memory_space<vmem>>, vector<256x128xbf16>
    %cst_20 = arith.constant dense<0.000000e+00> : vector<16x128xf32>
    %26 = tpu.matmul %24, %25, %cst_20 {dimension_numbers = #tpu.dot_dimension_numbers<[1], [0], [0], [1], [0, 0, 1, 1], [], []>} : vector<16x256xbf16>, vector<256x128xbf16>, vector<16x128xf32> -> vector<16x128xf32>
    %c0_21 = arith.constant 0 : index
    %c0_22 = arith.constant 0 : index
    %27 = vector.load %arg9[%c0_21, %c0_22] : memref<1x128xf32, #tpu.memory_space<vmem>>, vector<1x128xf32>
    %28 = vector.broadcast %27 : vector<1x128xf32> to vector<16x128xf32>
    %29 = arith.addf %26, %28 : vector<16x128xf32>
    %c0_23 = arith.constant 0 : index
    %c0_24 = arith.constant 0 : index
    %30 = vector.load %arg10[%c0_23, %c0_24] : memref<16x128xf32, #tpu.memory_space<vmem>>, vector<16x128xf32>
    tpu.vector_store %arg10[%c0_23, %c0_24], %29 {strides = array<i32>} : memref<16x128xf32, #tpu.memory_space<vmem>>, vector<16x128xf32>,
    return
  }
  func.func @transform_0(%arg0: i32) -> (i32, i32) {
    %c0_i32 = arith.constant 0 : i32
    %c0_i32_0 = arith.constant 0 : i32
    return %arg0, %c0_i32 : i32, i32
  }
  func.func @transform_1(%arg0: i32) -> (i32, i32) {
    %c0_i32 = arith.constant 0 : i32
    %c0_i32_0 = arith.constant 0 : i32
    %c0_i32_1 = arith.constant 0 : i32
    return %c0_i32, %c0_i32_0 : i32, i32
  }
  func.func @transform_2(%arg0: i32) -> (i32, i32) {
    %c0_i32 = arith.constant 0 : i32
    %c0_i32_0 = arith.constant 0 : i32
    %c0_i32_1 = arith.constant 0 : i32
    return %c0_i32, %c0_i32_0 : i32, i32
  }
  func.func @transform_3(%arg0: i32) -> (i32, i32) {
    %c0_i32 = arith.constant 0 : i32
    %c0_i32_0 = arith.constant 0 : i32
    %c0_i32_1 = arith.constant 0 : i32
    return %c0_i32, %c0_i32_0 : i32, i32
  }
  func.func @transform_4(%arg0: i32) -> (i32, i32) {
    %c0_i32 = arith.constant 0 : i32
    %c0_i32_0 = arith.constant 0 : i32
    %c0_i32_1 = arith.constant 0 : i32
    return %c0_i32, %c0_i32_0 : i32, i32
  }
  func.func @transform_5(%arg0: i32) -> (i32, i32) {
    %c0_i32 = arith.constant 0 : i32
    %c0_i32_0 = arith.constant 0 : i32
    %c0_i32_1 = arith.constant 0 : i32
    return %c0_i32, %c0_i32_0 : i32, i32
  }
  func.func @transform_6(%arg0: i32) -> (i32, i32) {
    %c0_i32 = arith.constant 0 : i32
    %c0_i32_0 = arith.constant 0 : i32
    %c0_i32_1 = arith.constant 0 : i32
    return %c0_i32, %c0_i32_0 : i32, i32
  }
  func.func @transform_7(%arg0: i32) -> (i32, i32) {
    %c0_i32 = arith.constant 0 : i32
    %c0_i32_0 = arith.constant 0 : i32
    %c0_i32_1 = arith.constant 0 : i32
    return %c0_i32, %c0_i32_0 : i32, i32
  }
  func.func @transform_8(%arg0: i32) -> (i32, i32) {
    %c0_i32 = arith.constant 0 : i32
    %c0_i32_0 = arith.constant 0 : i32
    %c0_i32_1 = arith.constant 0 : i32
    return %c0_i32, %c0_i32_0 : i32, i32
  }
  func.func @transform_9(%arg0: i32) -> (i32, i32) {
    %c0_i32 = arith.constant 0 : i32
    %c0_i32_0 = arith.constant 0 : i32
    return %arg0, %c0_i32 : i32, i32
  }
}

</mosaic_0001>

<bundles_post_ra>
// kernel: _forward_impl.1
= control target key start
LH: loop header
LB: loop body
LE: loop exit
PB: predicated region body
PF: predicated region fallthrough
CT: control target
= control target key end

     0   :  { %14 = vsyncpa [#allocation3], 0  ;;  %s7386_s0 = inlined_call_operand.vmem [shape: bf16[16,768], index: 0, kind: input, shape index: {}]   ;;  %s7387_s1 = inlined_call_operand.hbm [shape: bf16[768,1024], index: 1, kind: input, shape index: {}]   ;;  %s7388_s2 = inlined_call_operand.hbm [shape: f32[1,1024], index: 2, kind: input, shape index: {}]   ;;  %s7389_s3 = inlined_call_operand.hbm [shape: bf16[1024,512], index: 3, kind: input, shape index: {}]   ;;  %s7390_s4 = inlined_call_operand.hbm [shape: f32[1,512], index: 4, kind: input, shape index: {}]   ;;  %s7391_s5 = inlined_call_operand.hbm [shape: bf16[512,256], index: 5, kind: input, shape index: {}]   ;;  %s7392_s6 = inlined_call_operand.hbm [shape: f32[1,256], index: 6, kind: input, shape index: {}]   ;;  %s7393_s7 = inlined_call_operand.hbm [shape: bf16[256,128], index: 7, kind: input, shape index: {}]   ;;  %s7394_s8 = inlined_call_operand.hbm [shape: f32[1,128], index: 8, kind: input, shape index: {}]   ;;  %s7395_s9 = inlined_call_operand.vmem [shape: f32[16,128], index: 9, kind: output, shape index: {}]  }
   0x1   :  { %15 = vsyncpa [#allocation5], 0 }
   0x2   :  { %16 = vsyncpa [#allocation8], 0 }
   0x3   :  { %17 = vsyncpa [#allocation11], 0 }
   0x4   :  { %18 = vsyncpa [#allocation14], 0  ;;  %s7093_s30 = smov [#allocation4]   ;;  %s7094_s11 = smov [#allocation7]  }
   0x5   :  { %s39_s10 = sshll.u32 %s7093_s30, 4  ;;  %s61_s12 = sshll.u32 %s7094_s11, 4  ;;  %s40_s10 = int_to_ptr.vmem [resolvable:$true] %s39_s10  ;;  %s62_s12 = int_to_ptr.vmem [resolvable:$true] %s61_s12 }
   0x6   :  { %s6931_s13 = scalar_lea.vmem %s40_s10, 128  ;;  %p6936_p1 = scmp.lt.s32.totalorder %s40_s10, %s40_s10 }
   0x7   :  { %p6932_p0 = scmp.ne.s32.totalorder %s40_s10, %s6931_s13  ;;  %p6937_p2 = scmp.lt.s32.totalorder %s6931_s13, %s6931_s13 }
   0x9   :  { %p6938_p3 = por %p6937_p2, %p6936_p1 }
   0xb   :  { %p6939_p4 = pnand %p6938_p3, %p6932_p0 }
   0xd   :  { %6942 = shalt.err (!%p6939_p4)
}
   0xe   :  { %42 = dma.hbm_to_vmem [thread:$0]  %s7388_s2, 128, %s40_s10, [#allocation5]  }
   0xf   :  { %s6951_s16 = scalar_lea.vmem %s62_s12, 64  ;;  %p6956_p6 = scmp.lt.s32.totalorder %s62_s12, %s62_s12 }
  0x10   :  { %p6952_p5 = scmp.ne.s32.totalorder %s62_s12, %s6951_s16  ;;  %p6957_p7 = scmp.lt.s32.totalorder %s6951_s16, %s6951_s16 }
  0x12   :  { %p6958_p8 = por %p6957_p7, %p6956_p6 }
  0x14   :  { %p6959_p9 = pnand %p6958_p8, %p6952_p5 }
  0x16   :  { %6962 = shalt.err (!%p6959_p9)
}
  0x17   :  { %64 = dma.hbm_to_vmem [thread:$0]  %s7390_s4, 64, %s62_s12, [#allocation8]  }
  0x18   :  { %s7095_s19 = smov [#allocation10]   ;;  %s7096_s21 = smov [#allocation2]  }
  0x19   :  { %s83_s20 = sshll.u32 %s7095_s19, 4  ;;  %s26_s22 = sshll.u32 %s7096_s21, 4  ;;  %s84_s20 = int_to_ptr.vmem [resolvable:$true] %s83_s20  ;;  %s27_s22 = int_to_ptr.vmem [resolvable:$true] %s26_s22 }
  0x1a   :  { %s6971_s23 = scalar_lea.vmem %s84_s20, 32  ;;  %p6976_p11 = scmp.lt.s32.totalorder %s84_s20, %s84_s20 }
  0x1b   :  { %p6972_p10 = scmp.ne.s32.totalorder %s84_s20, %s6971_s23  ;;  %p6977_p12 = scmp.lt.s32.totalorder %s6971_s23, %s6971_s23 }
  0x1d   :  { %p6978_p13 = por %p6977_p12, %p6976_p11 }
  0x1f   :  { %p6979_p0 = pnand %p6978_p13, %p6972_p10 }
  0x21   :  { %6982 = shalt.err (!%p6979_p0)
}
  0x22   :  { %86 = dma.hbm_to_vmem [thread:$0]  %s7392_s6, 32, %s84_s20, [#allocation11]  }
  0x23   :  { %s6991_s25 = scalar_lea.vmem %s27_s22, 49152  ;;  %p6996_p2 = scmp.lt.s32.totalorder %s27_s22, %s27_s22 }
  0x24   :  { %p6992_p1 = scmp.ne.s32.totalorder %s27_s22, %s6991_s25  ;;  %p6997_p3 = scmp.lt.s32.totalorder %s6991_s25, %s6991_s25 }
  0x26   :  { %p6998_p4 = por %p6997_p3, %p6996_p2 }
  0x28   :  { %p6999_p5 = pnand %p6998_p4, %p6992_p1 }
  0x2a   :  { %7002 = shalt.err (!%p6999_p5)
}
  0x2b   :  { %s7097_s4 = smov 512   ;;  %s7098_s26 = smov 32  }
  0x2c   :  { %32 = dma.hbm_to_vmem [thread:$0]  %s7387_s1, 49152, %s27_s22, [#allocation3], %s7097_s4, %s7097_s4, %s7098_s26  }
  0x2d   :  { %s7099_s29 = smov [#allocation6]  }
  0x2e   :  { %s48_s30 = sshll.u32 %s7099_s29, 4  ;;  %s49_s30 = int_to_ptr.vmem [resolvable:$true] %s48_s30 }
  0x2f   :  { %s7011_s10 = scalar_lea.vmem %s49_s30, 32768  ;;  %p7016_p7 = scmp.lt.s32.totalorder %s49_s30, %s49_s30 }
  0x30   :  { %p7012_p6 = scmp.ne.s32.totalorder %s49_s30, %s7011_s10  ;;  %p7017_p8 = scmp.lt.s32.totalorder %s7011_s10, %s7011_s10 }
  0x32   :  { %p7018_p9 = por %p7017_p8, %p7016_p7 }
  0x34   :  { %p7019_p10 = pnand %p7018_p9, %p7012_p6 }
  0x36   :  { %7022 = shalt.err (!%p7019_p10)
}
  0x37   :  { %s7100_s6 = smov 256   ;;  %s7101_s11 = smov 16  }
  0x38   :  { %54 = dma.hbm_to_vmem [thread:$0]  %s7389_s3, 32768, %s49_s30, [#allocation5], %s7100_s6, %s7100_s6, %s7101_s11  }
  0x39   :  { %s7102_s14 = smov [#allocation9]  }
  0x3a   :  { %s70_s15 = sshll.u32 %s7102_s14, 4  ;;  %s71_s15 = int_to_ptr.vmem [resolvable:$true] %s70_s15 }
  0x3b   :  { %s7031_s1 = scalar_lea.vmem %s71_s15, 8192  ;;  %p7036_p12 = scmp.lt.s32.totalorder %s71_s15, %s71_s15 }
  0x3c   :  { %p7032_p11 = scmp.ne.s32.totalorder %s71_s15, %s7031_s1  ;;  %p7037_p13 = scmp.lt.s32.totalorder %s7031_s1, %s7031_s1 }
  0x3e   :  { %p7038_p0 = por %p7037_p13, %p7036_p12 }
  0x40   :  { %p7039_p1 = pnand %p7038_p0, %p7032_p11 }
  0x42   :  { %7042 = shalt.err (!%p7039_p1)
}
  0x43   :  { %s7103_s16 = smov 128   ;;  %s7104_s17 = smov 8  }
  0x44   :  { %76 = dma.hbm_to_vmem [thread:$0]  %s7391_s5, 8192, %s71_s15, [#allocation8], %s7103_s16, %s7103_s16, %s7104_s17  }
  0x45   :  { %s7105_s20 = smov [#allocation12]  }
  0x46   :  { %s92_s21 = sshll.u32 %s7105_s20, 4  ;;  %s93_s21 = int_to_ptr.vmem [resolvable:$true] %s92_s21 }
  0x47   :  { %s7051_s3 = scalar_lea.vmem %s93_s21, 2048  ;;  %p7056_p3 = scmp.lt.s32.totalorder %s93_s21, %s93_s21 }
  0x48   :  { %p7052_p2 = scmp.ne.s32.totalorder %s93_s21, %s7051_s3  ;;  %p7057_p4 = scmp.lt.s32.totalorder %s7051_s3, %s7051_s3 }
  0x4a   :  { %p7058_p5 = por %p7057_p4, %p7056_p3 }
  0x4c   :  { %p7059_p6 = pnand %p7058_p5, %p7052_p2 }
  0x4e   :  { %7062 = shalt.err (!%p7059_p6)
}
  0x4f   :  { %s7106_s22 = smov 64   ;;  %s7107_s23 = smov 4  }
  0x50   :  { %98 = dma.hbm_to_vmem [thread:$0]  %s7393_s7, 2048, %s93_s21, [#allocation11], %s7106_s22, %s7106_s22, %s7107_s23  }
  0x51   :  { %s7108_s25 = smov [#allocation13]  }
  0x52   :  { %s105_s4 = sshll.u32 %s7108_s25, 4  ;;  %s106_s4 = int_to_ptr.vmem [resolvable:$true] %s105_s4 }
  0x53   :  { %s7071_s5 = scalar_lea.vmem %s106_s4, 16  ;;  %s7075_s26 = scalar_lea.vmem %s106_s4, 32 }
  0x54   :  { %p7072_p7 = scmp.ne.s32.totalorder %s106_s4, %s7071_s5  ;;  %p7076_p8 = scmp.lt.s32.totalorder %s106_s4, %s106_s4 }
  0x55   :  { %p7077_p9 = scmp.lt.s32.totalorder %s7075_s26, %s7071_s5 }
  0x57   :  { %p7078_p10 = por %p7077_p9, %p7076_p8 }
  0x59   :  { %p7079_p11 = pnand %p7078_p10, %p7072_p7 }
  0x5b   :  { %7082 = shalt.err (!%p7079_p11)
}
  0x5c   :  { %108 = dma.hbm_to_vmem [thread:$0]  %s7394_s8, 16, %s106_s4, [#allocation14]  }
  0x5d   :  { %7083 = dma.done.wait [#allocation3], 49152  }
  0x5e   :  { %7084 = vsyncadd [#allocation3], 4294918144 }
  0x5f   :  { %7085 = dma.done.wait [#allocation5], 32896  }
  0x60   :  { %7086 = vsyncadd [#allocation5], 4294934400 }
  0x61   :  { %7087 = dma.done.wait [#allocation8], 8256  }
  0x62   :  { %7088 = vsyncadd [#allocation8], 4294959040 }
  0x63   :  { %7089 = dma.done.wait [#allocation11], 2080  }
  0x64   :  { %7090 = vsyncadd [#allocation11], 4294965216 }
  0x65   :  { %7091 = dma.done.wait [#allocation14], 16  }
  0x66   :  { %7092 = vsyncadd [#allocation14], 4294967280  ;;  %v196_v0 = vld [vmem:[#allocation2 + $0x1c0] sm:$0xff] }
  0x67   :  { %v200_v1 = vld [vmem:[#allocation2 + $0x1e0] sm:$0xff] }
  0x68   :  { %v324_v2 = vld [vmem:[#allocation2 + $0x5c0] sm:$0xff]  ;;  %v5708_v3 = vcombine.high %v196_v0, %v200_v1  ;;  %v5707_v5 = vcombine.low %v196_v0, %v200_v1 }
  0x69   :  { %v328_v4 = vld [vmem:[#allocation2 + $0x5e0] sm:$0xff] }
  0x6a   :  { %v188_v6 = vld [vmem:[#allocation2 + $0x180] sm:$0xff]  ;;  %v5836_v8 = vcombine.high %v324_v2, %v328_v4  ;;  %v5835_v9 = vcombine.low %v324_v2, %v328_v4  ;;  %2516 = vmatprep.subr.bf16.mxu0 %v5708_v3 }
  0x6b   :  { %v192_v7 = vld [vmem:[#allocation2 + $0x1a0] sm:$0xff]  ;;  %2517 = vmatpush1.bf16.msra.mxu0 %v5707_v5 }
  0x6c   :  { %v5700_v10 = vcombine.high %v188_v6, %v192_v7  ;;  %v316_v11 = vld [vmem:[#allocation2 + $0x580] sm:$0xff]  ;;  %2559 = vmatprep.subr.bf16.mxu1 %v5836_v8  ;;  %v5699_v18 = vcombine.low %v188_v6, %v192_v7 }
  0x6d   :  { %v320_v12 = vld [vmem:[#allocation2 + $0x5a0] sm:$0xff]  ;;  %2560 = vmatpush1.bf16.msra.mxu1 %v5835_v9 }
  0x6e   :  { %v180_v13 = vld [vmem:[#allocation2 + $0x140] sm:$0xff]  ;;  %v5828_v14 = vcombine.high %v316_v11, %v320_v12  ;;  %2518 = vmatprep.subr.bf16.mxu0 %v5700_v10  ;;  %v5827_v19 = vcombine.low %v316_v11, %v320_v12 }
  0x6f   :  { %v184_v15 = vld [vmem:[#allocation2 + $0x160] sm:$0xff]  ;;  %2519 = vmatpush1.bf16.msra.mxu0 %v5699_v18 }
  0x70   :  { %v308_v16 = vld [vmem:[#allocation2 + $0x540] sm:$0xff]  ;;  %v5692_v20 = vcombine.high %v180_v13, %v184_v15  ;;  %2561 = vmatprep.subr.bf16.mxu1 %v5828_v14  ;;  %v5691_v26 = vcombine.low %v180_v13, %v184_v15 }
  0x71   :  { %v312_v17 = vld [vmem:[#allocation2 + $0x560] sm:$0xff]  ;;  %2562 = vmatpush1.bf16.msra.mxu1 %v5827_v19 }
  0x72   :  { %v5820_v21 = vcombine.high %v308_v16, %v312_v17  ;;  %v172_v22 = vld [vmem:[#allocation2 + $0x100] sm:$0xff]  ;;  %2520 = vmatprep.subr.bf16.mxu0 %v5692_v20  ;;  %v5819_v27 = vcombine.low %v308_v16, %v312_v17 }
  0x73   :  { %v176_v23 = vld [vmem:[#allocation2 + $0x120] sm:$0xff]  ;;  %2521 = vmatpush1.bf16.msra.mxu0 %v5691_v26 }
  0x74   :  { %v300_v24 = vld [vmem:[#allocation2 + $0x500] sm:$0xff]  ;;  %v5684_v28 = vcombine.high %v172_v22, %v176_v23  ;;  %2563 = vmatprep.subr.bf16.mxu1 %v5820_v21  ;;  %v5683_v34 = vcombine.low %v172_v22, %v176_v23 }
  0x75   :  { %v304_v25 = vld [vmem:[#allocation2 + $0x520] sm:$0xff]  ;;  %2564 = vmatpush1.bf16.msra.mxu1 %v5819_v27 }
  0x76   :  { %v5812_v29 = vcombine.high %v300_v24, %v304_v25  ;;  %v164_v30 = vld [vmem:[#allocation2 + $0xc0] sm:$0xff]  ;;  %2522 = vmatprep.subr.bf16.mxu0 %v5684_v28  ;;  %v5811_v35 = vcombine.low %v300_v24, %v304_v25 }
  0x77   :  { %v168_v31 = vld [vmem:[#allocation2 + $0xe0] sm:$0xff]  ;;  %2523 = vmatpush1.bf16.msra.mxu0 %v5683_v34 }
  0x78   :  { %v292_v32 = vld [vmem:[#allocation2 + $0x4c0] sm:$0xff]  ;;  %v5676_v36 = vcombine.high %v164_v30, %v168_v31  ;;  %2565 = vmatprep.subr.bf16.mxu1 %v5812_v29  ;;  %v5675_v42 = vcombine.low %v164_v30, %v168_v31 }
  0x79   :  { %v296_v33 = vld [vmem:[#allocation2 + $0x4e0] sm:$0xff]  ;;  %2566 = vmatpush1.bf16.msra.mxu1 %v5811_v35 }
  0x7a   :  { %v5804_v37 = vcombine.high %v292_v32, %v296_v33  ;;  %v156_v38 = vld [vmem:[#allocation2 + $0x80] sm:$0xff]  ;;  %2524 = vmatprep.subr.bf16.mxu0 %v5676_v36  ;;  %v5803_v43 = vcombine.low %v292_v32, %v296_v33 }
  0x7b   :  { %v160_v39 = vld [vmem:[#allocation2 + $0xa0] sm:$0xff]  ;;  %2525 = vmatpush1.bf16.msra.mxu0 %v5675_v42 }
  0x7c   :  { %v284_v40 = vld [vmem:[#allocation2 + $0x480] sm:$0xff]  ;;  %v5668_v44 = vcombine.high %v156_v38, %v160_v39  ;;  %2567 = vmatprep.subr.bf16.mxu1 %v5804_v37  ;;  %v5667_v50 = vcombine.low %v156_v38, %v160_v39 }
  0x7d   :  { %v288_v41 = vld [vmem:[#allocation2 + $0x4a0] sm:$0xff]  ;;  %2568 = vmatpush1.bf16.msra.mxu1 %v5803_v43 }
  0x7e   :  { %v5796_v45 = vcombine.high %v284_v40, %v288_v41  ;;  %v148_v46 = vld [vmem:[#allocation2 + $0x40] sm:$0xff]  ;;  %2526 = vmatprep.subr.bf16.mxu0 %v5668_v44  ;;  %v5795_v52 = vcombine.low %v284_v40, %v288_v41 }
  0x7f   :  { %v152_v47 = vld [vmem:[#allocation2 + $0x60] sm:$0xff]  ;;  %2527 = vmatpush1.bf16.msra.mxu0 %v5667_v50 }
  0x80   :  { %v276_v48 = vld [vmem:[#allocation2 + $0x440] sm:$0xff]  ;;  %v5660_v53 = vcombine.high %v148_v46, %v152_v47  ;;  %2569 = vmatprep.subr.bf16.mxu1 %v5796_v45  ;;  %v5659_v60 = vcombine.low %v148_v46, %v152_v47 }
  0x81   :  { %v280_v49 = vld [vmem:[#allocation2 + $0x460] sm:$0xff]  ;;  %2570 = vmatpush1.bf16.msra.mxu1 %v5795_v52 }
  0x82   :  { %v140_v51 = vld [vmem:[#allocation2] sm:$0xff]  ;;  %v5788_v55 = vcombine.high %v276_v48, %v280_v49  ;;  %2528 = vmatprep.subr.bf16.mxu0 %v5660_v53  ;;  %v5787_v61 = vcombine.low %v276_v48, %v280_v49 }
  0x83   :  { %v144_v54 = vld [vmem:[#allocation2 + $0x20] sm:$0xff]  ;;  %2529 = vmatpush1.bf16.msra.mxu0 %v5659_v60 }
  0x84   :  { %v7186_v56 = vld [vmem:[%s7386_s0 + $0x4] ss:$24 sps:$4 sm:$0xff]   ;;  %v5652_v62 = vcombine.high %v140_v51, %v144_v54  ;;  %2571 = vmatprep.subr.bf16.mxu1 %v5788_v55  ;;  %v5651_v4 = vcombine.low %v140_v51, %v144_v54 }
  0x85   :  { %v268_v57 = vld [vmem:[#allocation2 + $0x400] sm:$0xff]  ;;  %2548 = vmatprep.mubr.bf16.mxu0 %v7186_v56  ;;  %2572 = vmatpush1.bf16.msra.mxu1 %v5787_v61 }
  0x86   :  { %v272_v58 = vld [vmem:[#allocation2 + $0x420] sm:$0xff]  ;;  %2530 = vmatprep.subr.bf16.mxu0 %v5652_v62 }
  0x87   :  { %v7191_v59 = vld [vmem:[%s7386_s0 + $0xc] ss:$24 sps:$4 sm:$0xff]   ;;  %v5780_v63 = vcombine.high %v268_v57, %v272_v58  ;;  %v5779_v5 = vcombine.low %v268_v57, %v272_v58  ;;  %2531 = vmatpush1.bf16.msra.mxu0 %v5651_v4 }
  0x88   :  { %v260_v0 = vld [vmem:[#allocation2 + $0x3c0] sm:$0xff]  ;;  %2591 = vmatprep.mubr.bf16.mxu1 %v7191_v59  ;;  %v197_v4 = vld [vmem:[#allocation2 + $0x1c8] sm:$0xff] }
  0x89   :  { %v264_v1 = vld [vmem:[#allocation2 + $0x3e0] sm:$0xff]  ;;  %2573 = vmatprep.subr.bf16.mxu1 %v5780_v63 }
  0x8a   :  { %v388_v2 = vld [vmem:[#allocation2 + $0x7c0] sm:$0xff]  ;;  %v5772_v6 = vcombine.high %v260_v0, %v264_v1  ;;  %v5771_v12 = vcombine.low %v260_v0, %v264_v1  ;;  %2574 = vmatpush1.bf16.msra.mxu1 %v5779_v5  ;;  %v201_v5 = vld [vmem:[#allocation2 + $0x1e8] sm:$0xff] }
  0x8b   :  { %v392_v3 = vld [vmem:[#allocation2 + $0x7e0] sm:$0xff] }
  0x8c   :  { %v5900_v7 = vcombine.high %v388_v2, %v392_v3  ;;  %v252_v8 = vld [vmem:[#allocation2 + $0x380] sm:$0xff]  ;;  %2532 = vmatprep.subr.bf16.mxu0 %v5772_v6  ;;  %v5899_v13 = vcombine.low %v388_v2, %v392_v3 }
  0x8d   :  { %v256_v9 = vld [vmem:[#allocation2 + $0x3a0] sm:$0xff]  ;;  %2533 = vmatpush2.bf16.msra.mxu0 %v5771_v12 }
  0x8e   :  { %v380_v10 = vld [vmem:[#allocation2 + $0x780] sm:$0xff]  ;;  %v5764_v14 = vcombine.high %v252_v8, %v256_v9  ;;  %2575 = vmatprep.subr.bf16.mxu1 %v5900_v7  ;;  %v5763_v20 = vcombine.low %v252_v8, %v256_v9  ;;  %v5710_v9 = vcombine.high %v197_v4, %v201_v5 }
  0x8f   :  { %v384_v11 = vld [vmem:[#allocation2 + $0x7a0] sm:$0xff]  ;;  %2576 = vmatpush2.bf16.msra.mxu1 %v5899_v13  ;;  %v189_v13 = vld [vmem:[#allocation2 + $0x188] sm:$0xff] }
  0x90   :  { %v5892_v15 = vcombine.high %v380_v10, %v384_v11  ;;  %v244_v16 = vld [vmem:[#allocation2 + $0x340] sm:$0xff]  ;;  %2534 = vmatprep.subr.bf16.mxu0 %v5764_v14  ;;  %v5891_v21 = vcombine.low %v380_v10, %v384_v11  ;;  %v193_v14 = vld [vmem:[#allocation2 + $0x1a8] sm:$0xff] }
  0x91   :  { %v248_v17 = vld [vmem:[#allocation2 + $0x360] sm:$0xff]  ;;  %2535 = vmatpush2.bf16.msra.mxu0 %v5763_v20 }
  0x92   :  { %v372_v18 = vld [vmem:[#allocation2 + $0x740] sm:$0xff]  ;;  %v5756_v22 = vcombine.high %v244_v16, %v248_v17  ;;  %2577 = vmatprep.subr.bf16.mxu1 %v5892_v15  ;;  %v5755_v28 = vcombine.low %v244_v16, %v248_v17  ;;  %v5709_v17 = vcombine.low %v197_v4, %v201_v5 }
  0x93   :  { %v376_v19 = vld [vmem:[#allocation2 + $0x760] sm:$0xff]  ;;  %2578 = vmatpush2.bf16.msra.mxu1 %v5891_v21 }
  0x94   :  { %v5884_v23 = vcombine.high %v372_v18, %v376_v19  ;;  %v236_v24 = vld [vmem:[#allocation2 + $0x300] sm:$0xff]  ;;  %2536 = vmatprep.subr.bf16.mxu0 %v5756_v22  ;;  %v5883_v29 = vcombine.low %v372_v18, %v376_v19  ;;  %v5702_v19 = vcombine.high %v189_v13, %v193_v14  ;;  %v7206_v22 = vld [vmem:[%s7386_s0 + $0x14] ss:$24 sps:$4 sm:$0xff]  }
  0x95   :  { %v240_v25 = vld [vmem:[#allocation2 + $0x320] sm:$0xff]  ;;  %2537 = vmatpush2.bf16.msra.mxu0 %v5755_v28 }
  0x96   :  { %v364_v26 = vld [vmem:[#allocation2 + $0x700] sm:$0xff]  ;;  %v5748_v30 = vcombine.high %v236_v24, %v240_v25  ;;  %2579 = vmatprep.subr.bf16.mxu1 %v5884_v23  ;;  %v5747_v36 = vcombine.low %v236_v24, %v240_v25  ;;  %v181_v23 = vld [vmem:[#allocation2 + $0x148] sm:$0xff] }
  0x97   :  { %v368_v27 = vld [vmem:[#allocation2 + $0x720] sm:$0xff]  ;;  %2580 = vmatpush2.bf16.msra.mxu1 %v5883_v29  ;;  %v185_v24 = vld [vmem:[#allocation2 + $0x168] sm:$0xff] }
  0x98   :  { %v5876_v31 = vcombine.high %v364_v26, %v368_v27  ;;  %v228_v32 = vld [vmem:[#allocation2 + $0x2c0] sm:$0xff]  ;;  %2538 = vmatprep.subr.bf16.mxu0 %v5748_v30  ;;  %v5875_v37 = vcombine.low %v364_v26, %v368_v27  ;;  %v5701_v26 = vcombine.low %v189_v13, %v193_v14  ;;  %v5694_v30 = vcombine.high %v181_v23, %v185_v24 }
  0x99   :  { %v232_v33 = vld [vmem:[#allocation2 + $0x2e0] sm:$0xff]  ;;  %2539 = vmatpush2.bf16.msra.mxu0 %v5747_v36 }
  0x9a   :  { %v356_v34 = vld [vmem:[#allocation2 + $0x6c0] sm:$0xff]  ;;  %v5740_v38 = vcombine.high %v228_v32, %v232_v33  ;;  %2581 = vmatprep.subr.bf16.mxu1 %v5876_v31  ;;  %v5739_v44 = vcombine.low %v228_v32, %v232_v33  ;;  %v173_v31 = vld [vmem:[#allocation2 + $0x108] sm:$0xff] }
  0x9b   :  { %v360_v35 = vld [vmem:[#allocation2 + $0x6e0] sm:$0xff]  ;;  %2582 = vmatpush2.bf16.msra.mxu1 %v5875_v37  ;;  %v177_v32 = vld [vmem:[#allocation2 + $0x128] sm:$0xff] }
  0x9c   :  { %v5868_v39 = vcombine.high %v356_v34, %v360_v35  ;;  %v220_v40 = vld [vmem:[#allocation2 + $0x280] sm:$0xff]  ;;  %2540 = vmatprep.subr.bf16.mxu0 %v5740_v38  ;;  %v5867_v45 = vcombine.low %v356_v34, %v360_v35  ;;  %v5693_v34 = vcombine.low %v181_v23, %v185_v24  ;;  %v165_v38 = vld [vmem:[#allocation2 + $0xc8] sm:$0xff] }
  0x9d   :  { %v224_v41 = vld [vmem:[#allocation2 + $0x2a0] sm:$0xff]  ;;  %2541 = vmatpush2.bf16.msra.mxu0 %v5739_v44 }
  0x9e   :  { %v348_v42 = vld [vmem:[#allocation2 + $0x680] sm:$0xff]  ;;  %v5732_v46 = vcombine.high %v220_v40, %v224_v41  ;;  %2583 = vmatprep.subr.bf16.mxu1 %v5868_v39  ;;  %v5731_v52 = vcombine.low %v220_v40, %v224_v41  ;;  %v5686_v39 = vcombine.high %v173_v31, %v177_v32  ;;  %v169_v40 = vld [vmem:[#allocation2 + $0xe8] sm:$0xff] }
  0x9f   :  { %v352_v43 = vld [vmem:[#allocation2 + $0x6a0] sm:$0xff]  ;;  %2584 = vmatpush2.bf16.msra.mxu1 %v5867_v45  ;;  %v157_v45 = vld [vmem:[#allocation2 + $0x88] sm:$0xff] }
  0xa0   :  { %v5860_v47 = vcombine.high %v348_v42, %v352_v43  ;;  %v212_v48 = vld [vmem:[#allocation2 + $0x240] sm:$0xff]  ;;  %2542 = vmatprep.subr.bf16.mxu0 %v5732_v46  ;;  %v5859_v53 = vcombine.low %v348_v42, %v352_v43  ;;  %v5685_v42 = vcombine.low %v173_v31, %v177_v32  ;;  %v5678_v46 = vcombine.high %v165_v38, %v169_v40 }
  0xa1   :  { %v216_v49 = vld [vmem:[#allocation2 + $0x260] sm:$0xff]  ;;  %2543 = vmatpush2.bf16.msra.mxu0 %v5731_v52 }
  0xa2   :  { %v340_v50 = vld [vmem:[#allocation2 + $0x640] sm:$0xff]  ;;  %v5724_v54 = vcombine.high %v212_v48, %v216_v49  ;;  %2585 = vmatprep.subr.bf16.mxu1 %v5860_v47  ;;  %v5723_v62 = vcombine.low %v212_v48, %v216_v49  ;;  %v161_v47 = vld [vmem:[#allocation2 + $0xa8] sm:$0xff]  ;;  %v5677_v49 = vcombine.low %v165_v38, %v169_v40 }
  0xa3   :  { %v344_v51 = vld [vmem:[#allocation2 + $0x660] sm:$0xff]  ;;  %2586 = vmatpush2.bf16.msra.mxu1 %v5859_v53  ;;  %v149_v53 = vld [vmem:[#allocation2 + $0x48] sm:$0xff] }
  0xa4   :  { %v5852_v55 = vcombine.high %v340_v50, %v344_v51  ;;  %v204_v57 = vld [vmem:[#allocation2 + $0x200] sm:$0xff]  ;;  %2544 = vmatprep.subr.bf16.mxu0 %v5724_v54  ;;  %v5851_v63 = vcombine.low %v340_v50, %v344_v51  ;;  %v5670_v54 = vcombine.high %v157_v45, %v161_v47 }
  0xa5   :  { %v208_v58 = vld [vmem:[#allocation2 + $0x220] sm:$0xff]  ;;  %2545 = vmatpush2.bf16.msra.mxu0 %v5723_v62 }
  0xa6   :  { %v332_v60 = vld [vmem:[#allocation2 + $0x600] sm:$0xff]  ;;  %v5716_v0 = vcombine.high %v204_v57, %v208_v58  ;;  %2587 = vmatprep.subr.bf16.mxu1 %v5852_v55  ;;  %v5715_v6 = vcombine.low %v204_v57, %v208_v58  ;;  %v153_v55 = vld [vmem:[#allocation2 + $0x68] sm:$0xff]  ;;  %v5669_v58 = vcombine.low %v157_v45, %v161_v47 }
  0xa7   :  { %v336_v61 = vld [vmem:[#allocation2 + $0x620] sm:$0xff]  ;;  %2588 = vmatpush2.bf16.msra.mxu1 %v5851_v63  ;;  %v141_v63 = vld [vmem:[#allocation2 + $0x8] sm:$0xff] }
  0xa8   :  { %v5844_v1 = vcombine.high %v332_v60, %v336_v61  ;;  %v452_v2 = vld [vmem:[#allocation2 + $0x9c0] sm:$0xff]  ;;  %2546 = vmatprep.subr.bf16.mxu0 %v5716_v0  ;;  %v5843_v7 = vcombine.low %v332_v60, %v336_v61  ;;  %v5662_v0 = vcombine.high %v149_v53, %v153_v55 }
  0xa9   :  { %v456_v3 = vld [vmem:[#allocation2 + $0x9e0] sm:$0xff]  ;;  %2547 = vmatpush2.bf16.msra.mxu0 %v5715_v6 }
  0xaa   :  { %v5964_v8 = vcombine.high %v452_v2, %v456_v3  ;;  %2589 = vmatprep.subr.bf16.mxu1 %v5844_v1  ;;  %v444_v10 = vld [vmem:[#allocation2 + $0x980] sm:$0xff]  ;;  %v5963_v16 = vcombine.low %v452_v2, %v456_v3  ;;  %v145_v1 = vld [vmem:[#allocation2 + $0x28] sm:$0xff]  ;;  %v5661_v3 = vcombine.low %v149_v53, %v153_v55 }
  0xab   :  { %v448_v11 = vld [vmem:[#allocation2 + $0x9a0] sm:$0xff]  ;;  %2590 = vmatpush2.bf16.msra.mxu1 %v5843_v7  ;;  %v261_v7 = vld [vmem:[#allocation2 + $0x3c8] sm:$0xff] }
  0xac   :  { %v7198_v12 = vld [vmem:[%s7386_s0] ss:$24 sps:$4 sm:$0xff]   ;;  %2602 = vmatprep.subr.bf16.mxu0 %v5964_v8  ;;  %v5956_v18 = vcombine.high %v444_v10, %v448_v11  ;;  %2645 = vmatprep.subr.bf16.mxu1 %v5710_v9  ;;  %v5955_v25 = vcombine.low %v444_v10, %v448_v11  ;;  %v5654_v8 = vcombine.high %v141_v63, %v145_v1  ;;  %v265_v9 = vld [vmem:[#allocation2 + $0x3e8] sm:$0xff] }
  0xad   :  { %v6415_v15 = vld [vmem:[%s7386_s0 + $0x8] ss:$24 sps:$4 sm:$0xff]   ;;  %2549 = vmatmul.mubr.bf16.vlgmr.msra.gmra.mxu0 %v7198_v12  ;;  %v5653_v11 = vcombine.low %v141_v63, %v145_v1 }
  0xae   :  { %v436_v20 = vld [vmem:[#allocation2 + $0x940] sm:$0xff]  ;;  %2592 = vmatmul.mubr.bf16.vlgmr.msra.gmra.mxu1 %v6415_v15  ;;  %2603 = vmatpush1.bf16.msra.mxu0 %v5963_v16  ;;  %v253_v16 = vld [vmem:[#allocation2 + $0x388] sm:$0xff] }
  0xaf   :  { %v440_v21 = vld [vmem:[#allocation2 + $0x960] sm:$0xff]  ;;  %2646 = vmatpush1.bf16.msra.mxu1 %v5709_v17  ;;  %2604 = vmatprep.subr.bf16.mxu0 %v5956_v18  ;;  %v5774_v17 = vcombine.high %v261_v7, %v265_v9  ;;  %v257_v18 = vld [vmem:[#allocation2 + $0x3a8] sm:$0xff] }
  0xb0   :  { %v5948_v27 = vcombine.high %v436_v20, %v440_v21  ;;  %v428_v28 = vld [vmem:[#allocation2 + $0x900] sm:$0xff]  ;;  %2647 = vmatprep.subr.bf16.mxu1 %v5702_v19  ;;  %2634 = vmatprep.mubr.bf16.mxu0 %v7206_v22  ;;  %v5947_v33 = vcombine.low %v436_v20, %v440_v21  ;;  %v5773_v20 = vcombine.low %v261_v7, %v265_v9  ;;  %v329_v9 = vld [vmem:[#allocation2 + $0x5e8] sm:$0xff] }
  0xb1   :  { %v432_v29 = vld [vmem:[#allocation2 + $0x920] sm:$0xff]  ;;  %2677 = vmatprep.mubr.bf16.mxu1 %v7186_v56 }
  0xb2   :  { %2605 = vmatpush1.bf16.msra.mxu0 %v5955_v25  ;;  %v5940_v35 = vcombine.high %v428_v28, %v432_v29  ;;  %v420_v36 = vld [vmem:[#allocation2 + $0x8c0] sm:$0xff]  ;;  %v5939_v41 = vcombine.low %v428_v28, %v432_v29  ;;  %v245_v25 = vld [vmem:[#allocation2 + $0x348] sm:$0xff]  ;;  %v5765_v29 = vcombine.low %v253_v16, %v257_v18 }
  0xb3   :  { %2648 = vmatpush1.bf16.msra.mxu1 %v5701_v26  ;;  %2606 = vmatprep.subr.bf16.mxu0 %v5948_v27  ;;  %v424_v37 = vld [vmem:[#allocation2 + $0x8e0] sm:$0xff]  ;;  %v5766_v26 = vcombine.high %v253_v16, %v257_v18  ;;  %v249_v27 = vld [vmem:[#allocation2 + $0x368] sm:$0xff] }
  0xb4   :  { %2649 = vmatprep.subr.bf16.mxu1 %v5694_v30  ;;  %v5932_v43 = vcombine.high %v420_v36, %v424_v37  ;;  %v412_v44 = vld [vmem:[#allocation2 + $0x880] sm:$0xff]  ;;  %v5931_v48 = vcombine.low %v420_v36, %v424_v37  ;;  %v5757_v37 = vcombine.low %v245_v25, %v249_v27  ;;  %v7214_v16 = vld [vmem:[%s7386_s0 + $0x10] ss:$24 sps:$4 sm:$0xff]  }
  0xb5   :  { %v416_v56 = vld [vmem:[#allocation2 + $0x8a0] sm:$0xff]  ;;  %v317_v18 = vld [vmem:[#allocation2 + $0x588] sm:$0xff] }
  0xb6   :  { %2607 = vmatpush1.bf16.msra.mxu0 %v5947_v33  ;;  %v5924_v50 = vcombine.high %v412_v44, %v416_v56  ;;  %v404_v51 = vld [vmem:[#allocation2 + $0x840] sm:$0xff]  ;;  %v5923_v57 = vcombine.low %v412_v44, %v416_v56  ;;  %v237_v33 = vld [vmem:[#allocation2 + $0x308] sm:$0xff] }
  0xb7   :  { %2650 = vmatpush1.bf16.msra.mxu1 %v5693_v34  ;;  %2608 = vmatprep.subr.bf16.mxu0 %v5940_v35  ;;  %v408_v52 = vld [vmem:[#allocation2 + $0x860] sm:$0xff]  ;;  %v5758_v34 = vcombine.high %v245_v25, %v249_v27  ;;  %v241_v35 = vld [vmem:[#allocation2 + $0x328] sm:$0xff] }
  0xb8   :  { %2651 = vmatprep.subr.bf16.mxu1 %v5686_v39  ;;  %v5916_v60 = vcombine.high %v404_v51, %v408_v52  ;;  %v396_v61 = vld [vmem:[#allocation2 + $0x800] sm:$0xff]  ;;  %v5915_v2 = vcombine.low %v404_v51, %v408_v52  ;;  %v5749_v56 = vcombine.low %v237_v33, %v241_v35  ;;  %v309_v27 = vld [vmem:[#allocation2 + $0x548] sm:$0xff] }
  0xb9   :  { %v400_v62 = vld [vmem:[#allocation2 + $0x820] sm:$0xff] }
  0xba   :  { %2609 = vmatpush1.bf16.msra.mxu0 %v5939_v41  ;;  %v5908_v4 = vcombine.high %v396_v61, %v400_v62  ;;  %v516_v5 = vld [vmem:[#allocation2 + $0xbc0] sm:$0xff]  ;;  %v5907_v10 = vcombine.low %v396_v61, %v400_v62  ;;  %v229_v41 = vld [vmem:[#allocation2 + $0x2c8] sm:$0xff] }
  0xbb   :  { %2652 = vmatpush1.bf16.msra.mxu1 %v5685_v42  ;;  %2610 = vmatprep.subr.bf16.mxu0 %v5932_v43  ;;  %v520_v6 = vld [vmem:[#allocation2 + $0xbe0] sm:$0xff]  ;;  %v5750_v42 = vcombine.high %v237_v33, %v241_v35  ;;  %v233_v43 = vld [vmem:[#allocation2 + $0x2e8] sm:$0xff] }
  0xbc   :  { %2653 = vmatprep.subr.bf16.mxu1 %v5678_v46  ;;  %v6028_v13 = vcombine.high %v516_v5, %v520_v6  ;;  %v508_v14 = vld [vmem:[#allocation2 + $0xb80] sm:$0xff]  ;;  %v6027_v19 = vcombine.low %v516_v5, %v520_v6  ;;  %v5741_v52 = vcombine.low %v229_v41, %v233_v43  ;;  %v301_v35 = vld [vmem:[#allocation2 + $0x508] sm:$0xff] }
  0xbd   :  { %v512_v15 = vld [vmem:[#allocation2 + $0xba0] sm:$0xff] }
  0xbe   :  { %2611 = vmatpush1.bf16.msra.mxu0 %v5931_v48  ;;  %v6020_v21 = vcombine.high %v508_v14, %v512_v15  ;;  %v500_v23 = vld [vmem:[#allocation2 + $0xb40] sm:$0xff]  ;;  %v6019_v28 = vcombine.low %v508_v14, %v512_v15  ;;  %v221_v48 = vld [vmem:[#allocation2 + $0x288] sm:$0xff] }
  0xbf   :  { %2654 = vmatpush1.bf16.msra.mxu1 %v5677_v49  ;;  %2612 = vmatprep.subr.bf16.mxu0 %v5924_v50  ;;  %v504_v24 = vld [vmem:[#allocation2 + $0xb60] sm:$0xff]  ;;  %v5742_v49 = vcombine.high %v229_v41, %v233_v43  ;;  %v225_v50 = vld [vmem:[#allocation2 + $0x2a8] sm:$0xff] }
  0xc0   :  { %2655 = vmatprep.subr.bf16.mxu1 %v5670_v54  ;;  %v6012_v30 = vcombine.high %v500_v23, %v504_v24  ;;  %v492_v31 = vld [vmem:[#allocation2 + $0xb00] sm:$0xff]  ;;  %v6011_v36 = vcombine.low %v500_v23, %v504_v24  ;;  %v5733_v62 = vcombine.low %v221_v48, %v225_v50  ;;  %v449_v23 = vld [vmem:[#allocation2 + $0x9a8] sm:$0xff] }
  0xc1   :  { %v496_v32 = vld [vmem:[#allocation2 + $0xb20] sm:$0xff]  ;;  %v297_v43 = vld [vmem:[#allocation2 + $0x4e8] sm:$0xff] }
  0xc2   :  { %2613 = vmatpush1.bf16.msra.mxu0 %v5923_v57  ;;  %v6004_v38 = vcombine.high %v492_v31, %v496_v32  ;;  %v484_v39 = vld [vmem:[#allocation2 + $0xac0] sm:$0xff]  ;;  %v6003_v44 = vcombine.low %v492_v31, %v496_v32  ;;  %v213_v57 = vld [vmem:[#allocation2 + $0x248] sm:$0xff] }
  0xc3   :  { %2656 = vmatpush1.bf16.msra.mxu1 %v5669_v58  ;;  %2614 = vmatprep.subr.bf16.mxu0 %v5916_v60  ;;  %v488_v40 = vld [vmem:[#allocation2 + $0xae0] sm:$0xff]  ;;  %v5734_v58 = vcombine.high %v221_v48, %v225_v50  ;;  %v217_v60 = vld [vmem:[#allocation2 + $0x268] sm:$0xff] }
  0xc4   :  { %2657 = vmatprep.subr.bf16.mxu1 %v5662_v0  ;;  %v5996_v45 = vcombine.high %v484_v39, %v488_v40  ;;  %v476_v46 = vld [vmem:[#allocation2 + $0xa80] sm:$0xff]  ;;  %v5995_v51 = vcombine.low %v484_v39, %v488_v40  ;;  %v5725_v6 = vcombine.low %v213_v57, %v217_v60  ;;  %v441_v31 = vld [vmem:[#allocation2 + $0x968] sm:$0xff] }
  0xc5   :  { %v480_v47 = vld [vmem:[#allocation2 + $0xaa0] sm:$0xff]  ;;  %v433_v39 = vld [vmem:[#allocation2 + $0x928] sm:$0xff] }
  0xc6   :  { %2615 = vmatpush1.bf16.msra.mxu0 %v5915_v2  ;;  %v5988_v53 = vcombine.high %v476_v46, %v480_v47  ;;  %v468_v54 = vld [vmem:[#allocation2 + $0xa40] sm:$0xff]  ;;  %v5987_v61 = vcombine.low %v476_v46, %v480_v47  ;;  %v205_v2 = vld [vmem:[#allocation2 + $0x208] sm:$0xff] }
  0xc7   :  { %2658 = vmatpush1.bf16.msra.mxu1 %v5661_v3  ;;  %2616 = vmatprep.subr.bf16.mxu0 %v5908_v4  ;;  %v472_v55 = vld [vmem:[#allocation2 + $0xa60] sm:$0xff]  ;;  %v5726_v3 = vcombine.high %v213_v57, %v217_v60  ;;  %v209_v4 = vld [vmem:[#allocation2 + $0x228] sm:$0xff] }
  0xc8   :  { %2659 = vmatprep.subr.bf16.mxu1 %v5654_v8  ;;  %v5980_v63 = vcombine.high %v468_v54, %v472_v55  ;;  %v460_v0 = vld [vmem:[#allocation2 + $0xa00] sm:$0xff]  ;;  %v5979_v5 = vcombine.low %v468_v54, %v472_v55  ;;  %v325_v8 = vld [vmem:[#allocation2 + $0x5c8] sm:$0xff]  ;;  %v5717_v15 = vcombine.low %v205_v2, %v209_v4 }
  0xc9   :  { %v464_v1 = vld [vmem:[#allocation2 + $0xa20] sm:$0xff]  ;;  %v5837_v24 = vcombine.low %v325_v8, %v329_v9  ;;  %v285_v48 = vld [vmem:[#allocation2 + $0x488] sm:$0xff] }
  0xca   :  { %2617 = vmatpush1.bf16.msra.mxu0 %v5907_v10  ;;  %v5972_v7 = vcombine.high %v460_v0, %v464_v1  ;;  %v453_v10 = vld [vmem:[#allocation2 + $0x9c8] sm:$0xff]  ;;  %v5971_v14 = vcombine.low %v460_v0, %v464_v1 }
  0xcb   :  { %2660 = vmatpush1.bf16.msra.mxu1 %v5653_v11  ;;  %2618 = vmatprep.subr.bf16.mxu0 %v6028_v13  ;;  %v5718_v11 = vcombine.high %v205_v2, %v209_v4  ;;  %v457_v13 = vld [vmem:[#allocation2 + $0x9e8] sm:$0xff] }
  0xcc   :  { %2661 = vmatprep.subr.bf16.mxu1 %v5774_v17  ;;  %v5838_v17 = vcombine.high %v325_v8, %v329_v9  ;;  %v5965_v25 = vcombine.low %v453_v10, %v457_v13  ;;  %v277_v55 = vld [vmem:[#allocation2 + $0x448] sm:$0xff] }
  0xcd   :  { %v281_v57 = vld [vmem:[#allocation2 + $0x468] sm:$0xff] }
  0xce   :  { %2619 = vmatpush2.bf16.msra.mxu0 %v6027_v19  ;;  %v321_v19 = vld [vmem:[#allocation2 + $0x5a8] sm:$0xff]  ;;  %v5790_v0 = vcombine.high %v277_v55, %v281_v57 }
  0xcf   :  { %2662 = vmatpush2.bf16.msra.mxu1 %v5773_v20  ;;  %2620 = vmatprep.subr.bf16.mxu0 %v6020_v21  ;;  %v445_v20 = vld [vmem:[#allocation2 + $0x988] sm:$0xff]  ;;  %v5966_v21 = vcombine.high %v453_v10, %v457_v13  ;;  %v5829_v32 = vcombine.low %v317_v18, %v321_v19 }
  0xd0   :  { %2663 = vmatprep.subr.bf16.mxu1 %v5766_v26  ;;  %v5830_v26 = vcombine.high %v317_v18, %v321_v19  ;;  %v5957_v33 = vcombine.low %v445_v20, %v449_v23  ;;  %v269_v1 = vld [vmem:[#allocation2 + $0x408] sm:$0xff] }
  0xd1   :  { %v273_v2 = vld [vmem:[#allocation2 + $0x428] sm:$0xff] }
  0xd2   :  { %2621 = vmatpush2.bf16.msra.mxu0 %v6019_v28  ;;  %v313_v28 = vld [vmem:[#allocation2 + $0x568] sm:$0xff]  ;;  %v5782_v8 = vcombine.high %v269_v1, %v273_v2 }
  0xd3   :  { %2664 = vmatpush2.bf16.msra.mxu1 %v5765_v29  ;;  %2622 = vmatprep.subr.bf16.mxu0 %v6012_v30  ;;  %v5958_v29 = vcombine.high %v445_v20, %v449_v23  ;;  %v437_v30 = vld [vmem:[#allocation2 + $0x948] sm:$0xff]  ;;  %v5821_v40 = vcombine.low %v309_v27, %v313_v28 }
  0xd4   :  { %2665 = vmatprep.subr.bf16.mxu1 %v5758_v34  ;;  %v5822_v34 = vcombine.high %v309_v27, %v313_v28  ;;  %v389_v9 = vld [vmem:[#allocation2 + $0x7c8] sm:$0xff] }
  0xd5   :  { %v393_v10 = vld [vmem:[#allocation2 + $0x7e8] sm:$0xff] }
  0xd6   :  { %2623 = vmatpush2.bf16.msra.mxu0 %v6011_v36  ;;  %v305_v36 = vld [vmem:[#allocation2 + $0x528] sm:$0xff]  ;;  %v5902_v18 = vcombine.high %v389_v9, %v393_v10 }
  0xd7   :  { %2666 = vmatpush2.bf16.msra.mxu1 %v5757_v37  ;;  %2624 = vmatprep.subr.bf16.mxu0 %v6004_v38  ;;  %v429_v37 = vld [vmem:[#allocation2 + $0x908] sm:$0xff]  ;;  %v5950_v38 = vcombine.high %v437_v30, %v441_v31  ;;  %v5814_v41 = vcombine.high %v301_v35, %v305_v36  ;;  %v5813_v46 = vcombine.low %v301_v35, %v305_v36 }
  0xd8   :  { %2667 = vmatprep.subr.bf16.mxu1 %v5750_v42  ;;  %v293_v42 = vld [vmem:[#allocation2 + $0x4c8] sm:$0xff]  ;;  %v5941_v47 = vcombine.low %v429_v37, %v433_v39 }
  0xd9   :  { %v381_v19 = vld [vmem:[#allocation2 + $0x788] sm:$0xff] }
  0xda   :  { %2625 = vmatpush2.bf16.msra.mxu0 %v6003_v44  ;;  %v421_v44 = vld [vmem:[#allocation2 + $0x8c8] sm:$0xff] }
  0xdb   :  { %2668 = vmatpush2.bf16.msra.mxu1 %v5749_v56  ;;  %2626 = vmatprep.subr.bf16.mxu0 %v5996_v45  ;;  %v5942_v56 = vcombine.high %v429_v37, %v433_v39  ;;  %v425_v45 = vld [vmem:[#allocation2 + $0x8e8] sm:$0xff] }
  0xdc   :  { %2669 = vmatprep.subr.bf16.mxu1 %v5742_v49  ;;  %v413_v49 = vld [vmem:[#allocation2 + $0x888] sm:$0xff]  ;;  %v5934_v50 = vcombine.high %v421_v44, %v425_v45 }
  0xdd   :  { %v385_v20 = vld [vmem:[#allocation2 + $0x7a8] sm:$0xff] }
  0xde   :  { %2627 = vmatpush2.bf16.msra.mxu0 %v5995_v51  ;;  %v417_v51 = vld [vmem:[#allocation2 + $0x8a8] sm:$0xff]  ;;  %v5894_v27 = vcombine.high %v381_v19, %v385_v20 }
  0xdf   :  { %2670 = vmatpush2.bf16.msra.mxu1 %v5741_v52  ;;  %2628 = vmatprep.subr.bf16.mxu0 %v5988_v53  ;;  %v5805_v52 = vcombine.low %v293_v42, %v297_v43  ;;  %v5933_v53 = vcombine.low %v421_v44, %v425_v45  ;;  %v5926_v60 = vcombine.high %v413_v49, %v417_v51  ;;  %v373_v28 = vld [vmem:[#allocation2 + $0x748] sm:$0xff] }
  0xe0   :  { %2671 = vmatprep.subr.bf16.mxu1 %v5734_v58  ;;  %v405_v58 = vld [vmem:[#allocation2 + $0x848] sm:$0xff] }
  0xe1   :  { %v365_v36 = vld [vmem:[#allocation2 + $0x708] sm:$0xff] }
  0xe2   :  { %2629 = vmatpush2.bf16.msra.mxu0 %v5987_v61  ;;  %v409_v61 = vld [vmem:[#allocation2 + $0x868] sm:$0xff] }
  0xe3   :  { %2672 = vmatpush2.bf16.msra.mxu1 %v5733_v62  ;;  %2630 = vmatprep.subr.bf16.mxu0 %v5980_v63  ;;  %v5925_v63 = vcombine.low %v413_v49, %v417_v51  ;;  %v5918_v4 = vcombine.high %v405_v58, %v409_v61  ;;  %v369_v37 = vld [vmem:[#allocation2 + $0x728] sm:$0xff] }
  0xe4   :  { %2673 = vmatprep.subr.bf16.mxu1 %v5726_v3  ;;  %v397_v3 = vld [vmem:[#allocation2 + $0x808] sm:$0xff] }
  0xe5   :  { %v361_v44 = vld [vmem:[#allocation2 + $0x6e8] sm:$0xff] }
  0xe6   :  { %2631 = vmatpush2.bf16.msra.mxu0 %v5979_v5  ;;  %v401_v5 = vld [vmem:[#allocation2 + $0x828] sm:$0xff] }
  0xe7   :  { %2674 = vmatpush2.bf16.msra.mxu1 %v5725_v6  ;;  %2632 = vmatprep.subr.bf16.mxu0 %v5972_v7  ;;  %v5789_v6 = vcombine.low %v277_v55, %v281_v57  ;;  %v5917_v7 = vcombine.low %v405_v58, %v409_v61  ;;  %v5910_v13 = vcombine.high %v397_v3, %v401_v5  ;;  %v353_v49 = vld [vmem:[#allocation2 + $0x6a8] sm:$0xff] }
  0xe8   :  { %2675 = vmatprep.subr.bf16.mxu1 %v5718_v11  ;;  %v517_v11 = vld [vmem:[#allocation2 + $0xbc8] sm:$0xff] }
  0xe9   :  { %v341_v57 = vld [vmem:[#allocation2 + $0x648] sm:$0xff] }
  0xea   :  { %2633 = vmatpush2.bf16.msra.mxu0 %v5971_v14  ;;  %v521_v14 = vld [vmem:[#allocation2 + $0xbe8] sm:$0xff] }
  0xeb   :  { %2676 = vmatpush2.bf16.msra.mxu1 %v5717_v15  ;;  %2688 = vmatprep.subr.bf16.mxu0 %v5838_v17  ;;  %v5781_v15 = vcombine.low %v269_v1, %v273_v2  ;;  %v5909_v17 = vcombine.low %v397_v3, %v401_v5  ;;  %v6030_v23 = vcombine.high %v517_v11, %v521_v14  ;;  %v345_v58 = vld [vmem:[#allocation2 + $0x668] sm:$0xff] }
  0xec   :  { %2731 = vmatprep.subr.bf16.mxu1 %v5966_v21  ;;  %v509_v21 = vld [vmem:[#allocation2 + $0xb88] sm:$0xff]  ;;  %v5854_v1 = vcombine.high %v341_v57, %v345_v58 }
  0xed   :  { %2635 = vmatmul.mubr.bf16.vlgmr.msra.gmra.mxu0 %v7214_v16  ;;  %v333_v2 = vld [vmem:[#allocation2 + $0x608] sm:$0xff] }
  0xee   :  { %2678 = vmatmul.mubr.bf16.vlgmr.msra.gmra.mxu1 %v7198_v12  ;;  %2689 = vmatpush1.bf16.msra.mxu0 %v5837_v24  ;;  %v5949_v12 = vcombine.low %v437_v30, %v441_v31  ;;  %v513_v24 = vld [vmem:[#allocation2 + $0xba8] sm:$0xff] }
  0xef   :  { %2732 = vmatpush1.bf16.msra.mxu1 %v5965_v25  ;;  %2690 = vmatprep.subr.bf16.mxu0 %v5830_v26  ;;  %v5901_v25 = vcombine.low %v389_v9, %v393_v10  ;;  %v6029_v26 = vcombine.low %v517_v11, %v521_v14  ;;  %v501_v30 = vld [vmem:[#allocation2 + $0xb48] sm:$0xff]  ;;  %v6022_v31 = vcombine.high %v509_v21, %v513_v24  ;;  %v198_v10 = vld [vmem:[#allocation2 + $0x1d0] sm:$0xff] }
  0xf0   :  { %2733 = vmatprep.subr.bf16.mxu1 %v5958_v29  ;;  %2720 = vmatprep.mubr.bf16.mxu0 %v7191_v59  ;;  %v5806_v59 = vcombine.high %v293_v42, %v297_v43  ;;  %v377_v29 = vld [vmem:[#allocation2 + $0x768] sm:$0xff]  ;;  %v5878_v42 = vcombine.high %v365_v36, %v369_v37  ;;  %v202_v11 = vld [vmem:[#allocation2 + $0x1f0] sm:$0xff] }
  0xf1   :  { %2763 = vmatprep.mubr.bf16.mxu1 %v7206_v22  ;;  %v289_v22 = vld [vmem:[#allocation2 + $0x4a8] sm:$0xff]  ;;  %v5886_v35 = vcombine.high %v373_v28, %v377_v29 }
  0xf2   :  { %2691 = vmatpush1.bf16.msra.mxu0 %v5829_v32  ;;  %v5798_v54 = vcombine.high %v285_v48, %v289_v22  ;;  %v5797_v62 = vcombine.low %v285_v48, %v289_v22  ;;  %v505_v32 = vld [vmem:[#allocation2 + $0xb68] sm:$0xff] }
  0xf3   :  { %2734 = vmatpush1.bf16.msra.mxu1 %v5957_v33  ;;  %2692 = vmatprep.subr.bf16.mxu0 %v5822_v34  ;;  %v5893_v33 = vcombine.low %v381_v19, %v385_v20  ;;  %v6021_v34 = vcombine.low %v509_v21, %v513_v24  ;;  %v6014_v39 = vcombine.high %v501_v30, %v505_v32  ;;  %v357_v43 = vld [vmem:[#allocation2 + $0x6c8] sm:$0xff]  ;;  %v190_v20 = vld [vmem:[#allocation2 + $0x190] sm:$0xff] }
  0xf4   :  { %2735 = vmatprep.subr.bf16.mxu1 %v5950_v38  ;;  %v493_v38 = vld [vmem:[#allocation2 + $0xb08] sm:$0xff]  ;;  %v5870_v48 = vcombine.high %v357_v43, %v361_v44  ;;  %v5712_v19 = vcombine.high %v198_v10, %v202_v11  ;;  %v194_v21 = vld [vmem:[#allocation2 + $0x1b0] sm:$0xff] }
  0xf5   :  { %v349_v22 = vld [vmem:[#allocation2 + $0x688] sm:$0xff] }
  0xf6   :  { %2693 = vmatpush1.bf16.msra.mxu0 %v5821_v40  ;;  %v497_v40 = vld [vmem:[#allocation2 + $0xb28] sm:$0xff]  ;;  %v5862_v55 = vcombine.high %v349_v22, %v353_v49 }
  0xf7   :  { %2736 = vmatpush1.bf16.msra.mxu1 %v5949_v12  ;;  %2694 = vmatprep.subr.bf16.mxu0 %v5814_v41  ;;  %v5885_v12 = vcombine.low %v373_v28, %v377_v29  ;;  %v6013_v41 = vcombine.low %v501_v30, %v505_v32  ;;  %v6006_v45 = vcombine.high %v493_v38, %v497_v40  ;;  %v337_v3 = vld [vmem:[#allocation2 + $0x628] sm:$0xff]  ;;  %v182_v29 = vld [vmem:[#allocation2 + $0x150] sm:$0xff] }
  0xf8   :  { %2737 = vmatprep.subr.bf16.mxu1 %v5942_v56  ;;  %v485_v56 = vld [vmem:[#allocation2 + $0xac8] sm:$0xff]  ;;  %v5846_v9 = vcombine.high %v333_v2, %v337_v3  ;;  %v5704_v28 = vcombine.high %v190_v20, %v194_v21  ;;  %v186_v30 = vld [vmem:[#allocation2 + $0x170] sm:$0xff] }
  0xfa   :  { %2695 = vmatpush1.bf16.msra.mxu0 %v5813_v46  ;;  %v489_v46 = vld [vmem:[#allocation2 + $0xae8] sm:$0xff] }
  0xfb   :  { %2738 = vmatpush1.bf16.msra.mxu1 %v5941_v47  ;;  %2696 = vmatprep.subr.bf16.mxu0 %v5806_v59  ;;  %v5877_v47 = vcombine.low %v365_v36, %v369_v37  ;;  %v6005_v59 = vcombine.low %v493_v38, %v497_v40  ;;  %v5998_v51 = vcombine.high %v485_v56, %v489_v46  ;;  %v174_v38 = vld [vmem:[#allocation2 + $0x110] sm:$0xff] }
  0xfc   :  { %2739 = vmatprep.subr.bf16.mxu1 %v5934_v50  ;;  %v477_v50 = vld [vmem:[#allocation2 + $0xa88] sm:$0xff]  ;;  %v5696_v37 = vcombine.high %v182_v29, %v186_v30  ;;  %v302_v40 = vld [vmem:[#allocation2 + $0x510] sm:$0xff] }
  0xfe   :  { %2697 = vmatpush1.bf16.msra.mxu0 %v5805_v52  ;;  %v481_v52 = vld [vmem:[#allocation2 + $0xaa8] sm:$0xff] }
  0xff   :  { %2740 = vmatpush1.bf16.msra.mxu1 %v5933_v53  ;;  %2698 = vmatprep.subr.bf16.mxu0 %v5798_v54  ;;  %v5869_v53 = vcombine.low %v357_v43, %v361_v44  ;;  %v5997_v54 = vcombine.low %v485_v56, %v489_v46  ;;  %v5990_v61 = vcombine.high %v477_v50, %v481_v52  ;;  %v170_v46 = vld [vmem:[#allocation2 + $0xf0] sm:$0xff] }
 0x100   :  { %2741 = vmatprep.subr.bf16.mxu1 %v5926_v60  ;;  %v469_v60 = vld [vmem:[#allocation2 + $0xa48] sm:$0xff]  ;;  %v5695_v43 = vcombine.low %v182_v29, %v186_v30 }
 0x102   :  { %2699 = vmatpush1.bf16.msra.mxu0 %v5797_v62  ;;  %v473_v62 = vld [vmem:[#allocation2 + $0xa68] sm:$0xff] }
 0x103   :  { %2742 = vmatpush1.bf16.msra.mxu1 %v5925_v63  ;;  %2700 = vmatprep.subr.bf16.mxu0 %v5790_v0  ;;  %v5861_v63 = vcombine.low %v349_v22, %v353_v49  ;;  %v5989_v0 = vcombine.low %v477_v50, %v481_v52  ;;  %v5982_v5 = vcombine.high %v469_v60, %v473_v62  ;;  %v162_v52 = vld [vmem:[#allocation2 + $0xb0] sm:$0xff] }
 0x104   :  { %2743 = vmatprep.subr.bf16.mxu1 %v5918_v4  ;;  %v461_v4 = vld [vmem:[#allocation2 + $0xa08] sm:$0xff] }
 0x106   :  { %2701 = vmatpush1.bf16.msra.mxu0 %v5789_v6  ;;  %v465_v6 = vld [vmem:[#allocation2 + $0xa28] sm:$0xff] }
 0x107   :  { %2744 = vmatpush1.bf16.msra.mxu1 %v5917_v7  ;;  %2702 = vmatprep.subr.bf16.mxu0 %v5782_v8  ;;  %v5853_v7 = vcombine.low %v341_v57, %v345_v58  ;;  %v5981_v8 = vcombine.low %v469_v60, %v473_v62  ;;  %v5974_v14 = vcombine.high %v461_v4, %v465_v6  ;;  %v154_v62 = vld [vmem:[#allocation2 + $0x70] sm:$0xff] }
 0x108   :  { %2745 = vmatprep.subr.bf16.mxu1 %v5910_v13  ;;  %v326_v13 = vld [vmem:[#allocation2 + $0x5d0] sm:$0xff] }
 0x10a   :  { %2703 = vmatpush1.bf16.msra.mxu0 %v5781_v15  ;;  %v330_v15 = vld [vmem:[#allocation2 + $0x5f0] sm:$0xff] }
 0x10b   :  { %2746 = vmatpush1.bf16.msra.mxu1 %v5909_v17  ;;  %2704 = vmatprep.subr.bf16.mxu0 %v5902_v18  ;;  %v5845_v17 = vcombine.low %v333_v2, %v337_v3  ;;  %v5973_v18 = vcombine.low %v461_v4, %v465_v6  ;;  %v5840_v24 = vcombine.high %v326_v13, %v330_v15  ;;  %v146_v6 = vld [vmem:[#allocation2 + $0x30] sm:$0xff] }
 0x10c   :  { %2747 = vmatprep.subr.bf16.mxu1 %v6030_v23  ;;  %v318_v23 = vld [vmem:[#allocation2 + $0x590] sm:$0xff] }
 0x10e   :  { %2705 = vmatpush2.bf16.msra.mxu0 %v5901_v25  ;;  %v322_v25 = vld [vmem:[#allocation2 + $0x5b0] sm:$0xff] }
 0x10f   :  { %2748 = vmatpush2.bf16.msra.mxu1 %v6029_v26  ;;  %2706 = vmatprep.subr.bf16.mxu0 %v5894_v27  ;;  %v5711_v26 = vcombine.low %v198_v10, %v202_v11  ;;  %v5839_v27 = vcombine.low %v326_v13, %v330_v15  ;;  %v5832_v32 = vcombine.high %v318_v23, %v322_v25  ;;  %v266_v15 = vld [vmem:[#allocation2 + $0x3f0] sm:$0xff] }
 0x110   :  { %2749 = vmatprep.subr.bf16.mxu1 %v6022_v31  ;;  %v310_v31 = vld [vmem:[#allocation2 + $0x550] sm:$0xff]  ;;  %v5831_v36 = vcombine.low %v318_v23, %v322_v25 }
 0x111   :  { %v258_v25 = vld [vmem:[#allocation2 + $0x3b0] sm:$0xff] }
 0x112   :  { %2707 = vmatpush2.bf16.msra.mxu0 %v5893_v33  ;;  %v314_v33 = vld [vmem:[#allocation2 + $0x570] sm:$0xff] }
 0x113   :  { %2750 = vmatpush2.bf16.msra.mxu1 %v6021_v34  ;;  %2708 = vmatprep.subr.bf16.mxu0 %v5886_v35  ;;  %v7223_v34 = vld [vmem:[%s7386_s0 + $0x8] ss:$24 sps:$4 sm:$0xff]   ;;  %v5703_v35 = vcombine.low %v190_v20, %v194_v21  ;;  %v5823_v44 = vcombine.low %v310_v31, %v314_v33 }
 0x114   :  { %2751 = vmatprep.subr.bf16.mxu1 %v6014_v39  ;;  %v178_v39 = vld [vmem:[#allocation2 + $0x130] sm:$0xff] }
 0x115   :  { %v5688_v56 = vcombine.high %v174_v38, %v178_v39  ;;  %v5687_v22 = vcombine.low %v174_v38, %v178_v39 }
 0x116   :  { %2709 = vmatpush2.bf16.msra.mxu0 %v5885_v12  ;;  %v5824_v12 = vcombine.high %v310_v31, %v314_v33  ;;  %v250_v33 = vld [vmem:[#allocation2 + $0x370] sm:$0xff] }
 0x117   :  { %2752 = vmatpush2.bf16.msra.mxu1 %v6013_v41  ;;  %2710 = vmatprep.subr.bf16.mxu0 %v5878_v42  ;;  %v306_v41 = vld [vmem:[#allocation2 + $0x530] sm:$0xff]  ;;  %v7230_v42 = vld [vmem:[%s7386_s0 + $0x4] ss:$24 sps:$4 sm:$0xff]  }
 0x118   :  { %2753 = vmatprep.subr.bf16.mxu1 %v6006_v45  ;;  %v166_v45 = vld [vmem:[#allocation2 + $0xd0] sm:$0xff]  ;;  %v5815_v49 = vcombine.low %v302_v40, %v306_v41 }
 0x119   :  { %v5680_v50 = vcombine.high %v166_v45, %v170_v46  ;;  %v5679_v57 = vcombine.low %v166_v45, %v170_v46 }
 0x11a   :  { %2711 = vmatpush2.bf16.msra.mxu0 %v5877_v47  ;;  %v294_v47 = vld [vmem:[#allocation2 + $0x4d0] sm:$0xff] }
 0x11b   :  { %2754 = vmatpush2.bf16.msra.mxu1 %v6005_v59  ;;  %2712 = vmatprep.subr.bf16.mxu0 %v5870_v48  ;;  %v5816_v59 = vcombine.high %v302_v40, %v306_v41  ;;  %v298_v48 = vld [vmem:[#allocation2 + $0x4f0] sm:$0xff] }
 0x11c   :  { %2755 = vmatprep.subr.bf16.mxu1 %v5998_v51  ;;  %v158_v51 = vld [vmem:[#allocation2 + $0x90] sm:$0xff]  ;;  %v5807_v58 = vcombine.low %v294_v47, %v298_v48 }
 0x11d   :  { %v5672_v60 = vcombine.high %v158_v51, %v162_v52  ;;  %v5671_v2 = vcombine.low %v158_v51, %v162_v52  ;;  %v242_v41 = vld [vmem:[#allocation2 + $0x330] sm:$0xff] }
 0x11e   :  { %2713 = vmatpush2.bf16.msra.mxu0 %v5869_v53  ;;  %v286_v53 = vld [vmem:[#allocation2 + $0x490] sm:$0xff] }
 0x11f   :  { %2756 = vmatpush2.bf16.msra.mxu1 %v5997_v54  ;;  %2714 = vmatprep.subr.bf16.mxu0 %v5862_v55  ;;  %v5808_v54 = vcombine.high %v294_v47, %v298_v48  ;;  %v290_v55 = vld [vmem:[#allocation2 + $0x4b0] sm:$0xff] }
 0x120   :  { %2757 = vmatprep.subr.bf16.mxu1 %v5990_v61  ;;  %v150_v61 = vld [vmem:[#allocation2 + $0x50] sm:$0xff]  ;;  %v5799_v3 = vcombine.low %v286_v53, %v290_v55 }
 0x121   :  { %v5664_v4 = vcombine.high %v150_v61, %v154_v62  ;;  %v5663_v10 = vcombine.low %v150_v61, %v154_v62  ;;  %v234_v48 = vld [vmem:[#allocation2 + $0x2f0] sm:$0xff] }
 0x122   :  { %2715 = vmatpush2.bf16.msra.mxu0 %v5861_v63  ;;  %v278_v63 = vld [vmem:[#allocation2 + $0x450] sm:$0xff] }
 0x123   :  { %2758 = vmatpush2.bf16.msra.mxu1 %v5989_v0  ;;  %2716 = vmatprep.subr.bf16.mxu0 %v5854_v1  ;;  %v5800_v0 = vcombine.high %v286_v53, %v290_v55  ;;  %v282_v1 = vld [vmem:[#allocation2 + $0x470] sm:$0xff] }
 0x124   :  { %2759 = vmatprep.subr.bf16.mxu1 %v5982_v5  ;;  %v142_v5 = vld [vmem:[#allocation2 + $0x10] sm:$0xff]  ;;  %v5791_v11 = vcombine.low %v278_v63, %v282_v1 }
 0x125   :  { %v5656_v13 = vcombine.high %v142_v5, %v146_v6  ;;  %v5655_v20 = vcombine.low %v142_v5, %v146_v6  ;;  %v226_v55 = vld [vmem:[#allocation2 + $0x2b0] sm:$0xff]  ;;  %v526_v6 = vlaneseq }
 0x126   :  { %2717 = vmatpush2.bf16.msra.mxu0 %v5853_v7  ;;  %v270_v7 = vld [vmem:[#allocation2 + $0x410] sm:$0xff] }
 0x127   :  { %2760 = vmatpush2.bf16.msra.mxu1 %v5981_v8  ;;  %2718 = vmatprep.subr.bf16.mxu0 %v5846_v9  ;;  %v5792_v8 = vcombine.high %v278_v63, %v282_v1  ;;  %v274_v9 = vld [vmem:[#allocation2 + $0x430] sm:$0xff] }
 0x128   :  { %2761 = vmatprep.subr.bf16.mxu1 %v5974_v14  ;;  %v262_v14 = vld [vmem:[#allocation2 + $0x3d0] sm:$0xff]  ;;  %v5783_v21 = vcombine.low %v270_v7, %v274_v9 }
 0x129   :  { %v5776_v23 = vcombine.high %v262_v14, %v266_v15  ;;  %v5775_v29 = vcombine.low %v262_v14, %v266_v15  ;;  %v218_v1 = vld [vmem:[#allocation2 + $0x270] sm:$0xff] }
 0x12a   :  { %2719 = vmatpush2.bf16.msra.mxu0 %v5845_v17  ;;  %v390_v17 = vld [vmem:[#allocation2 + $0x7d0] sm:$0xff] }
 0x12b   :  { %2762 = vmatpush2.bf16.msra.mxu1 %v5973_v18  ;;  %2774 = vmatprep.subr.bf16.mxu0 %v5712_v19  ;;  %v5784_v18 = vcombine.high %v270_v7, %v274_v9  ;;  %v394_v19 = vld [vmem:[#allocation2 + $0x7f0] sm:$0xff] }
 0x12c   :  { %2817 = vmatprep.subr.bf16.mxu1 %v5840_v24  ;;  %v254_v24 = vld [vmem:[#allocation2 + $0x390] sm:$0xff]  ;;  %v5903_v30 = vcombine.low %v390_v17, %v394_v19 }
 0x12d   :  { %2721 = vmatmul.mubr.bf16.vlgmr.msra.gmra.mxu0 %v7223_v34  ;;  %v5768_v31 = vcombine.high %v254_v24, %v258_v25  ;;  %v5767_v38 = vcombine.low %v254_v24, %v258_v25  ;;  %v206_v9 = vld [vmem:[#allocation2 + $0x210] sm:$0xff]  ;;  %v199_v24 = vld [vmem:[#allocation2 + $0x1d8] sm:$0xff] }
 0x12e   :  { %2764 = vmatmul.mubr.bf16.vlgmr.msra.gmra.mxu1 %v7214_v16  ;;  %2775 = vmatpush1.bf16.msra.mxu0 %v5711_v26  ;;  %v7236_v16 = vld [vmem:[%s7386_s0 + $0xc] ss:$24 sps:$4 sm:$0xff]   ;;  %v382_v26 = vld [vmem:[#allocation2 + $0x790] sm:$0xff]  ;;  %v203_v25 = vld [vmem:[#allocation2 + $0x1f8] sm:$0xff] }
 0x12f   :  { %2818 = vmatpush1.bf16.msra.mxu1 %v5839_v27  ;;  %2776 = vmatprep.subr.bf16.mxu0 %v5704_v28  ;;  %v5904_v27 = vcombine.high %v390_v17, %v394_v19  ;;  %v386_v28 = vld [vmem:[#allocation2 + $0x7b0] sm:$0xff]  ;;  %v7239_v17 = vshrl.u32 %v526_v6, 7  ;;  %v167_v6 = vld [vmem:[#allocation2 + $0xd8] sm:$0xff] }
 0x130   :  { %2819 = vmatprep.subr.bf16.mxu1 %v5832_v32  ;;  %2806 = vmatprep.mubr.bf16.mxu0 %v7230_v42  ;;  %v246_v32 = vld [vmem:[#allocation2 + $0x350] sm:$0xff]  ;;  %v5895_v39 = vcombine.low %v382_v26, %v386_v28 }
 0x131   :  { %2849 = vmatprep.mubr.bf16.mxu1 %v7236_v16  ;;  %v5760_v40 = vcombine.high %v246_v32, %v250_v33  ;;  %v5759_v45 = vcombine.low %v246_v32, %v250_v33  ;;  %v338_v14 = vld [vmem:[#allocation2 + $0x630] sm:$0xff] }
 0x132   :  { %2777 = vmatpush1.bf16.msra.mxu0 %v5703_v35  ;;  %v374_v35 = vld [vmem:[#allocation2 + $0x750] sm:$0xff] }
 0x133   :  { %2820 = vmatpush1.bf16.msra.mxu1 %v5831_v36  ;;  %2778 = vmatprep.subr.bf16.mxu0 %v5696_v37  ;;  %v5896_v36 = vcombine.high %v382_v26, %v386_v28  ;;  %v378_v37 = vld [vmem:[#allocation2 + $0x770] sm:$0xff] }
 0x134   :  { %2821 = vmatprep.subr.bf16.mxu1 %v5824_v12  ;;  %v238_v12 = vld [vmem:[#allocation2 + $0x310] sm:$0xff]  ;;  %v5887_v46 = vcombine.low %v374_v35, %v378_v37 }
 0x135   :  { %v5752_v47 = vcombine.high %v238_v12, %v242_v41  ;;  %v5751_v51 = vcombine.low %v238_v12, %v242_v41  ;;  %v446_v32 = vld [vmem:[#allocation2 + $0x990] sm:$0xff] }
 0x136   :  { %2779 = vmatpush1.bf16.msra.mxu0 %v5695_v43  ;;  %v366_v43 = vld [vmem:[#allocation2 + $0x710] sm:$0xff] }
 0x137   :  { %2822 = vmatpush1.bf16.msra.mxu1 %v5823_v44  ;;  %2780 = vmatprep.subr.bf16.mxu0 %v5688_v56  ;;  %v5888_v44 = vcombine.high %v374_v35, %v378_v37  ;;  %v370_v56 = vld [vmem:[#allocation2 + $0x730] sm:$0xff]  ;;  %v191_v35 = vld [vmem:[#allocation2 + $0x198] sm:$0xff] }
 0x138   :  { %2823 = vmatprep.subr.bf16.mxu1 %v5816_v59  ;;  %v230_v59 = vld [vmem:[#allocation2 + $0x2d0] sm:$0xff]  ;;  %v5879_v52 = vcombine.low %v366_v43, %v370_v56 }
 0x139   :  { %v5744_v53 = vcombine.high %v230_v59, %v234_v48  ;;  %v5743_v61 = vcombine.low %v230_v59, %v234_v48  ;;  %v450_v33 = vld [vmem:[#allocation2 + $0x9b0] sm:$0xff] }
 0x13a   :  { %2781 = vmatpush1.bf16.msra.mxu0 %v5687_v22  ;;  %v358_v22 = vld [vmem:[#allocation2 + $0x6d0] sm:$0xff]  ;;  %v5959_v48 = vcombine.low %v446_v32, %v450_v33 }
 0x13b   :  { %2824 = vmatpush1.bf16.msra.mxu1 %v5815_v49  ;;  %2782 = vmatprep.subr.bf16.mxu0 %v5680_v50  ;;  %v5880_v49 = vcombine.high %v366_v43, %v370_v56  ;;  %v362_v50 = vld [vmem:[#allocation2 + $0x6f0] sm:$0xff]  ;;  %v7251_v56 = vld [vmem:[%s7386_s0] ss:$24 sps:$4 sm:$0xff]  }
 0x13c   :  { %2825 = vmatprep.subr.bf16.mxu1 %v5808_v54  ;;  %v222_v54 = vld [vmem:[#allocation2 + $0x290] sm:$0xff]  ;;  %v5871_v62 = vcombine.low %v358_v22, %v362_v50 }
 0x13d   :  { %v5736_v63 = vcombine.high %v222_v54, %v226_v55  ;;  %v5735_v5 = vcombine.low %v222_v54, %v226_v55  ;;  %v438_v41 = vld [vmem:[#allocation2 + $0x950] sm:$0xff] }
 0x13e   :  { %2783 = vmatpush1.bf16.msra.mxu0 %v5679_v57  ;;  %v350_v57 = vld [vmem:[#allocation2 + $0x690] sm:$0xff] }
 0x13f   :  { %2826 = vmatpush1.bf16.msra.mxu1 %v5807_v58  ;;  %2784 = vmatprep.subr.bf16.mxu0 %v5672_v60  ;;  %v5872_v58 = vcombine.high %v358_v22, %v362_v50  ;;  %v354_v60 = vld [vmem:[#allocation2 + $0x6b0] sm:$0xff] }
 0x140   :  { %2827 = vmatprep.subr.bf16.mxu1 %v5800_v0  ;;  %v214_v0 = vld [vmem:[#allocation2 + $0x250] sm:$0xff]  ;;  %v5863_v7 = vcombine.low %v350_v57, %v354_v60 }
 0x141   :  { %v5727_v15 = vcombine.low %v214_v0, %v218_v1  ;;  %v442_v43 = vld [vmem:[#allocation2 + $0x970] sm:$0xff] }
 0x142   :  { %2785 = vmatpush1.bf16.msra.mxu0 %v5671_v2  ;;  %v342_v2 = vld [vmem:[#allocation2 + $0x650] sm:$0xff]  ;;  %v5952_v50 = vcombine.high %v438_v41, %v442_v43 }
 0x143   :  { %2828 = vmatpush1.bf16.msra.mxu1 %v5799_v3  ;;  %2786 = vmatprep.subr.bf16.mxu0 %v5664_v4  ;;  %v5864_v3 = vcombine.high %v350_v57, %v354_v60  ;;  %v346_v4 = vld [vmem:[#allocation2 + $0x670] sm:$0xff]  ;;  %v179_v60 = vld [vmem:[#allocation2 + $0x138] sm:$0xff] }
 0x144   :  { %2829 = vmatprep.subr.bf16.mxu1 %v5792_v8  ;;  %v5728_v8 = vcombine.high %v214_v0, %v218_v1  ;;  %v430_v54 = vld [vmem:[#allocation2 + $0x910] sm:$0xff] }
 0x145   :  { %v434_v55 = vld [vmem:[#allocation2 + $0x930] sm:$0xff] }
 0x146   :  { %2787 = vmatpush1.bf16.msra.mxu0 %v5663_v10  ;;  %v5856_v10 = vcombine.high %v342_v2, %v346_v4  ;;  %v5944_v1 = vcombine.high %v430_v54, %v434_v55 }
 0x147   :  { %2830 = vmatpush1.bf16.msra.mxu1 %v5791_v11  ;;  %2788 = vmatprep.subr.bf16.mxu0 %v5656_v13  ;;  %v210_v11 = vld [vmem:[#allocation2 + $0x230] sm:$0xff] }
 0x148   :  { %2831 = vmatprep.subr.bf16.mxu1 %v5784_v18  ;;  %v334_v13 = vld [vmem:[#allocation2 + $0x610] sm:$0xff]  ;;  %v5855_v18 = vcombine.low %v342_v2, %v346_v4  ;;  %v5720_v19 = vcombine.high %v206_v9, %v210_v11  ;;  %v5719_v26 = vcombine.low %v206_v9, %v210_v11 }
 0x149   :  { %v5847_v28 = vcombine.low %v334_v13, %v338_v14  ;;  %v422_v4 = vld [vmem:[#allocation2 + $0x8d0] sm:$0xff] }
 0x14a   :  { %2789 = vmatpush1.bf16.msra.mxu0 %v5655_v20  ;;  %v5848_v20 = vcombine.high %v334_v13, %v338_v14  ;;  %v414_v11 = vld [vmem:[#allocation2 + $0x890] sm:$0xff]  ;;  %v159_v14 = vld [vmem:[#allocation2 + $0x98] sm:$0xff] }
 0x14b   :  { %2832 = vmatpush1.bf16.msra.mxu1 %v5783_v21  ;;  %2790 = vmatprep.subr.bf16.mxu0 %v5776_v23  ;;  %v454_v21 = vld [vmem:[#allocation2 + $0x9d0] sm:$0xff] }
 0x14c   :  { %2833 = vmatprep.subr.bf16.mxu1 %v5904_v27  ;;  %v458_v23 = vld [vmem:[#allocation2 + $0x9f0] sm:$0xff]  ;;  %v7242_v27 = vsub.s32 0, %v7239_v17 }
 0x14d   :  { %v418_v13 = vld [vmem:[#allocation2 + $0x8b0] sm:$0xff] }
 0x14e   :  { %2791 = vmatpush2.bf16.msra.mxu0 %v5775_v29  ;;  %v7244_v29 = vld [vmem:[#allocation4] sm:$0xff] }
 0x14f   :  { %2834 = vmatpush2.bf16.msra.mxu1 %v5903_v30  ;;  %2792 = vmatprep.subr.bf16.mxu0 %v5768_v31  ;;  %v5968_v30 = vcombine.high %v454_v21, %v458_v23  ;;  %v5714_v31 = vcombine.high %v199_v24, %v203_v25  ;;  %v529_v37 = vrot.slane %v7244_v29, %v7242_v27 }
 0x150   :  { %2835 = vmatprep.subr.bf16.mxu1 %v5896_v36  ;;  %v195_v36 = vld [vmem:[#allocation2 + $0x1b8] sm:$0xff] }
 0x151   :  { %v5706_v12 = vcombine.high %v191_v35, %v195_v36 }
 0x152   :  { %2793 = vmatpush2.bf16.msra.mxu0 %v5767_v38  ;;  %v5967_v38 = vcombine.low %v454_v21, %v458_v23  ;;  %v406_v23 = vld [vmem:[#allocation2 + $0x850] sm:$0xff] }
 0x153   :  { %2836 = vmatpush2.bf16.msra.mxu1 %v5895_v39  ;;  %2794 = vmatprep.subr.bf16.mxu0 %v5760_v40  ;;  %v5713_v39 = vcombine.low %v199_v24, %v203_v25  ;;  %v5960_v40 = vcombine.high %v446_v32, %v450_v33  ;;  %v410_v24 = vld [vmem:[#allocation2 + $0x870] sm:$0xff]  ;;  %v151_v25 = vld [vmem:[#allocation2 + $0x58] sm:$0xff] }
 0x154   :  { %2837 = vmatprep.subr.bf16.mxu1 %v5888_v44  ;;  %v398_v33 = vld [vmem:[#allocation2 + $0x810] sm:$0xff] }
 0x156   :  { %2795 = vmatpush2.bf16.msra.mxu0 %v5759_v45  ;;  %v183_v45 = vld [vmem:[#allocation2 + $0x158] sm:$0xff] }
 0x157   :  { %2838 = vmatpush2.bf16.msra.mxu1 %v5887_v46  ;;  %2796 = vmatprep.subr.bf16.mxu0 %v5752_v47  ;;  %v187_v46 = vld [vmem:[#allocation2 + $0x178] sm:$0xff] }
 0x158   :  { %2839 = vmatprep.subr.bf16.mxu1 %v5880_v49  ;;  %v5705_v49 = vcombine.low %v191_v35, %v195_v36  ;;  %v5697_v0 = vcombine.low %v183_v45, %v187_v46  ;;  %v402_v35 = vld [vmem:[#allocation2 + $0x830] sm:$0xff]  ;;  %v143_v36 = vld [vmem:[#allocation2 + $0x18] sm:$0xff] }
 0x15a   :  { %2797 = vmatpush2.bf16.msra.mxu0 %v5751_v51 }
 0x15b   :  { %2840 = vmatpush2.bf16.msra.mxu1 %v5879_v52  ;;  %2798 = vmatprep.subr.bf16.mxu0 %v5744_v53  ;;  %v5698_v53 = vcombine.high %v183_v45, %v187_v46  ;;  %v267_v45 = vld [vmem:[#allocation2 + $0x3f8] sm:$0xff]  ;;  %v5911_v46 = vcombine.low %v398_v33, %v402_v35 }
 0x15c   :  { %2841 = vmatprep.subr.bf16.mxu1 %v5872_v58  ;;  %v175_v58 = vld [vmem:[#allocation2 + $0x118] sm:$0xff] }
 0x15e   :  { %2799 = vmatpush2.bf16.msra.mxu0 %v5743_v61 }
 0x15f   :  { %2842 = vmatpush2.bf16.msra.mxu1 %v5871_v62  ;;  %2800 = vmatprep.subr.bf16.mxu0 %v5736_v63  ;;  %v5951_v62 = vcombine.low %v438_v41, %v442_v43  ;;  %v518_v41 = vld [vmem:[#allocation2 + $0xbd0] sm:$0xff] }
 0x160   :  { %2843 = vmatprep.subr.bf16.mxu1 %v5864_v3  ;;  %v5690_v3 = vcombine.high %v175_v58, %v179_v60  ;;  %v522_v43 = vld [vmem:[#allocation2 + $0xbf0] sm:$0xff] }
 0x162   :  { %2801 = vmatpush2.bf16.msra.mxu0 %v5735_v5  ;;  %v426_v5 = vld [vmem:[#allocation2 + $0x8f0] sm:$0xff] }
 0x163   :  { %2844 = vmatpush2.bf16.msra.mxu1 %v5863_v7  ;;  %2802 = vmatprep.subr.bf16.mxu0 %v5728_v8  ;;  %v171_v7 = vld [vmem:[#allocation2 + $0xf8] sm:$0xff]  ;;  %v5943_v8 = vcombine.low %v430_v54, %v434_v55  ;;  %v5936_v9 = vcombine.high %v422_v4, %v426_v5  ;;  %v6031_v55 = vcombine.low %v518_v41, %v522_v43 }
 0x164   :  { %2845 = vmatprep.subr.bf16.mxu1 %v5856_v10  ;;  %v5682_v10 = vcombine.high %v167_v6, %v171_v7  ;;  %v259_v54 = vld [vmem:[#allocation2 + $0x3b8] sm:$0xff] }
 0x166   :  { %2803 = vmatpush2.bf16.msra.mxu0 %v5727_v15  ;;  %v163_v15 = vld [vmem:[#allocation2 + $0xb8] sm:$0xff] }
 0x167   :  { %2846 = vmatpush2.bf16.msra.mxu1 %v5855_v18  ;;  %2804 = vmatprep.subr.bf16.mxu0 %v5720_v19  ;;  %v5935_v18 = vcombine.low %v422_v4, %v426_v5  ;;  %v5681_v19 = vcombine.low %v167_v6, %v171_v7  ;;  %v5674_v21 = vcombine.high %v159_v14, %v163_v15  ;;  %v494_v6 = vld [vmem:[#allocation2 + $0xb10] sm:$0xff] }
 0x168   :  { %2847 = vmatprep.subr.bf16.mxu1 %v5848_v20  ;;  %v5928_v20 = vcombine.high %v414_v11, %v418_v13  ;;  %v498_v7 = vld [vmem:[#allocation2 + $0xb30] sm:$0xff] }
 0x16a   :  { %2805 = vmatpush2.bf16.msra.mxu0 %v5719_v26  ;;  %v155_v26 = vld [vmem:[#allocation2 + $0x78] sm:$0xff] }
 0x16b   :  { %2848 = vmatpush2.bf16.msra.mxu1 %v5847_v28  ;;  %2860 = vmatprep.subr.bf16.mxu0 %v5968_v30  ;;  %v5927_v28 = vcombine.low %v414_v11, %v418_v13  ;;  %v5673_v30 = vcombine.low %v159_v14, %v163_v15  ;;  %v5666_v32 = vcombine.high %v151_v25, %v155_v26  ;;  %v486_v14 = vld [vmem:[#allocation2 + $0xad0] sm:$0xff] }
 0x16c   :  { %2903 = vmatprep.subr.bf16.mxu1 %v5714_v31  ;;  %v5920_v31 = vcombine.high %v406_v23, %v410_v24  ;;  %v6008_v11 = vcombine.high %v494_v6, %v498_v7  ;;  %v490_v15 = vld [vmem:[#allocation2 + $0xaf0] sm:$0xff] }
 0x16d   :  { %v2550_v44 = vpop.f32.mrf.mxu0  ;;  %2807 = vmatmul.mubr.bf16.vlgmr.msra.gmra.mxu0 %v7251_v56 }
 0x16e   :  { %v2551_v47 = vadd.f32 %v2550_v44, %v529_v37  ;;  %v2593_v59 = vpop.f32.mrf.mxu1  ;;  %2850 = vmatmul.mubr.bf16.vlgmr.msra.gmra.mxu1 %v7223_v34  ;;  %2861 = vmatpush1.bf16.msra.mxu0 %v5967_v38  ;;  %v7264_v34 = vld [vmem:[%s7386_s0 + $0x14] ss:$24 sps:$4 sm:$0xff]   ;;  %v5919_v38 = vcombine.low %v406_v23, %v410_v24  ;;  %v263_v44 = vld [vmem:[#allocation2 + $0x3d8] sm:$0xff]  ;;  %v6000_v23 = vcombine.high %v486_v14, %v490_v15 }
 0x16f   :  { %2904 = vmatpush1.bf16.msra.mxu1 %v5713_v39  ;;  %v7255_v22 = vpop.f32.mrf.mxu0  ;;  %2862 = vmatprep.subr.bf16.mxu0 %v5960_v40  ;;  %v5665_v39 = vcombine.low %v151_v25, %v155_v26  ;;  %v5912_v40 = vcombine.high %v398_v33, %v402_v35  ;;  %v478_v25 = vld [vmem:[#allocation2 + $0xa90] sm:$0xff] }
 0x170   :  { %v7257_v51 = vadd.f32 %v2593_v59, %v2551_v47  ;;  %v7259_v52 = vpop.f32.mrf.mxu1  ;;  %2905 = vmatprep.subr.bf16.mxu1 %v5706_v12  ;;  %2892 = vmatprep.mubr.bf16.mxu0 %v7264_v34  ;;  %v6032_v59 = vcombine.high %v518_v41, %v522_v43  ;;  %v482_v26 = vld [vmem:[#allocation2 + $0xab0] sm:$0xff] }
 0x171   :  { %v2554_v57 = vpop.f32.mrf.mxu0  ;;  %2935 = vmatprep.mubr.bf16.mxu1 %v7230_v42  ;;  %v5689_v42 = vcombine.low %v175_v58, %v179_v60  ;;  %v5992_v33 = vcombine.high %v478_v25, %v482_v26 }
 0x172   :  { %v2555_v61 = vadd.f32 %v2554_v57, %v529_v37  ;;  %2863 = vmatpush1.bf16.msra.mxu0 %v5959_v48  ;;  %v2597_v63 = vpop.f32.mrf.mxu1  ;;  %v147_v37 = vld [vmem:[#allocation2 + $0x38] sm:$0xff]  ;;  %v5778_v48 = vcombine.high %v263_v44, %v267_v45  ;;  %v5777_v57 = vcombine.low %v263_v44, %v267_v45  ;;  %v462_v44 = vld [vmem:[#allocation2 + $0xa10] sm:$0xff] }
 0x173   :  { %2906 = vmatpush1.bf16.msra.mxu1 %v5705_v49  ;;  %2864 = vmatprep.subr.bf16.mxu0 %v5952_v50  ;;  %v5658_v12 = vcombine.high %v143_v36, %v147_v37  ;;  %v5657_v47 = vcombine.low %v143_v36, %v147_v37  ;;  %v510_v49 = vld [vmem:[#allocation2 + $0xb90] sm:$0xff] }
 0x174   :  { %v7268_v2 = vadd.f32 %v2597_v63, %v2555_v61  ;;  %2907 = vmatprep.subr.bf16.mxu1 %v5698_v53  ;;  %v514_v50 = vld [vmem:[#allocation2 + $0xbb0] sm:$0xff]  ;;  %v255_v53 = vld [vmem:[#allocation2 + $0x398] sm:$0xff] }
 0x175   :  { %v6024_v58 = vcombine.high %v510_v49, %v514_v50  ;;  %v5770_v60 = vcombine.high %v255_v53, %v259_v54  ;;  %v502_v61 = vld [vmem:[#allocation2 + $0xb50] sm:$0xff]  ;;  %v247_v63 = vld [vmem:[#allocation2 + $0x358] sm:$0xff] }
 0x176   :  { %2865 = vmatpush1.bf16.msra.mxu0 %v5951_v62  ;;  %v506_v62 = vld [vmem:[#allocation2 + $0xb70] sm:$0xff] }
 0x177   :  { %2908 = vmatpush1.bf16.msra.mxu1 %v5697_v0  ;;  %2866 = vmatprep.subr.bf16.mxu0 %v5944_v1  ;;  %v251_v0 = vld [vmem:[#allocation2 + $0x378] sm:$0xff]  ;;  %v6023_v1 = vcombine.low %v510_v49, %v514_v50  ;;  %v6016_v4 = vcombine.high %v502_v61, %v506_v62  ;;  %v470_v36 = vld [vmem:[#allocation2 + $0xa50] sm:$0xff] }
 0x178   :  { %2909 = vmatprep.subr.bf16.mxu1 %v5690_v3  ;;  %v5769_v3 = vcombine.low %v255_v53, %v259_v54  ;;  %v5762_v5 = vcombine.high %v247_v63, %v251_v0  ;;  %v474_v37 = vld [vmem:[#allocation2 + $0xa70] sm:$0xff]  ;;  %v327_v53 = vld [vmem:[#allocation2 + $0x5d8] sm:$0xff] }
 0x179   :  { %v5984_v41 = vcombine.high %v470_v36, %v474_v37  ;;  %v466_v45 = vld [vmem:[#allocation2 + $0xa30] sm:$0xff]  ;;  %v331_v54 = vld [vmem:[#allocation2 + $0x5f8] sm:$0xff] }
 0x17a   :  { %2867 = vmatpush1.bf16.msra.mxu0 %v5943_v8  ;;  %v239_v8 = vld [vmem:[#allocation2 + $0x318] sm:$0xff]  ;;  %v5976_v49 = vcombine.high %v462_v44, %v466_v45 }
 0x17b   :  { %2910 = vmatpush1.bf16.msra.mxu1 %v5689_v42  ;;  %2868 = vmatprep.subr.bf16.mxu0 %v5936_v9  ;;  %v243_v42 = vld [vmem:[#allocation2 + $0x338] sm:$0xff]  ;;  %v6015_v9 = vcombine.low %v502_v61, %v506_v62  ;;  %v5842_v61 = vcombine.high %v327_v53, %v331_v54 }
 0x17c   :  { %2911 = vmatprep.subr.bf16.mxu1 %v5682_v10  ;;  %v5761_v10 = vcombine.low %v247_v63, %v251_v0  ;;  %v5754_v13 = vcombine.high %v239_v8, %v243_v42  ;;  %v319_v63 = vld [vmem:[#allocation2 + $0x598] sm:$0xff] }
 0x17d   :  { %v323_v0 = vld [vmem:[#allocation2 + $0x5b8] sm:$0xff] }
 0x17e   :  { %2869 = vmatpush1.bf16.msra.mxu0 %v5935_v18  ;;  %v231_v18 = vld [vmem:[#allocation2 + $0x2d8] sm:$0xff] }
 0x17f   :  { %2912 = vmatpush1.bf16.msra.mxu1 %v5681_v19  ;;  %2870 = vmatprep.subr.bf16.mxu0 %v5928_v20  ;;  %v235_v19 = vld [vmem:[#allocation2 + $0x2f8] sm:$0xff]  ;;  %v6007_v20 = vcombine.low %v494_v6, %v498_v7  ;;  %v5834_v7 = vcombine.high %v319_v63, %v323_v0 }
 0x180   :  { %2913 = vmatprep.subr.bf16.mxu1 %v5674_v21  ;;  %v5753_v21 = vcombine.low %v239_v8, %v243_v42  ;;  %v5746_v24 = vcombine.high %v231_v18, %v235_v19  ;;  %v311_v42 = vld [vmem:[#allocation2 + $0x558] sm:$0xff] }
 0x182   :  { %2871 = vmatpush1.bf16.msra.mxu0 %v5927_v28  ;;  %v223_v28 = vld [vmem:[#allocation2 + $0x298] sm:$0xff] }
 0x183   :  { %2914 = vmatpush1.bf16.msra.mxu1 %v5673_v30  ;;  %2872 = vmatprep.subr.bf16.mxu0 %v5920_v31  ;;  %v227_v30 = vld [vmem:[#allocation2 + $0x2b8] sm:$0xff]  ;;  %v5999_v31 = vcombine.low %v486_v14, %v490_v15 }
 0x184   :  { %2915 = vmatprep.subr.bf16.mxu1 %v5666_v32  ;;  %v5745_v32 = vcombine.low %v231_v18, %v235_v19  ;;  %v5738_v35 = vcombine.high %v223_v28, %v227_v30  ;;  %v443_v14 = vld [vmem:[#allocation2 + $0x978] sm:$0xff]  ;;  %v5833_v18 = vcombine.low %v319_v63, %v323_v0 }
 0x185   :  { %v275_v63 = vld [vmem:[#allocation2 + $0x438] sm:$0xff] }
 0x186   :  { %2873 = vmatpush1.bf16.msra.mxu0 %v5919_v38  ;;  %v215_v38 = vld [vmem:[#allocation2 + $0x258] sm:$0xff] }
 0x187   :  { %2916 = vmatpush1.bf16.msra.mxu1 %v5665_v39  ;;  %2874 = vmatprep.subr.bf16.mxu0 %v5912_v40  ;;  %v219_v39 = vld [vmem:[#allocation2 + $0x278] sm:$0xff]  ;;  %v5991_v40 = vcombine.low %v478_v25, %v482_v26 }
 0x188   :  { %2917 = vmatprep.subr.bf16.mxu1 %v5658_v12  ;;  %v5737_v12 = vcombine.low %v223_v28, %v227_v30  ;;  %v5730_v43 = vcombine.high %v215_v38, %v219_v39  ;;  %v307_v25 = vld [vmem:[#allocation2 + $0x538] sm:$0xff] }
 0x189   :  { %v431_v28 = vld [vmem:[#allocation2 + $0x918] sm:$0xff] }
 0x18a   :  { %2875 = vmatpush1.bf16.msra.mxu0 %v5911_v46  ;;  %v207_v46 = vld [vmem:[#allocation2 + $0x218] sm:$0xff] }
 0x18b   :  { %2918 = vmatpush1.bf16.msra.mxu1 %v5657_v47  ;;  %2876 = vmatprep.subr.bf16.mxu0 %v6032_v59  ;;  %v211_v47 = vld [vmem:[#allocation2 + $0x238] sm:$0xff]  ;;  %v5983_v59 = vcombine.low %v470_v36, %v474_v37 }
 0x18c   :  { %2919 = vmatprep.subr.bf16.mxu1 %v5778_v48  ;;  %v5729_v48 = vcombine.low %v215_v38, %v219_v39  ;;  %v5722_v50 = vcombine.high %v207_v46, %v211_v47  ;;  %v435_v30 = vld [vmem:[#allocation2 + $0x938] sm:$0xff] }
 0x18d   :  { %v5946_v36 = vcombine.high %v431_v28, %v435_v30  ;;  %v295_v37 = vld [vmem:[#allocation2 + $0x4d8] sm:$0xff] }
 0x18e   :  { %2877 = vmatpush2.bf16.msra.mxu0 %v6031_v55  ;;  %v455_v55 = vld [vmem:[#allocation2 + $0x9d8] sm:$0xff] }
 0x18f   :  { %2920 = vmatpush2.bf16.msra.mxu1 %v5777_v57  ;;  %2878 = vmatprep.subr.bf16.mxu0 %v6024_v58  ;;  %v459_v57 = vld [vmem:[#allocation2 + $0x9f8] sm:$0xff]  ;;  %v5975_v58 = vcombine.low %v462_v44, %v466_v45 }
 0x190   :  { %2921 = vmatprep.subr.bf16.mxu1 %v5770_v60  ;;  %v5721_v60 = vcombine.low %v207_v46, %v211_v47  ;;  %v5970_v62 = vcombine.high %v455_v55, %v459_v57  ;;  %v5969_v6 = vcombine.low %v455_v55, %v459_v57  ;;  %v299_v38 = vld [vmem:[#allocation2 + $0x4f8] sm:$0xff] }
 0x191   :  { %v427_v39 = vld [vmem:[#allocation2 + $0x8f8] sm:$0xff]  ;;  %v5809_v47 = vcombine.low %v295_v37, %v299_v38 }
 0x192   :  { %2879 = vmatpush2.bf16.msra.mxu0 %v6023_v1  ;;  %v447_v1 = vld [vmem:[#allocation2 + $0x998] sm:$0xff] }
 0x193   :  { %2922 = vmatpush2.bf16.msra.mxu1 %v5769_v3  ;;  %2880 = vmatprep.subr.bf16.mxu0 %v6016_v4  ;;  %v451_v3 = vld [vmem:[#allocation2 + $0x9b8] sm:$0xff]  ;;  %v5841_v4 = vcombine.low %v327_v53, %v331_v54 }
 0x194   :  { %2923 = vmatprep.subr.bf16.mxu1 %v5762_v5  ;;  %v7270_v5 = vpop.f32.mrf.mxu0  ;;  %v5962_v8 = vcombine.high %v447_v1, %v451_v3  ;;  %v291_v44 = vld [vmem:[#allocation2 + $0x4b8] sm:$0xff] }
 0x195   :  { %v415_v45 = vld [vmem:[#allocation2 + $0x898] sm:$0xff] }
 0x196   :  { %2881 = vmatpush2.bf16.msra.mxu0 %v6015_v9  ;;  %v315_v9 = vld [vmem:[#allocation2 + $0x578] sm:$0xff] }
 0x197   :  { %2924 = vmatpush2.bf16.msra.mxu1 %v5761_v10  ;;  %2882 = vmatprep.subr.bf16.mxu0 %v6008_v11  ;;  %v7275_v11 = vld [vmem:[%s7386_s0 + $0x10] ss:$24 sps:$4 sm:$0xff]   ;;  %v419_v46 = vld [vmem:[#allocation2 + $0x8b8] sm:$0xff] }
 0x198   :  { %2925 = vmatprep.subr.bf16.mxu1 %v5754_v13  ;;  %v439_v13 = vld [vmem:[#allocation2 + $0x958] sm:$0xff] }
 0x199   :  { %v283_v53 = vld [vmem:[#allocation2 + $0x478] sm:$0xff] }
 0x19a   :  { %2883 = vmatpush2.bf16.msra.mxu0 %v6007_v20  ;;  %v5961_v20 = vcombine.low %v447_v1, %v451_v3  ;;  %v407_v54 = vld [vmem:[#allocation2 + $0x858] sm:$0xff] }
 0x19b   :  { %2926 = vmatpush2.bf16.msra.mxu1 %v5753_v21  ;;  %2884 = vmatprep.subr.bf16.mxu0 %v6000_v23  ;;  %v5826_v21 = vcombine.high %v311_v42, %v315_v9  ;;  %v5954_v23 = vcombine.high %v439_v13, %v443_v14  ;;  %v411_v55 = vld [vmem:[#allocation2 + $0x878] sm:$0xff] }
 0x19c   :  { %2927 = vmatprep.subr.bf16.mxu1 %v5746_v24  ;;  %v303_v24 = vld [vmem:[#allocation2 + $0x518] sm:$0xff] }
 0x19d   :  { %v399_v0 = vld [vmem:[#allocation2 + $0x818] sm:$0xff] }
 0x19e   :  { %2885 = vmatpush2.bf16.msra.mxu0 %v5999_v31  ;;  %v5953_v31 = vcombine.low %v439_v13, %v443_v14  ;;  %v403_v1 = vld [vmem:[#allocation2 + $0x838] sm:$0xff] }
 0x19f   :  { %2928 = vmatpush2.bf16.msra.mxu1 %v5745_v32  ;;  %2886 = vmatprep.subr.bf16.mxu0 %v5992_v33  ;;  %v5818_v32 = vcombine.high %v303_v24, %v307_v25  ;;  %v5913_v14 = vcombine.low %v399_v0, %v403_v1 }
 0x1a0   :  { %2929 = vmatprep.subr.bf16.mxu1 %v5738_v35 }
 0x1a2   :  { %2887 = vmatpush2.bf16.msra.mxu0 %v5991_v40 }
 0x1a3   :  { %2930 = vmatpush2.bf16.msra.mxu1 %v5737_v12  ;;  %2888 = vmatprep.subr.bf16.mxu0 %v5984_v41  ;;  %v5810_v12 = vcombine.high %v295_v37, %v299_v38  ;;  %v367_v38 = vld [vmem:[#allocation2 + $0x718] sm:$0xff] }
 0x1a4   :  { %2931 = vmatprep.subr.bf16.mxu1 %v5730_v43  ;;  %v287_v43 = vld [vmem:[#allocation2 + $0x498] sm:$0xff] }
 0x1a5   :  { %v5801_v57 = vcombine.low %v287_v43, %v291_v44 }
 0x1a6   :  { %2889 = vmatpush2.bf16.msra.mxu0 %v5983_v59 }
 0x1a7   :  { %2932 = vmatpush2.bf16.msra.mxu1 %v5729_v48  ;;  %2890 = vmatprep.subr.bf16.mxu0 %v5976_v49  ;;  %v5802_v48 = vcombine.high %v287_v43, %v291_v44  ;;  %v5930_v49 = vcombine.high %v415_v45, %v419_v46  ;;  %v359_v44 = vld [vmem:[#allocation2 + $0x6d8] sm:$0xff] }
 0x1a8   :  { %2933 = vmatprep.subr.bf16.mxu1 %v5722_v50  ;;  %v279_v50 = vld [vmem:[#allocation2 + $0x458] sm:$0xff] }
 0x1a9   :  { %v5793_v3 = vcombine.low %v279_v50, %v283_v53 }
 0x1aa   :  { %2891 = vmatpush2.bf16.msra.mxu0 %v5975_v58  ;;  %v5929_v58 = vcombine.low %v415_v45, %v419_v46  ;;  %v363_v45 = vld [vmem:[#allocation2 + $0x6f8] sm:$0xff] }
 0x1ab   :  { %2934 = vmatpush2.bf16.msra.mxu1 %v5721_v60  ;;  %2946 = vmatprep.subr.bf16.mxu0 %v5842_v61  ;;  %v5794_v60 = vcombine.high %v279_v50, %v283_v53  ;;  %v5922_v61 = vcombine.high %v407_v54, %v411_v55  ;;  %v487_v46 = vld [vmem:[#allocation2 + $0xad8] sm:$0xff] }
 0x1ac   :  { %2989 = vmatprep.subr.bf16.mxu1 %v5970_v62  ;;  %v271_v62 = vld [vmem:[#allocation2 + $0x418] sm:$0xff] }
 0x1ad   :  { %v2636_v10 = vpop.f32.mrf.mxu0  ;;  %2893 = vmatmul.mubr.bf16.vlgmr.msra.gmra.mxu0 %v7275_v11  ;;  %v5785_v13 = vcombine.low %v271_v62, %v275_v63  ;;  %v351_v53 = vld [vmem:[#allocation2 + $0x698] sm:$0xff] }
 0x1ae   :  { %v2637_v15 = vadd.f32 %v2636_v10, %v7257_v51  ;;  %2936 = vmatmul.mubr.bf16.vlgmr.msra.gmra.mxu1 %v7251_v56  ;;  %2947 = vmatpush1.bf16.msra.mxu0 %v5841_v4  ;;  %v5825_v51 = vcombine.low %v311_v42, %v315_v9  ;;  %v5921_v4 = vcombine.low %v407_v54, %v411_v55  ;;  %v395_v42 = vld [vmem:[#allocation2 + $0x7f8] sm:$0xff]  ;;  %v7288_v55 = vsub.s32 1, %v7239_v17 }
 0x1af   :  { %2990 = vmatpush1.bf16.msra.mxu1 %v5969_v6  ;;  %v7280_v19 = vpop.f32.mrf.mxu0  ;;  %2948 = vmatprep.subr.bf16.mxu0 %v5834_v7  ;;  %v5786_v6 = vcombine.high %v271_v62, %v275_v63  ;;  %v5914_v7 = vcombine.high %v399_v0, %v403_v1  ;;  %v519_v9 = vld [vmem:[#allocation2 + $0xbd8] sm:$0xff] }
 0x1b0   :  { %2991 = vmatprep.subr.bf16.mxu1 %v5962_v8  ;;  %2978 = vmatprep.mubr.bf16.mxu0 %v7236_v16  ;;  %v3032_v33 = vmax.f32 %v2637_v15, 0.0  ;;  %v423_v16 = vld [vmem:[#allocation2 + $0x8d8] sm:$0xff] }
 0x1b1   :  { %v2640_v26 = vpop.f32.mrf.mxu0  ;;  %3021 = vmatprep.mubr.bf16.mxu1 %v7264_v34  ;;  %v5817_v34 = vcombine.low %v303_v24, %v307_v25  ;;  %v5938_v41 = vcombine.high %v423_v16, %v427_v39  ;;  %v5937_v59 = vcombine.low %v423_v16, %v427_v39  ;;  %v391_v8 = vld [vmem:[#allocation2 + $0x7d8] sm:$0xff] }
 0x1b2   :  { %v2641_v56 = vadd.f32 %v2640_v26, %v7268_v2  ;;  %2949 = vmatpush1.bf16.msra.mxu0 %v5833_v18  ;;  %v5945_v2 = vcombine.low %v431_v28, %v435_v30  ;;  %v523_v10 = vld [vmem:[#allocation2 + $0xbf8] sm:$0xff]  ;;  %v5906_v15 = vcombine.high %v391_v8, %v395_v42  ;;  %v5905_v25 = vcombine.low %v391_v8, %v395_v42 }
 0x1b3   :  { %2992 = vmatpush1.bf16.msra.mxu1 %v5961_v20  ;;  %2950 = vmatprep.subr.bf16.mxu0 %v5826_v21  ;;  %v6034_v18 = vcombine.high %v519_v9, %v523_v10  ;;  %v383_v20 = vld [vmem:[#allocation2 + $0x798] sm:$0xff]  ;;  %v6033_v26 = vcombine.low %v519_v9, %v523_v10 }
 0x1b4   :  { %v3040_v35 = vmax.f32 %v2641_v56, 0.0  ;;  %2993 = vmatprep.subr.bf16.mxu1 %v5954_v23  ;;  %v387_v21 = vld [vmem:[#allocation2 + $0x7b8] sm:$0xff] }
 0x1b5   :  { %v511_v23 = vld [vmem:[#allocation2 + $0xb98] sm:$0xff]  ;;  %v5898_v28 = vcombine.high %v383_v20, %v387_v21 }
 0x1b6   :  { %v7285_v40 = vpack.c.bf16 %v3040_v35, %v3032_v33  ;;  %2951 = vmatpush1.bf16.msra.mxu0 %v5825_v51  ;;  %v515_v24 = vld [vmem:[#allocation2 + $0xbb8] sm:$0xff]  ;;  %v5897_v33 = vcombine.low %v383_v20, %v387_v21 }
 0x1b7   :  { %2994 = vmatpush1.bf16.msra.mxu1 %v5953_v31  ;;  %2952 = vmatprep.subr.bf16.mxu0 %v5818_v32  ;;  %v6026_v30 = vcombine.high %v511_v23, %v515_v24  ;;  %v375_v56 = vld [vmem:[#allocation2 + $0x758] sm:$0xff]  ;;  %v6025_v35 = vcombine.low %v511_v23, %v515_v24  ;;  %v2642_v24 = vpop.f32.mrf.mxu0 }
 0x1b8   :  { %2995 = vmatprep.subr.bf16.mxu1 %v5946_v36  ;;  %v379_v51 = vld [vmem:[#allocation2 + $0x778] sm:$0xff] }
 0x1b9   :  { %v503_v31 = vld [vmem:[#allocation2 + $0xb58] sm:$0xff]  ;;  %v5890_v36 = vcombine.high %v375_v56, %v379_v51 }
 0x1ba   :  { %2953 = vmatpush1.bf16.msra.mxu0 %v5817_v34  ;;  %v507_v32 = vld [vmem:[#allocation2 + $0xb78] sm:$0xff] }
 0x1bb   :  { %2996 = vmatpush1.bf16.msra.mxu1 %v5945_v2  ;;  %2954 = vmatprep.subr.bf16.mxu0 %v5810_v12  ;;  %v6018_v37 = vcombine.high %v503_v31, %v507_v32  ;;  %v371_v16 = vld [vmem:[#allocation2 + $0x738] sm:$0xff]  ;;  %v5889_v2 = vcombine.low %v375_v56, %v379_v51  ;;  %v6017_v12 = vcombine.low %v503_v31, %v507_v32  ;;  %v540_v32 = vsub.s32 3, %v7239_v17 }
 0x1bc   :  { %2997 = vmatprep.subr.bf16.mxu1 %v5938_v41  ;;  %v495_v39 = vld [vmem:[#allocation2 + $0xb18] sm:$0xff]  ;;  %v5882_v41 = vcombine.high %v367_v38, %v371_v16 }
 0x1bd   :  { %v499_v34 = vld [vmem:[#allocation2 + $0xb38] sm:$0xff] }
 0x1be   :  { %2955 = vmatpush1.bf16.msra.mxu0 %v5809_v47  ;;  %v6010_v43 = vcombine.high %v495_v39, %v499_v34  ;;  %v491_v47 = vld [vmem:[#allocation2 + $0xaf8] sm:$0xff] }
 0x1bf   :  { %2998 = vmatpush1.bf16.msra.mxu1 %v5937_v59  ;;  %2956 = vmatprep.subr.bf16.mxu0 %v5802_v48  ;;  %v5881_v59 = vcombine.low %v367_v38, %v371_v16  ;;  %v6009_v48 = vcombine.low %v495_v39, %v499_v34  ;;  %v6002_v50 = vcombine.high %v487_v46, %v491_v47  ;;  %v355_v54 = vld [vmem:[#allocation2 + $0x6b8] sm:$0xff] }
 0x1c0   :  { %2999 = vmatprep.subr.bf16.mxu1 %v5930_v49  ;;  %v5874_v49 = vcombine.high %v359_v44, %v363_v45  ;;  %v5866_v62 = vcombine.high %v351_v53, %v355_v54  ;;  %v343_v0 = vld [vmem:[#allocation2 + $0x658] sm:$0xff]  ;;  %v5865_v8 = vcombine.low %v351_v53, %v355_v54 }
 0x1c1   :  { %v347_v1 = vld [vmem:[#allocation2 + $0x678] sm:$0xff] }
 0x1c2   :  { %2957 = vmatpush1.bf16.msra.mxu0 %v5801_v57  ;;  %v479_v57 = vld [vmem:[#allocation2 + $0xa98] sm:$0xff]  ;;  %v5858_v10 = vcombine.high %v343_v0, %v347_v1 }
 0x1c3   :  { %3000 = vmatpush1.bf16.msra.mxu1 %v5929_v58  ;;  %2958 = vmatprep.subr.bf16.mxu0 %v5794_v60  ;;  %v483_v58 = vld [vmem:[#allocation2 + $0xab8] sm:$0xff]  ;;  %v5873_v60 = vcombine.low %v359_v44, %v363_v45  ;;  %v6921_v45 = vld [vmem:[%s7386_s0 + $0x8] ss:$24 sps:$4 sm:$0xff]  }
 0x1c4   :  { %3001 = vmatprep.subr.bf16.mxu1 %v5922_v61  ;;  %v6001_v61 = vcombine.low %v487_v46, %v491_v47  ;;  %v5994_v63 = vcombine.high %v479_v57, %v483_v58  ;;  %v5993_v9 = vcombine.low %v479_v57, %v483_v58  ;;  %v463_v21 = vld [vmem:[#allocation2 + $0xa18] sm:$0xff] }
 0x1c5   :  { %v467_v23 = vld [vmem:[#allocation2 + $0xa38] sm:$0xff] }
 0x1c6   :  { %2959 = vmatpush1.bf16.msra.mxu0 %v5793_v3  ;;  %v533_v3 = vrot.slane %v7244_v29, %v7288_v55  ;;  %v5978_v56 = vcombine.high %v463_v21, %v467_v23  ;;  %v6424_v38 = vld [vmem:[#allocation6 + $0x2e4] ss:$16 sps:$4 sm:$0xff]   ;;  %v6419_v39 = vld [vmem:[#allocation6 + $0xe0] ss:$16 sps:$4 sm:$0xff]  }
 0x1c7   :  { %3002 = vmatpush1.bf16.msra.mxu1 %v5921_v4  ;;  %2960 = vmatprep.subr.bf16.mxu0 %v5786_v6  ;;  %v471_v4 = vld [vmem:[#allocation2 + $0xa58] sm:$0xff] }
 0x1c8   :  { %3003 = vmatprep.subr.bf16.mxu1 %v5914_v7  ;;  %v475_v6 = vld [vmem:[#allocation2 + $0xa78] sm:$0xff]  ;;  %v2599_v7 = vpop.f32.mrf.mxu1  ;;  %v2557_v42 = vadd.f32 %v7270_v5, %v533_v3  ;;  %v2553_v20 = vadd.f32 %v7255_v22, %v533_v3 }
 0x1c9   :  { %v5985_v5 = vcombine.low %v471_v4, %v475_v6  ;;  %v6425_v47 = vld [vmem:[#allocation6 + $0xc0] ss:$16 sps:$4 sm:$0xff]   ;;  %v6436_v54 = vld [vmem:[#allocation6 + $0x2a4] ss:$16 sps:$4 sm:$0xff]  }
 0x1ca   :  { %2961 = vmatpush1.bf16.msra.mxu0 %v5785_v13  ;;  %v7293_v13 = vpop.f32.mrf.mxu1  ;;  %v2596_v51 = vadd.f32 %v7259_v52, %v2553_v20  ;;  %v541_v52 = vrot.slane %v7244_v29, %v540_v32  ;;  %v6442_v3 = vld [vmem:[#allocation6 + $0x284] ss:$16 sps:$4 sm:$0xff]   ;;  %v6446_v20 = vld [vmem:[#allocation6 + $0x260] ss:$16 sps:$4 sm:$0xff]  }
 0x1cb   :  { %3004 = vmatpush1.bf16.msra.mxu1 %v5913_v14  ;;  %2962 = vmatprep.subr.bf16.mxu0 %v5906_v15  ;;  %v5986_v14 = vcombine.high %v471_v4, %v475_v6  ;;  %v335_v15 = vld [vmem:[#allocation2 + $0x618] sm:$0xff] }
 0x1cc   :  { %3005 = vmatprep.subr.bf16.mxu1 %v6034_v18  ;;  %v339_v18 = vld [vmem:[#allocation2 + $0x638] sm:$0xff] }
 0x1cd   :  { %v5849_v22 = vcombine.low %v335_v15, %v339_v18 }
 0x1ce   :  { %2963 = vmatpush2.bf16.msra.mxu0 %v5905_v25  ;;  %v5857_v25 = vcombine.low %v343_v0, %v347_v1 }
 0x1cf   :  { %3006 = vmatpush2.bf16.msra.mxu1 %v6033_v26  ;;  %2964 = vmatprep.subr.bf16.mxu0 %v5898_v28  ;;  %v2600_v26 = vadd.f32 %v2599_v7, %v2557_v42  ;;  %v5850_v28 = vcombine.high %v335_v15, %v339_v18  ;;  %v6437_v7 = vld [vmem:[#allocation6 + $0x80] ss:$16 sps:$4 sm:$0xff]   ;;  %v6445_v42 = vld [vmem:[#allocation6 + $0x64] ss:$16 sps:$4 sm:$0xff]  }
 0x1d0   :  { %3007 = vmatprep.subr.bf16.mxu1 %v6026_v30  ;;  %v2681_v30 = vpop.f32.mrf.mxu1  ;;  %v6443_v18 = vld [vmem:[#allocation6 + $0x60] ss:$16 sps:$4 sm:$0xff]  }
 0x1d1   :  { %v2643_v31 = vadd.f32 %v2642_v24, %v2600_v26  ;;  %v2682_v29 = vadd.f32 %v2681_v30, %v541_v52  ;;  %v6449_v24 = vld [vmem:[#allocation6 + $0x40] ss:$16 sps:$4 sm:$0xff]   ;;  %v6457_v26 = vld [vmem:[#allocation6 + $0x24] ss:$16 sps:$4 sm:$0xff]  }
 0x1d2   :  { %2965 = vmatpush2.bf16.msra.mxu0 %v5897_v33  ;;  %v2639_v33 = vadd.f32 %v7280_v19, %v2596_v51  ;;  %v6458_v30 = vld [vmem:[#allocation6 + $0x220] ss:$16 sps:$4 sm:$0xff]   ;;  %v6466_v51 = vld [vmem:[#allocation6 + $0x204] ss:$16 sps:$4 sm:$0xff]  }
 0x1d3   :  { %3008 = vmatpush2.bf16.msra.mxu1 %v6025_v35  ;;  %2966 = vmatprep.subr.bf16.mxu0 %v5890_v36  ;;  %v5977_v35 = vcombine.low %v463_v21, %v467_v23  ;;  %v6421_v36 = vld [vmem:[#allocation6 + $0xe4] ss:$16 sps:$4 sm:$0xff]   ;;  %v3041_v16 = vmax.f32 %v2643_v31, 0.0  ;;  %v6461_v31 = vld [vmem:[#allocation6] ss:$16 sps:$4 sm:$0xff]  }
 0x1d4   :  { %3009 = vmatprep.subr.bf16.mxu1 %v6018_v37  ;;  %v7299_v37 = vpop.f32.mrf.mxu1  ;;  %v3033_v34 = vmax.f32 %v2639_v33, 0.0  ;;  %v6451_v21 = vld [vmem:[#allocation6 + $0x44] ss:$16 sps:$4 sm:$0xff]  }
 0x1d5   :  { %v6454_v23 = vld [vmem:[#allocation6 + $0x244] ss:$16 sps:$4 sm:$0xff]  }
 0x1d6   :  { %2967 = vmatpush2.bf16.msra.mxu0 %v5889_v2  ;;  %v6422_v2 = vld [vmem:[#allocation6 + $0x2e0] ss:$16 sps:$4 sm:$0xff]   ;;  %v2685_v19 = vpop.f32.mrf.mxu1  ;;  %v6469_v33 = vld [vmem:[#allocation6 + $0x1e4] ss:$16 sps:$4 sm:$0xff]  }
 0x1d7   :  { %3010 = vmatpush2.bf16.msra.mxu1 %v6017_v12  ;;  %2968 = vmatprep.subr.bf16.mxu0 %v5882_v41  ;;  %v6427_v12 = vld [vmem:[#allocation6 + $0xc4] ss:$16 sps:$4 sm:$0xff]   ;;  %v2686_v58 = vadd.f32 %v2685_v19, %v541_v52 }
 0x1d8   :  { %3011 = vmatprep.subr.bf16.mxu1 %v6010_v43  ;;  %v6430_v41 = vld [vmem:[#allocation6 + $0x2c4] ss:$16 sps:$4 sm:$0xff]   ;;  %v7304_v43 = vpack.c.bf16 %v3041_v16, %v3033_v34  ;;  %v6476_v34 = vld [vmem:[#allocation6 + $0x3c0] ss:$16 sps:$4 sm:$0xff]  }
 0x1d9   :  { %v6475_v16 = vld [vmem:[#allocation6 + $0x1c4] ss:$16 sps:$4 sm:$0xff]  }
 0x1da   :  { %2969 = vmatpush2.bf16.msra.mxu0 %v5881_v59  ;;  %v6478_v52 = vld [vmem:[#allocation6 + $0x3c4] ss:$16 sps:$4 sm:$0xff]  }
 0x1db   :  { %3012 = vmatpush2.bf16.msra.mxu1 %v6009_v48  ;;  %2970 = vmatprep.subr.bf16.mxu0 %v5874_v49  ;;  %v6428_v48 = vld [vmem:[#allocation6 + $0x2c0] ss:$16 sps:$4 sm:$0xff]   ;;  %v6433_v49 = vld [vmem:[#allocation6 + $0xa4] ss:$16 sps:$4 sm:$0xff]  }
 0x1dc   :  { %3013 = vmatprep.subr.bf16.mxu1 %v6002_v50  ;;  %v6484_v19 = vld [vmem:[#allocation6 + $0x3a4] ss:$16 sps:$4 sm:$0xff]  }
 0x1de   :  { %2971 = vmatpush2.bf16.msra.mxu0 %v5873_v60 }
 0x1df   :  { %3014 = vmatpush2.bf16.msra.mxu1 %v6001_v61  ;;  %2972 = vmatprep.subr.bf16.mxu0 %v5866_v62  ;;  %v6434_v62 = vld [vmem:[#allocation6 + $0x2a0] ss:$16 sps:$4 sm:$0xff]  }
 0x1e0   :  { %3015 = vmatprep.subr.bf16.mxu1 %v5994_v63  ;;  %v6439_v63 = vld [vmem:[#allocation6 + $0x84] ss:$16 sps:$4 sm:$0xff]  }
 0x1e2   :  { %2973 = vmatpush2.bf16.msra.mxu0 %v5865_v8  ;;  %v6440_v8 = vld [vmem:[#allocation6 + $0x280] ss:$16 sps:$4 sm:$0xff]  }
 0x1e3   :  { %3016 = vmatpush2.bf16.msra.mxu1 %v5993_v9  ;;  %2974 = vmatprep.subr.bf16.mxu0 %v5858_v10 }
 0x1e4   :  { %3017 = vmatprep.subr.bf16.mxu1 %v5986_v14  ;;  %v6448_v14 = vld [vmem:[#allocation6 + $0x264] ss:$16 sps:$4 sm:$0xff]  }
 0x1e6   :  { %2975 = vmatpush2.bf16.msra.mxu0 %v5857_v25  ;;  %v6452_v25 = vld [vmem:[#allocation6 + $0x240] ss:$16 sps:$4 sm:$0xff]  }
 0x1e7   :  { %3018 = vmatpush2.bf16.msra.mxu1 %v5985_v5  ;;  %2976 = vmatprep.subr.bf16.mxu0 %v5850_v28  ;;  %v6460_v5 = vld [vmem:[#allocation6 + $0x224] ss:$16 sps:$4 sm:$0xff]   ;;  %v6455_v28 = vld [vmem:[#allocation6 + $0x20] ss:$16 sps:$4 sm:$0xff]  }
 0x1e8   :  { %3019 = vmatprep.subr.bf16.mxu1 %v5978_v56  ;;  %v6463_v56 = vld [vmem:[#allocation6 + $0x4] ss:$16 sps:$4 sm:$0xff]  }
 0x1ea   :  { %2977 = vmatpush2.bf16.msra.mxu0 %v5849_v22  ;;  %v6464_v22 = vld [vmem:[#allocation6 + $0x200] ss:$16 sps:$4 sm:$0xff]  }
 0x1eb   :  { %3020 = vmatpush2.bf16.msra.mxu1 %v5977_v35  ;;  %4614 = vmatprep.subr.bf16.mxu0 %v6421_v36  ;;  %v6472_v35 = vld [vmem:[#allocation6 + $0x3e4] ss:$16 sps:$4 sm:$0xff]   ;;  %v6467_v36 = vld [vmem:[#allocation6 + $0x1e0] ss:$16 sps:$4 sm:$0xff]  }
 0x1ec   :  { %4657 = vmatprep.subr.bf16.mxu1 %v6424_v38  ;;  %v6470_v38 = vld [vmem:[#allocation6 + $0x3e0] ss:$16 sps:$4 sm:$0xff]  }
 0x1ed   :  { %v7306_v44 = vpop.f32.mrf.mxu0  ;;  %2979 = vmatmul.mubr.bf16.vlgmr.msra.gmra.mxu0 %v6921_v45  ;;  %v6487_v45 = vld [vmem:[#allocation6 + $0x184] ss:$16 sps:$4 sm:$0xff]  }
 0x1ee   :  { %v7311_v46 = vpop.f32.mrf.mxu1  ;;  %3022 = vmatmul.mubr.bf16.vlgmr.msra.gmra.mxu1 %v7275_v11  ;;  %4615 = vmatpush1.bf16.msra.mxu0 %v6419_v39  ;;  %v6431_v11 = vld [vmem:[#allocation6 + $0xa0] ss:$16 sps:$4 sm:$0xff]  }
 0x1ef   :  { %4646 = vmatprep.mubr.bf16.mxu0 %v7304_v43  ;;  %4658 = vmatpush1.bf16.msra.mxu1 %v6422_v2  ;;  %v2724_v59 = vpop.f32.mrf.mxu0  ;;  %v6473_v39 = vld [vmem:[#allocation6 + $0x1c0] ss:$16 sps:$4 sm:$0xff]   ;;  %v6481_v2 = vld [vmem:[#allocation6 + $0x1a4] ss:$16 sps:$4 sm:$0xff]  }
 0x1f0   :  { %v2725_v50 = vadd.f32 %v2724_v59, %v2682_v29  ;;  %v2767_v53 = vpop.f32.mrf.mxu1  ;;  %4616 = vmatprep.subr.bf16.mxu0 %v6427_v12  ;;  %4659 = vmatprep.subr.bf16.mxu1 %v6430_v41  ;;  %v6479_v12 = vld [vmem:[#allocation6 + $0x1a0] ss:$16 sps:$4 sm:$0xff]   ;;  %v6490_v29 = vld [vmem:[#allocation6 + $0x384] ss:$16 sps:$4 sm:$0xff]  }
 0x1f1   :  { %v7315_v57 = vpop.f32.mrf.mxu0  ;;  %v6482_v41 = vld [vmem:[#allocation6 + $0x3a0] ss:$16 sps:$4 sm:$0xff]  }
 0x1f2   :  { %v7317_v60 = vpop.f32.mrf.mxu1  ;;  %4617 = vmatpush1.bf16.msra.mxu0 %v6425_v47  ;;  %v2768_v0 = vadd.f32 %v2767_v53, %v2725_v50  ;;  %v536_v47 = vsub.s32 2, %v7239_v17  ;;  %v6485_v59 = vld [vmem:[#allocation6 + $0x180] ss:$16 sps:$4 sm:$0xff]   ;;  %v6496_v50 = vld [vmem:[#allocation6 + $0x364] ss:$16 sps:$4 sm:$0xff]   ;;  %v7323_v53 = vld [vmem:[#allocation4] sm:$0xff] }
 0x1f3   :  { %4660 = vmatpush1.bf16.msra.mxu1 %v6428_v48  ;;  %v2728_v61 = vpop.f32.mrf.mxu0  ;;  %4618 = vmatprep.subr.bf16.mxu0 %v6433_v49  ;;  %v6488_v48 = vld [vmem:[#allocation6 + $0x380] ss:$16 sps:$4 sm:$0xff]   ;;  %v6493_v49 = vld [vmem:[#allocation6 + $0x164] ss:$16 sps:$4 sm:$0xff]  }
 0x1f4   :  { %v2729_v1 = vadd.f32 %v2728_v61, %v2686_v58  ;;  %4661 = vmatprep.subr.bf16.mxu1 %v6436_v54  ;;  %v2771_v4 = vpop.f32.mrf.mxu1  ;;  %v3035_v9 = vmax.f32 %v2768_v0, 0.0  ;;  %v537_v54 = vrot.slane %v7323_v53, %v536_v47  ;;  %v6491_v58 = vld [vmem:[#allocation6 + $0x160] ss:$16 sps:$4 sm:$0xff]   ;;  %v6499_v61 = vld [vmem:[#allocation6 + $0x144] ss:$16 sps:$4 sm:$0xff]  }
 0x1f5   :  { %v6497_v0 = vld [vmem:[#allocation6 + $0x140] ss:$16 sps:$4 sm:$0xff]  }
 0x1f6   :  { %v2772_v6 = vadd.f32 %v2771_v4, %v2729_v1  ;;  %4619 = vmatpush1.bf16.msra.mxu0 %v6431_v11  ;;  %v6494_v11 = vld [vmem:[#allocation6 + $0x360] ss:$16 sps:$4 sm:$0xff]   ;;  %v2680_v4 = vadd.f32 %v7293_v13, %v537_v54 }
 0x1f7   :  { %4662 = vmatpush1.bf16.msra.mxu1 %v6434_v62  ;;  %4620 = vmatprep.subr.bf16.mxu0 %v6439_v63  ;;  %v6502_v62 = vld [vmem:[#allocation6 + $0x344] ss:$16 sps:$4 sm:$0xff]   ;;  %v2684_v63 = vadd.f32 %v7299_v37, %v537_v54  ;;  %v6500_v1 = vld [vmem:[#allocation6 + $0x340] ss:$16 sps:$4 sm:$0xff]  }
 0x1f8   :  { %v3043_v10 = vmax.f32 %v2772_v6, 0.0  ;;  %4663 = vmatprep.subr.bf16.mxu1 %v6442_v3  ;;  %v6505_v3 = vld [vmem:[#allocation6 + $0x124] ss:$16 sps:$4 sm:$0xff]   ;;  %v6509_v13 = vld [vmem:[#allocation6 + $0x100] ss:$16 sps:$4 sm:$0xff]  }
 0x1f9   :  { %v2727_v6 = vadd.f32 %v7315_v57, %v2684_v63  ;;  %v6511_v37 = vld [vmem:[#allocation6 + $0x104] ss:$16 sps:$4 sm:$0xff]   ;;  %v6512_v57 = vld [vmem:[#allocation6 + $0x300] ss:$16 sps:$4 sm:$0xff]  }
 0x1fa   :  { %v7319_v15 = vpack.c.bf16 %v3043_v10, %v3035_v9  ;;  %4621 = vmatpush1.bf16.msra.mxu0 %v6437_v7  ;;  %v6508_v7 = vld [vmem:[#allocation6 + $0x324] ss:$16 sps:$4 sm:$0xff]   ;;  %v6506_v9 = vld [vmem:[#allocation6 + $0x320] ss:$16 sps:$4 sm:$0xff]  }
 0x1fb   :  { %4664 = vmatpush1.bf16.msra.mxu1 %v6440_v8  ;;  %4622 = vmatprep.subr.bf16.mxu0 %v6445_v42  ;;  %v2723_v8 = vadd.f32 %v7306_v44, %v2680_v4  ;;  %v6503_v42 = vld [vmem:[#allocation6 + $0x120] ss:$16 sps:$4 sm:$0xff]   ;;  %v2770_v10 = vadd.f32 %v7317_v60, %v2727_v6  ;;  %v6568_v44 = vld [vmem:[#allocation6 + $0x6e4] ss:$16 sps:$4 sm:$0xff]  }
 0x1fc   :  { %4689 = vmatprep.mubr.bf16.mxu1 %v7319_v15  ;;  %4665 = vmatprep.subr.bf16.mxu1 %v6448_v14  ;;  %v6514_v14 = vld [vmem:[#allocation6 + $0x304] ss:$16 sps:$4 sm:$0xff]   ;;  %v6566_v60 = vld [vmem:[#allocation6 + $0x6e0] ss:$16 sps:$4 sm:$0xff]  }
 0x1fd   :  { %v6541_v54 = vld [vmem:[#allocation6 + $0x5e4] ss:$16 sps:$4 sm:$0xff]   ;;  %v6614_v63 = vld [vmem:[#allocation6 + $0x7e0] ss:$16 sps:$4 sm:$0xff]  }
 0x1fe   :  { %4623 = vmatpush1.bf16.msra.mxu0 %v6443_v18  ;;  %v2766_v18 = vadd.f32 %v7311_v46, %v2723_v8  ;;  %v6574_v46 = vld [vmem:[#allocation6 + $0x6c4] ss:$16 sps:$4 sm:$0xff]   ;;  %v6620_v4 = vld [vmem:[#allocation6 + $0x7c0] ss:$16 sps:$4 sm:$0xff]  }
 0x1ff   :  { %4666 = vmatpush1.bf16.msra.mxu1 %v6446_v20  ;;  %4624 = vmatprep.subr.bf16.mxu0 %v6451_v21  ;;  %v6517_v20 = vld [vmem:[#allocation6 + $0x4e4] ss:$16 sps:$4 sm:$0xff]   ;;  %v3042_v21 = vmax.f32 %v2770_v10, 0.0 }
 0x200   :  { %4667 = vmatprep.subr.bf16.mxu1 %v6454_v23  ;;  %v3034_v23 = vmax.f32 %v2766_v18, 0.0  ;;  %v6628_v6 = vld [vmem:[#allocation6 + $0x7a4] ss:$16 sps:$4 sm:$0xff]  }
 0x201   :  { %v6550_v8 = vld [vmem:[#allocation6 + $0x584] ss:$16 sps:$4 sm:$0xff]  }
 0x202   :  { %4625 = vmatpush1.bf16.msra.mxu0 %v6449_v24  ;;  %v6515_v24 = vld [vmem:[#allocation6 + $0x4e0] ss:$16 sps:$4 sm:$0xff]   ;;  %v6553_v10 = vld [vmem:[#allocation6 + $0x564] ss:$16 sps:$4 sm:$0xff]  }
 0x203   :  { %4668 = vmatpush1.bf16.msra.mxu1 %v6452_v25  ;;  %4626 = vmatprep.subr.bf16.mxu0 %v6457_v26  ;;  %v6520_v25 = vld [vmem:[#allocation6 + $0x4c4] ss:$16 sps:$4 sm:$0xff]   ;;  %v7334_v26 = vpack.c.bf16 %v3042_v21, %v3034_v23 }
 0x204   :  { %4669 = vmatprep.subr.bf16.mxu1 %v6460_v5  ;;  %v6518_v5 = vld [vmem:[#allocation6 + $0x4c0] ss:$16 sps:$4 sm:$0xff]   ;;  %v6640_v18 = vld [vmem:[#allocation6 + $0x764] ss:$16 sps:$4 sm:$0xff]  }
 0x205   :  { %v6646_v21 = vld [vmem:[#allocation6 + $0x744] ss:$16 sps:$4 sm:$0xff]  }
 0x206   :  { %4627 = vmatpush1.bf16.msra.mxu0 %v6455_v28  ;;  %v6523_v28 = vld [vmem:[#allocation6 + $0x4a4] ss:$16 sps:$4 sm:$0xff]  }
 0x207   :  { %4670 = vmatpush1.bf16.msra.mxu1 %v6458_v30  ;;  %4628 = vmatprep.subr.bf16.mxu0 %v6463_v56  ;;  %v6572_v30 = vld [vmem:[#allocation6 + $0x6c0] ss:$16 sps:$4 sm:$0xff]   ;;  %v6580_v56 = vld [vmem:[#allocation6 + $0x6a4] ss:$16 sps:$4 sm:$0xff]  }
 0x208   :  { %4671 = vmatprep.subr.bf16.mxu1 %v6466_v51  ;;  %v6521_v51 = vld [vmem:[#allocation6 + $0x4a0] ss:$16 sps:$4 sm:$0xff]  }
 0x20a   :  { %4629 = vmatpush1.bf16.msra.mxu0 %v6461_v31  ;;  %v6526_v31 = vld [vmem:[#allocation6 + $0x484] ss:$16 sps:$4 sm:$0xff]  }
 0x20b   :  { %4672 = vmatpush1.bf16.msra.mxu1 %v6464_v22  ;;  %4630 = vmatprep.subr.bf16.mxu0 %v6469_v33  ;;  %v6578_v22 = vld [vmem:[#allocation6 + $0x6a0] ss:$16 sps:$4 sm:$0xff]   ;;  %v6586_v33 = vld [vmem:[#allocation6 + $0x684] ss:$16 sps:$4 sm:$0xff]  }
 0x20c   :  { %4673 = vmatprep.subr.bf16.mxu1 %v6472_v35  ;;  %v6524_v35 = vld [vmem:[#allocation6 + $0x480] ss:$16 sps:$4 sm:$0xff]  }
 0x20e   :  { %4631 = vmatpush2.bf16.msra.mxu0 %v6467_v36  ;;  %v6529_v36 = vld [vmem:[#allocation6 + $0x464] ss:$16 sps:$4 sm:$0xff]  }
 0x20f   :  { %4674 = vmatpush2.bf16.msra.mxu1 %v6470_v38  ;;  %4632 = vmatprep.subr.bf16.mxu0 %v6475_v16  ;;  %v6584_v38 = vld [vmem:[#allocation6 + $0x680] ss:$16 sps:$4 sm:$0xff]   ;;  %v6592_v16 = vld [vmem:[#allocation6 + $0x664] ss:$16 sps:$4 sm:$0xff]  }
 0x210   :  { %4675 = vmatprep.subr.bf16.mxu1 %v6478_v52  ;;  %v6527_v52 = vld [vmem:[#allocation6 + $0x460] ss:$16 sps:$4 sm:$0xff]  }
 0x212   :  { %4633 = vmatpush2.bf16.msra.mxu0 %v6473_v39  ;;  %v6532_v39 = vld [vmem:[#allocation6 + $0x444] ss:$16 sps:$4 sm:$0xff]  }
 0x213   :  { %4676 = vmatpush2.bf16.msra.mxu1 %v6476_v34  ;;  %4634 = vmatprep.subr.bf16.mxu0 %v6481_v2  ;;  %v6590_v34 = vld [vmem:[#allocation6 + $0x660] ss:$16 sps:$4 sm:$0xff]   ;;  %v6598_v2 = vld [vmem:[#allocation6 + $0x644] ss:$16 sps:$4 sm:$0xff]  }
 0x214   :  { %4677 = vmatprep.subr.bf16.mxu1 %v6484_v19  ;;  %v6530_v19 = vld [vmem:[#allocation6 + $0x440] ss:$16 sps:$4 sm:$0xff]  }
 0x216   :  { %4635 = vmatpush2.bf16.msra.mxu0 %v6479_v12  ;;  %v6535_v12 = vld [vmem:[#allocation6 + $0x424] ss:$16 sps:$4 sm:$0xff]  }
 0x217   :  { %4678 = vmatpush2.bf16.msra.mxu1 %v6482_v41  ;;  %4636 = vmatprep.subr.bf16.mxu0 %v6487_v45  ;;  %v6596_v41 = vld [vmem:[#allocation6 + $0x640] ss:$16 sps:$4 sm:$0xff]   ;;  %v6604_v45 = vld [vmem:[#allocation6 + $0x624] ss:$16 sps:$4 sm:$0xff]  }
 0x218   :  { %4679 = vmatprep.subr.bf16.mxu1 %v6490_v29  ;;  %v6533_v29 = vld [vmem:[#allocation6 + $0x420] ss:$16 sps:$4 sm:$0xff]  }
 0x21a   :  { %4637 = vmatpush2.bf16.msra.mxu0 %v6485_v59  ;;  %v6538_v59 = vld [vmem:[#allocation6 + $0x404] ss:$16 sps:$4 sm:$0xff]  }
 0x21b   :  { %4680 = vmatpush2.bf16.msra.mxu1 %v6488_v48  ;;  %4638 = vmatprep.subr.bf16.mxu0 %v6493_v49  ;;  %v6602_v48 = vld [vmem:[#allocation6 + $0x620] ss:$16 sps:$4 sm:$0xff]   ;;  %v6610_v49 = vld [vmem:[#allocation6 + $0x604] ss:$16 sps:$4 sm:$0xff]  }
 0x21c   :  { %4681 = vmatprep.subr.bf16.mxu1 %v6496_v50  ;;  %v6536_v50 = vld [vmem:[#allocation6 + $0x400] ss:$16 sps:$4 sm:$0xff]  }
 0x21e   :  { %4639 = vmatpush2.bf16.msra.mxu0 %v6491_v58  ;;  %v6608_v58 = vld [vmem:[#allocation6 + $0x600] ss:$16 sps:$4 sm:$0xff]  }
 0x21f   :  { %4682 = vmatpush2.bf16.msra.mxu1 %v6494_v11  ;;  %4640 = vmatprep.subr.bf16.mxu0 %v6499_v61  ;;  %v6616_v11 = vld [vmem:[#allocation6 + $0x7e4] ss:$16 sps:$4 sm:$0xff]   ;;  %v6539_v61 = vld [vmem:[#allocation6 + $0x5e0] ss:$16 sps:$4 sm:$0xff]  }
 0x220   :  { %4683 = vmatprep.subr.bf16.mxu1 %v6502_v62  ;;  %v6544_v62 = vld [vmem:[#allocation6 + $0x5c4] ss:$16 sps:$4 sm:$0xff]  }
 0x222   :  { %4641 = vmatpush2.bf16.msra.mxu0 %v6497_v0  ;;  %v6622_v0 = vld [vmem:[#allocation6 + $0x7c4] ss:$16 sps:$4 sm:$0xff]  }
 0x223   :  { %4684 = vmatpush2.bf16.msra.mxu1 %v6500_v1  ;;  %4642 = vmatprep.subr.bf16.mxu0 %v6505_v3  ;;  %v6542_v1 = vld [vmem:[#allocation6 + $0x5c0] ss:$16 sps:$4 sm:$0xff]   ;;  %v6547_v3 = vld [vmem:[#allocation6 + $0x5a4] ss:$16 sps:$4 sm:$0xff]  }
 0x224   :  { %4685 = vmatprep.subr.bf16.mxu1 %v6508_v7  ;;  %v6545_v7 = vld [vmem:[#allocation6 + $0x5a0] ss:$16 sps:$4 sm:$0xff]  }
 0x226   :  { %4643 = vmatpush2.bf16.msra.mxu0 %v6503_v42  ;;  %v6626_v42 = vld [vmem:[#allocation6 + $0x7a0] ss:$16 sps:$4 sm:$0xff]  }
 0x227   :  { %4686 = vmatpush2.bf16.msra.mxu1 %v6506_v9  ;;  %4644 = vmatprep.subr.bf16.mxu0 %v6511_v37  ;;  %v6634_v9 = vld [vmem:[#allocation6 + $0x784] ss:$16 sps:$4 sm:$0xff]   ;;  %v6548_v37 = vld [vmem:[#allocation6 + $0x580] ss:$16 sps:$4 sm:$0xff]  }
 0x228   :  { %4687 = vmatprep.subr.bf16.mxu1 %v6514_v14  ;;  %v6632_v14 = vld [vmem:[#allocation6 + $0x780] ss:$16 sps:$4 sm:$0xff]  }
 0x22a   :  { %4645 = vmatpush2.bf16.msra.mxu0 %v6509_v13  ;;  %v6551_v13 = vld [vmem:[#allocation6 + $0x560] ss:$16 sps:$4 sm:$0xff]  }
 0x22b   :  { %4688 = vmatpush2.bf16.msra.mxu1 %v6512_v57  ;;  %4700 = vmatprep.subr.bf16.mxu0 %v6517_v20  ;;  %v6556_v57 = vld [vmem:[#allocation6 + $0x544] ss:$16 sps:$4 sm:$0xff]   ;;  %v6638_v20 = vld [vmem:[#allocation6 + $0x760] ss:$16 sps:$4 sm:$0xff]  }
 0x22c   :  { %4743 = vmatprep.subr.bf16.mxu1 %v6568_v44  ;;  %v6554_v44 = vld [vmem:[#allocation6 + $0x540] ss:$16 sps:$4 sm:$0xff]  }
 0x22d   :  { %4647 = vmatmul.mubr.bf16.vlgmr.msra.gmra.mxu0 %v7285_v40  ;;  %v2808_v23 = vpop.f32.mrf.mxu0 }
 0x22e   :  { %4690 = vmatmul.mubr.bf16.vlgmr.msra.gmra.mxu1 %v7334_v26  ;;  %4701 = vmatpush1.bf16.msra.mxu0 %v6515_v24  ;;  %v6559_v24 = vld [vmem:[#allocation6 + $0x524] ss:$16 sps:$4 sm:$0xff]  }
 0x22f   :  { %4702 = vmatprep.subr.bf16.mxu0 %v6520_v25  ;;  %4744 = vmatpush1.bf16.msra.mxu1 %v6566_v60  ;;  %v6644_v25 = vld [vmem:[#allocation6 + $0x740] ss:$16 sps:$4 sm:$0xff]   ;;  %v6652_v60 = vld [vmem:[#allocation6 + $0x724] ss:$16 sps:$4 sm:$0xff]  }
 0x230   :  { %4745 = vmatprep.subr.bf16.mxu1 %v6574_v46  ;;  %v6557_v46 = vld [vmem:[#allocation6 + $0x520] ss:$16 sps:$4 sm:$0xff]  }
 0x232   :  { %4703 = vmatpush1.bf16.msra.mxu0 %v6518_v5  ;;  %v2810_v5 = vpop.f32.mrf.mxu0 }
 0x233   :  { %4704 = vmatprep.subr.bf16.mxu0 %v6523_v28  ;;  %4746 = vmatpush1.bf16.msra.mxu1 %v6572_v30  ;;  %v6562_v28 = vld [vmem:[#allocation6 + $0x504] ss:$16 sps:$4 sm:$0xff]   ;;  %v6650_v30 = vld [vmem:[#allocation6 + $0x720] ss:$16 sps:$4 sm:$0xff]  }
 0x234   :  { %4747 = vmatprep.subr.bf16.mxu1 %v6580_v56  ;;  %v548_v56 = vsub.s32 5, %v7239_v17 }
 0x236   :  { %4705 = vmatpush1.bf16.msra.mxu0 %v6521_v51  ;;  %v6658_v51 = vld [vmem:[#allocation6 + $0x704] ss:$16 sps:$4 sm:$0xff]  }
 0x237   :  { %4706 = vmatprep.subr.bf16.mxu0 %v6526_v31  ;;  %4748 = vmatpush1.bf16.msra.mxu1 %v6578_v22  ;;  %v544_v31 = vsub.s32 4, %v7239_v17  ;;  %v2851_v22 = vpop.f32.mrf.mxu1 }
 0x238   :  { %4749 = vmatprep.subr.bf16.mxu1 %v6586_v33  ;;  %v6560_v33 = vld [vmem:[#allocation6 + $0x500] ss:$16 sps:$4 sm:$0xff]  }
 0x23a   :  { %4707 = vmatpush1.bf16.msra.mxu0 %v6524_v35  ;;  %v2812_v35 = vpop.f32.mrf.mxu0 }
 0x23b   :  { %4708 = vmatprep.subr.bf16.mxu0 %v6529_v36  ;;  %4750 = vmatpush1.bf16.msra.mxu1 %v6584_v38  ;;  %v6565_v36 = vld [vmem:[#allocation6 + $0xec] ss:$16 sps:$4 sm:$0xff]   ;;  %v6656_v38 = vld [vmem:[#allocation6 + $0x700] ss:$16 sps:$4 sm:$0xff]  }
 0x23c   :  { %4751 = vmatprep.subr.bf16.mxu1 %v6592_v16  ;;  %v549_v16 = vrot.slane %v7323_v53, %v548_v56  ;;  %v6617_v56 = vld [vmem:[#allocation6 + $0x1c8] ss:$16 sps:$4 sm:$0xff]  }
 0x23e   :  { %4709 = vmatpush1.bf16.msra.mxu0 %v6527_v52  ;;  %v6664_v52 = vld [vmem:[#allocation6 + $0x2ec] ss:$16 sps:$4 sm:$0xff]  }
 0x23f   :  { %4710 = vmatprep.subr.bf16.mxu0 %v6532_v39  ;;  %4752 = vmatpush1.bf16.msra.mxu1 %v6590_v34  ;;  %v545_v39 = vrot.slane %v7323_v53, %v544_v31  ;;  %v2853_v34 = vpop.f32.mrf.mxu1 }
 0x240   :  { %4753 = vmatprep.subr.bf16.mxu1 %v6598_v2  ;;  %v2814_v2 = vpop.f32.mrf.mxu0 }
 0x242   :  { %4711 = vmatpush1.bf16.msra.mxu0 %v6530_v19  ;;  %v2811_v19 = vadd.f32 %v2810_v5, %v549_v16  ;;  %v6613_v5 = vld [vmem:[#allocation6 + $0x1ec] ss:$16 sps:$4 sm:$0xff]  }
 0x243   :  { %4712 = vmatprep.subr.bf16.mxu0 %v6535_v12  ;;  %4754 = vmatpush1.bf16.msra.mxu1 %v6596_v41  ;;  %v2813_v12 = vadd.f32 %v2812_v35, %v545_v39  ;;  %v2809_v41 = vadd.f32 %v2808_v23, %v545_v39  ;;  %v6595_v23 = vld [vmem:[#allocation6 + $0x4c] ss:$16 sps:$4 sm:$0xff]  }
 0x244   :  { %4755 = vmatprep.subr.bf16.mxu1 %v6604_v45  ;;  %v2855_v45 = vpop.f32.mrf.mxu1 }
 0x246   :  { %4713 = vmatpush1.bf16.msra.mxu0 %v6533_v29 }
 0x247   :  { %4714 = vmatprep.subr.bf16.mxu0 %v6538_v59  ;;  %4756 = vmatpush1.bf16.msra.mxu1 %v6602_v48  ;;  %v2815_v59 = vadd.f32 %v2814_v2, %v549_v16  ;;  %v556_v16 = vsub.s32 7, %v7239_v17  ;;  %v6643_v2 = vld [vmem:[#allocation6 + $0x14c] ss:$16 sps:$4 sm:$0xff]  }
 0x248   :  { %4757 = vmatprep.subr.bf16.mxu1 %v6610_v49  ;;  %v2854_v49 = vadd.f32 %v2853_v34, %v2811_v19  ;;  %v6635_v34 = vld [vmem:[#allocation6 + $0x168] ss:$16 sps:$4 sm:$0xff]  }
 0x249   :  { %v557_v19 = vrot.slane %v7323_v53, %v556_v16  ;;  %v6691_v16 = vld [vmem:[#allocation6 + $0x44c] ss:$16 sps:$4 sm:$0xff]  }
 0x24a   :  { %4715 = vmatpush1.bf16.msra.mxu0 %v6536_v50  ;;  %v2856_v50 = vadd.f32 %v2855_v45, %v2813_v12  ;;  %v6641_v45 = vld [vmem:[#allocation6 + $0x148] ss:$16 sps:$4 sm:$0xff]  }
 0x24b   :  { %4716 = vmatprep.subr.bf16.mxu0 %v6541_v54  ;;  %4758 = vmatpush1.bf16.msra.mxu1 %v6608_v58  ;;  %v2852_v54 = vadd.f32 %v2851_v22, %v2809_v41  ;;  %v2857_v58 = vpop.f32.mrf.mxu1  ;;  %v6623_v22 = vld [vmem:[#allocation6 + $0x1a8] ss:$16 sps:$4 sm:$0xff]  }
 0x24c   :  { %4759 = vmatprep.subr.bf16.mxu1 %v6616_v11 }
 0x24e   :  { %4717 = vmatpush2.bf16.msra.mxu0 %v6539_v61  ;;  %v2858_v61 = vadd.f32 %v2857_v58, %v2815_v59  ;;  %v6649_v59 = vld [vmem:[#allocation6 + $0x12c] ss:$16 sps:$4 sm:$0xff]  }
 0x24f   :  { %4718 = vmatprep.subr.bf16.mxu0 %v6544_v62  ;;  %4760 = vmatpush2.bf16.msra.mxu1 %v6614_v63 }
 0x250   :  { %4761 = vmatprep.subr.bf16.mxu1 %v6622_v0 }
 0x252   :  { %4719 = vmatpush2.bf16.msra.mxu0 %v6542_v1 }
 0x253   :  { %4720 = vmatprep.subr.bf16.mxu0 %v6547_v3  ;;  %4762 = vmatpush2.bf16.msra.mxu1 %v6620_v4 }
 0x254   :  { %4763 = vmatprep.subr.bf16.mxu1 %v6628_v6 }
 0x256   :  { %4721 = vmatpush2.bf16.msra.mxu0 %v6545_v7 }
 0x257   :  { %4722 = vmatprep.subr.bf16.mxu0 %v6550_v8  ;;  %4764 = vmatpush2.bf16.msra.mxu1 %v6626_v42 }
 0x258   :  { %4765 = vmatprep.subr.bf16.mxu1 %v6634_v9  ;;  %v6563_v9 = vld [vmem:[#allocation6 + $0xe8] ss:$16 sps:$4 sm:$0xff]  }
 0x25a   :  { %4723 = vmatpush2.bf16.msra.mxu0 %v6548_v37 }
 0x25b   :  { %4724 = vmatprep.subr.bf16.mxu0 %v6553_v10  ;;  %4766 = vmatpush2.bf16.msra.mxu1 %v6632_v14  ;;  %v6571_v10 = vld [vmem:[#allocation6 + $0xcc] ss:$16 sps:$4 sm:$0xff]   ;;  %v6569_v14 = vld [vmem:[#allocation6 + $0xc8] ss:$16 sps:$4 sm:$0xff]  }
 0x25c   :  { %4767 = vmatprep.subr.bf16.mxu1 %v6640_v18  ;;  %v6577_v18 = vld [vmem:[#allocation6 + $0xac] ss:$16 sps:$4 sm:$0xff]  }
 0x25e   :  { %4725 = vmatpush2.bf16.msra.mxu0 %v6551_v13  ;;  %v6575_v13 = vld [vmem:[#allocation6 + $0xa8] ss:$16 sps:$4 sm:$0xff]  }
 0x25f   :  { %4726 = vmatprep.subr.bf16.mxu0 %v6556_v57  ;;  %4768 = vmatpush2.bf16.msra.mxu1 %v6638_v20  ;;  %v6583_v57 = vld [vmem:[#allocation6 + $0x8c] ss:$16 sps:$4 sm:$0xff]   ;;  %v6581_v20 = vld [vmem:[#allocation6 + $0x88] ss:$16 sps:$4 sm:$0xff]  }
 0x260   :  { %4769 = vmatprep.subr.bf16.mxu1 %v6646_v21  ;;  %v6589_v21 = vld [vmem:[#allocation6 + $0x6c] ss:$16 sps:$4 sm:$0xff]  }
 0x262   :  { %4727 = vmatpush2.bf16.msra.mxu0 %v6554_v44  ;;  %v6587_v44 = vld [vmem:[#allocation6 + $0x68] ss:$16 sps:$4 sm:$0xff]  }
 0x263   :  { %4728 = vmatprep.subr.bf16.mxu0 %v6559_v24  ;;  %4770 = vmatpush2.bf16.msra.mxu1 %v6644_v25  ;;  %v6593_v24 = vld [vmem:[#allocation6 + $0x48] ss:$16 sps:$4 sm:$0xff]   ;;  %v6601_v25 = vld [vmem:[#allocation6 + $0x2c] ss:$16 sps:$4 sm:$0xff]  }
 0x264   :  { %4771 = vmatprep.subr.bf16.mxu1 %v6652_v60  ;;  %v6607_v60 = vld [vmem:[#allocation6 + $0xc] ss:$16 sps:$4 sm:$0xff]  }
 0x266   :  { %4729 = vmatpush2.bf16.msra.mxu0 %v6557_v46  ;;  %v6605_v46 = vld [vmem:[#allocation6 + $0x8] ss:$16 sps:$4 sm:$0xff]  }
 0x267   :  { %4730 = vmatprep.subr.bf16.mxu0 %v6562_v28  ;;  %4772 = vmatpush2.bf16.msra.mxu1 %v6650_v30  ;;  %v6611_v28 = vld [vmem:[#allocation6 + $0x1e8] ss:$16 sps:$4 sm:$0xff]   ;;  %v6619_v30 = vld [vmem:[#allocation6 + $0x1cc] ss:$16 sps:$4 sm:$0xff]  }
 0x268   :  { %4773 = vmatprep.subr.bf16.mxu1 %v6658_v51  ;;  %v6625_v51 = vld [vmem:[#allocation6 + $0x1ac] ss:$16 sps:$4 sm:$0xff]  }
 0x26a   :  { %4731 = vmatpush2.bf16.msra.mxu0 %v6560_v33  ;;  %v6631_v33 = vld [vmem:[#allocation6 + $0x18c] ss:$16 sps:$4 sm:$0xff]  }
 0x26b   :  { %4786 = vmatprep.subr.bf16.mxu0 %v6565_v36  ;;  %4774 = vmatpush2.bf16.msra.mxu1 %v6656_v38  ;;  %v6629_v36 = vld [vmem:[#allocation6 + $0x188] ss:$16 sps:$4 sm:$0xff]   ;;  %v6637_v38 = vld [vmem:[#allocation6 + $0x16c] ss:$16 sps:$4 sm:$0xff]  }
 0x26c   :  { %4829 = vmatprep.subr.bf16.mxu1 %v6664_v52  ;;  %v552_v52 = vsub.s32 6, %v7239_v17 }
 0x26d   :  { %v2894_v29 = vpop.f32.mrf.mxu0 }
 0x26e   :  { %v2895_v0 = vadd.f32 %v2894_v29, %v2852_v54  ;;  %v2937_v31 = vpop.f32.mrf.mxu1  ;;  %v553_v12 = vrot.slane %v7323_v53, %v552_v52  ;;  %v6686_v52 = vld [vmem:[#allocation6 + $0x268] ss:$16 sps:$4 sm:$0xff]  }
 0x26f   :  { %v2896_v48 = vpop.f32.mrf.mxu0 }
 0x270   :  { %v2897_v62 = vadd.f32 %v2896_v48, %v2854_v49  ;;  %v3036_v8 = vmax.f32 %v2895_v0, 0.0  ;;  %v2939_v35 = vpop.f32.mrf.mxu1  ;;  %v2938_v54 = vadd.f32 %v2937_v31, %v553_v12  ;;  %v6655_v0 = vld [vmem:[#allocation6 + $0x10c] ss:$16 sps:$4 sm:$0xff]  }
 0x271   :  { %v2898_v11 = vpop.f32.mrf.mxu0  ;;  %v2940_v48 = vadd.f32 %v2939_v35, %v557_v19  ;;  %v6679_v31 = vld [vmem:[#allocation6 + $0x48c] ss:$16 sps:$4 sm:$0xff]  }
 0x272   :  { %v2899_v63 = vadd.f32 %v2898_v11, %v2856_v50  ;;  %v3037_v6 = vmax.f32 %v2897_v62, 0.0  ;;  %v2941_v39 = vpop.f32.mrf.mxu1  ;;  %v6647_v62 = vld [vmem:[#allocation6 + $0x128] ss:$16 sps:$4 sm:$0xff]   ;;  %v6685_v35 = vld [vmem:[#allocation6 + $0x46c] ss:$16 sps:$4 sm:$0xff]  }
 0x273   :  { %v2900_v1 = vpop.f32.mrf.mxu0  ;;  %v2942_v58 = vadd.f32 %v2941_v39, %v553_v12  ;;  %v6689_v39 = vld [vmem:[#allocation6 + $0x448] ss:$16 sps:$4 sm:$0xff]  }
 0x274   :  { %v2901_v3 = vadd.f32 %v2900_v1, %v2858_v61  ;;  %v3044_v4 = vmax.f32 %v2899_v63, 0.0  ;;  %v2943_v41 = vpop.f32.mrf.mxu1  ;;  %v6695_v12 = vld [vmem:[#allocation6 + $0x428] ss:$16 sps:$4 sm:$0xff]  }
 0x275   :  { %v2944_v1 = vadd.f32 %v2943_v41, %v557_v19  ;;  %v6692_v19 = vld [vmem:[#allocation6 + $0x248] ss:$16 sps:$4 sm:$0xff]   ;;  %v6700_v41 = vld [vmem:[#allocation6 + $0x22c] ss:$16 sps:$4 sm:$0xff]  }
 0x276   :  { %v3045_v7 = vmax.f32 %v2901_v3, 0.0  ;;  %v7344_v37 = vpack.c.bf16 %v3044_v4, %v3036_v8 }
 0x278   :  { %v7342_v42 = vpack.c.bf16 %v3045_v7, %v3037_v6 }
 0x27a   :  { %4732 = vmatprep.mubr.bf16.mxu0 %v7342_v42 }
 0x27b   :  { %4733 = vmatmul.mubr.bf16.vlgmr.msra.gmra.mxu0 %v7344_v37 }
 0x27c   :  { %4787 = vmatpush1.bf16.msra.mxu0 %v6563_v9  ;;  %4818 = vmatprep.mubr.bf16.mxu0 %v7304_v43  ;;  %v6599_v43 = vld [vmem:[#allocation6 + $0x28] ss:$16 sps:$4 sm:$0xff]  }
 0x27d   :  { %4788 = vmatprep.subr.bf16.mxu0 %v6571_v10  ;;  %v6653_v10 = vld [vmem:[#allocation6 + $0x108] ss:$16 sps:$4 sm:$0xff]  }
 0x280   :  { %4789 = vmatpush1.bf16.msra.mxu0 %v6569_v14 }
 0x281   :  { %4790 = vmatprep.subr.bf16.mxu0 %v6577_v18  ;;  %v6661_v18 = vld [vmem:[#allocation6 + $0x4ec] ss:$16 sps:$4 sm:$0xff]  }
 0x284   :  { %4791 = vmatpush1.bf16.msra.mxu0 %v6575_v13 }
 0x285   :  { %4792 = vmatprep.subr.bf16.mxu0 %v6583_v57 }
 0x288   :  { %4793 = vmatpush1.bf16.msra.mxu0 %v6581_v20 }
 0x289   :  { %4794 = vmatprep.subr.bf16.mxu0 %v6589_v21 }
 0x28c   :  { %4795 = vmatpush1.bf16.msra.mxu0 %v6587_v44 }
 0x28d   :  { %4796 = vmatprep.subr.bf16.mxu0 %v6595_v23  ;;  %v6659_v23 = vld [vmem:[#allocation6 + $0x4e8] ss:$16 sps:$4 sm:$0xff]  }
 0x290   :  { %4797 = vmatpush1.bf16.msra.mxu0 %v6593_v24  ;;  %v6667_v24 = vld [vmem:[#allocation6 + $0x4cc] ss:$16 sps:$4 sm:$0xff]  }
 0x291   :  { %4798 = vmatprep.subr.bf16.mxu0 %v6601_v25 }
 0x294   :  { %4799 = vmatpush1.bf16.msra.mxu0 %v6599_v43 }
 0x295   :  { %4800 = vmatprep.subr.bf16.mxu0 %v6607_v60  ;;  %v6662_v60 = vld [vmem:[#allocation6 + $0x2e8] ss:$16 sps:$4 sm:$0xff]  }
 0x298   :  { %4801 = vmatpush1.bf16.msra.mxu0 %v6605_v46 }
 0x299   :  { %4802 = vmatprep.subr.bf16.mxu0 %v6613_v5  ;;  %v6665_v5 = vld [vmem:[#allocation6 + $0x4c8] ss:$16 sps:$4 sm:$0xff]  }
 0x29c   :  { %4803 = vmatpush2.bf16.msra.mxu0 %v6611_v28  ;;  %v6670_v28 = vld [vmem:[#allocation6 + $0x2cc] ss:$16 sps:$4 sm:$0xff]  }
 0x29d   :  { %4804 = vmatprep.subr.bf16.mxu0 %v6619_v30  ;;  %v6673_v30 = vld [vmem:[#allocation6 + $0x4ac] ss:$16 sps:$4 sm:$0xff]  }
 0x2a0   :  { %4805 = vmatpush2.bf16.msra.mxu0 %v6617_v56  ;;  %v6668_v56 = vld [vmem:[#allocation6 + $0x2c8] ss:$16 sps:$4 sm:$0xff]  }
 0x2a1   :  { %4806 = vmatprep.subr.bf16.mxu0 %v6625_v51  ;;  %v6676_v51 = vld [vmem:[#allocation6 + $0x2ac] ss:$16 sps:$4 sm:$0xff]  }
 0x2a4   :  { %4807 = vmatpush2.bf16.msra.mxu0 %v6623_v22  ;;  %v6677_v22 = vld [vmem:[#allocation6 + $0x488] ss:$16 sps:$4 sm:$0xff]  }
 0x2a5   :  { %4808 = vmatprep.subr.bf16.mxu0 %v6631_v33  ;;  %v6682_v33 = vld [vmem:[#allocation6 + $0x28c] ss:$16 sps:$4 sm:$0xff]  }
 0x2a8   :  { %4809 = vmatpush2.bf16.msra.mxu0 %v6629_v36  ;;  %v6680_v36 = vld [vmem:[#allocation6 + $0x288] ss:$16 sps:$4 sm:$0xff]  }
 0x2a9   :  { %4810 = vmatprep.subr.bf16.mxu0 %v6637_v38  ;;  %v6688_v38 = vld [vmem:[#allocation6 + $0x26c] ss:$16 sps:$4 sm:$0xff]  }
 0x2ac   :  { %4811 = vmatpush2.bf16.msra.mxu0 %v6635_v34  ;;  %v6694_v34 = vld [vmem:[#allocation6 + $0x24c] ss:$16 sps:$4 sm:$0xff]  }
 0x2ad   :  { %v2980_v29 = vpop.f32.mrf.mxu0  ;;  %4812 = vmatprep.subr.bf16.mxu0 %v6643_v2  ;;  %v6697_v2 = vld [vmem:[#allocation6 + $0x42c] ss:$16 sps:$4 sm:$0xff]  }
 0x2ae   :  { %v3023_v49 = vpop.f32.mrf.mxu1  ;;  %v2981_v53 = vadd.f32 %v2980_v29, %v2938_v54  ;;  %v6698_v29 = vld [vmem:[#allocation6 + $0x228] ss:$16 sps:$4 sm:$0xff]  }
 0x2af   :  { %v2982_v50 = vpop.f32.mrf.mxu0  ;;  %v6707_v54 = vld [vmem:[#allocation6 + $0x5e8] ss:$16 sps:$4 sm:$0xff]  }
 0x2b0   :  { %v2983_v11 = vadd.f32 %v2982_v50, %v2940_v48  ;;  %v3025_v61 = vpop.f32.mrf.mxu1  ;;  %4813 = vmatpush2.bf16.msra.mxu0 %v6641_v45  ;;  %v3024_v13 = vadd.f32 %v3023_v49, %v2981_v53  ;;  %v6703_v45 = vld [vmem:[#allocation6 + $0x40c] ss:$16 sps:$4 sm:$0xff]   ;;  %v6704_v50 = vld [vmem:[#allocation6 + $0x208] ss:$16 sps:$4 sm:$0xff]  }
 0x2b1   :  { %v2984_v63 = vpop.f32.mrf.mxu0  ;;  %4814 = vmatprep.subr.bf16.mxu0 %v6649_v59  ;;  %v6701_v59 = vld [vmem:[#allocation6 + $0x408] ss:$16 sps:$4 sm:$0xff]   ;;  %v6706_v48 = vld [vmem:[#allocation6 + $0x20c] ss:$16 sps:$4 sm:$0xff]  }
 0x2b2   :  { %v2985_v3 = vadd.f32 %v2984_v63, %v2942_v58  ;;  %v3027_v4 = vpop.f32.mrf.mxu1  ;;  %v3026_v7 = vadd.f32 %v3025_v61, %v2983_v11  ;;  %v3038_v25 = vmax.f32 %v3024_v13, 0.0  ;;  %v6709_v49 = vld [vmem:[#allocation6 + $0x5ec] ss:$16 sps:$4 sm:$0xff]   ;;  %v6710_v61 = vld [vmem:[#allocation6 + $0x3e8] ss:$16 sps:$4 sm:$0xff]  }
 0x2b3   :  { %v2986_v6 = vpop.f32.mrf.mxu0  ;;  %v6712_v58 = vld [vmem:[#allocation6 + $0x3ec] ss:$16 sps:$4 sm:$0xff]   ;;  %v6719_v53 = vld [vmem:[#allocation6 + $0x5a8] ss:$16 sps:$4 sm:$0xff]  }
 0x2b4   :  { %v3028_v8 = vadd.f32 %v3027_v4, %v2985_v3  ;;  %v2987_v9 = vadd.f32 %v2986_v6, %v2944_v1  ;;  %4815 = vmatpush2.bf16.msra.mxu0 %v6647_v62  ;;  %v3029_v14 = vpop.f32.mrf.mxu1  ;;  %v3039_v20 = vmax.f32 %v3026_v7, 0.0  ;;  %v6715_v11 = vld [vmem:[#allocation6 + $0x5cc] ss:$16 sps:$4 sm:$0xff]   ;;  %v6713_v62 = vld [vmem:[#allocation6 + $0x5c8] ss:$16 sps:$4 sm:$0xff]  }
 0x2b5   :  { %4816 = vmatprep.subr.bf16.mxu0 %v6655_v0  ;;  %v6718_v63 = vld [vmem:[#allocation6 + $0x3cc] ss:$16 sps:$4 sm:$0xff]   ;;  %v6716_v1 = vld [vmem:[#allocation6 + $0x3c8] ss:$16 sps:$4 sm:$0xff]  }
 0x2b6   :  { %v3030_v57 = vadd.f32 %v3029_v14, %v2987_v9  ;;  %v3046_v21 = vmax.f32 %v3028_v8, 0.0  ;;  %v6721_v0 = vld [vmem:[#allocation6 + $0x5ac] ss:$16 sps:$4 sm:$0xff]   ;;  %v6722_v6 = vld [vmem:[#allocation6 + $0x3a8] ss:$16 sps:$4 sm:$0xff]  }
 0x2b7   :  { %v6724_v3 = vld [vmem:[#allocation6 + $0x3ac] ss:$16 sps:$4 sm:$0xff]   ;;  %v6725_v7 = vld [vmem:[#allocation6 + $0x588] ss:$16 sps:$4 sm:$0xff]  }
 0x2b8   :  { %v3047_v44 = vmax.f32 %v3030_v57, 0.0  ;;  %4817 = vmatpush2.bf16.msra.mxu0 %v6653_v10  ;;  %v7356_v46 = vpack.c.bf16 %v3046_v21, %v3038_v25  ;;  %v6727_v4 = vld [vmem:[#allocation6 + $0x58c] ss:$16 sps:$4 sm:$0xff]   ;;  %v6728_v10 = vld [vmem:[#allocation6 + $0x388] ss:$16 sps:$4 sm:$0xff]  }
 0x2b9   :  { %4872 = vmatprep.subr.bf16.mxu0 %v6661_v18  ;;  %v6730_v8 = vld [vmem:[#allocation6 + $0x38c] ss:$16 sps:$4 sm:$0xff]   ;;  %v6731_v14 = vld [vmem:[#allocation6 + $0x568] ss:$16 sps:$4 sm:$0xff]  }
 0x2ba   :  { %v7353_v43 = vpack.c.bf16 %v3047_v44, %v3039_v20  ;;  %v6733_v9 = vld [vmem:[#allocation6 + $0x56c] ss:$16 sps:$4 sm:$0xff]   ;;  %v6734_v57 = vld [vmem:[#allocation6 + $0x368] ss:$16 sps:$4 sm:$0xff]  }
 0x2bb   :  { %4819 = vmatmul.mubr.bf16.vlgmr.msra.gmra.mxu0 %v7285_v40  ;;  %v6671_v40 = vld [vmem:[#allocation6 + $0x4a8] ss:$16 sps:$4 sm:$0xff]   ;;  %v6736_v18 = vld [vmem:[#allocation6 + $0x36c] ss:$16 sps:$4 sm:$0xff]  }
 0x2bc   :  { %4873 = vmatpush1.bf16.msra.mxu0 %v6659_v23  ;;  %4904 = vmatprep.mubr.bf16.mxu0 %v7342_v42  ;;  %v6674_v42 = vld [vmem:[#allocation6 + $0x2a8] ss:$16 sps:$4 sm:$0xff]   ;;  %v6739_v13 = vld [vmem:[#allocation6 + $0x54c] ss:$16 sps:$4 sm:$0xff]  }
 0x2bd   :  { %4775 = vmatprep.mubr.bf16.mxu1 %v7353_v43  ;;  %4874 = vmatprep.subr.bf16.mxu0 %v6667_v24  ;;  %v6737_v20 = vld [vmem:[#allocation6 + $0x548] ss:$16 sps:$4 sm:$0xff]   ;;  %v6742_v21 = vld [vmem:[#allocation6 + $0x34c] ss:$16 sps:$4 sm:$0xff]  }
 0x2be   :  { %4776 = vmatmul.mubr.bf16.vlgmr.msra.gmra.mxu1 %v7356_v46  ;;  %v6745_v44 = vld [vmem:[#allocation6 + $0x52c] ss:$16 sps:$4 sm:$0xff]   ;;  %v6740_v23 = vld [vmem:[#allocation6 + $0x348] ss:$16 sps:$4 sm:$0xff]  }
 0x2bf   :  { %4830 = vmatpush1.bf16.msra.mxu1 %v6662_v60  ;;  %4861 = vmatprep.mubr.bf16.mxu1 %v7319_v15  ;;  %v6683_v15 = vld [vmem:[#allocation6 + $0x468] ss:$16 sps:$4 sm:$0xff]   ;;  %v6748_v25 = vld [vmem:[#allocation6 + $0x32c] ss:$16 sps:$4 sm:$0xff]  }
 0x2c0   :  { %4875 = vmatpush1.bf16.msra.mxu0 %v6665_v5  ;;  %4831 = vmatprep.subr.bf16.mxu1 %v6670_v28  ;;  %v6743_v24 = vld [vmem:[#allocation6 + $0x528] ss:$16 sps:$4 sm:$0xff]   ;;  %v6751_v60 = vld [vmem:[#allocation6 + $0x50c] ss:$16 sps:$4 sm:$0xff]  }
 0x2c1   :  { %4876 = vmatprep.subr.bf16.mxu0 %v6673_v30  ;;  %v6746_v5 = vld [vmem:[#allocation6 + $0x328] ss:$16 sps:$4 sm:$0xff]   ;;  %v6754_v30 = vld [vmem:[#allocation6 + $0x30c] ss:$16 sps:$4 sm:$0xff]  }
 0x2c2   :  { %v6749_v28 = vld [vmem:[#allocation6 + $0x508] ss:$16 sps:$4 sm:$0xff]  }
 0x2c3   :  { %4832 = vmatpush1.bf16.msra.mxu1 %v6668_v56  ;;  %v6805_v56 = vld [vmem:[#allocation9 + $0x74] ss:$8 sps:$4 sm:$0xff]  }
 0x2c4   :  { %4877 = vmatpush1.bf16.msra.mxu0 %v6671_v40  ;;  %4833 = vmatprep.subr.bf16.mxu1 %v6676_v51  ;;  %v6752_v40 = vld [vmem:[#allocation6 + $0x308] ss:$16 sps:$4 sm:$0xff]   ;;  %v6757_v51 = vld [vmem:[#allocation6 + $0x6ec] ss:$16 sps:$4 sm:$0xff]  }
 0x2c5   :  { %4878 = vmatprep.subr.bf16.mxu0 %v6679_v31  ;;  %v6803_v31 = vld [vmem:[#allocation9 + $0x70] ss:$8 sps:$4 sm:$0xff]  }
 0x2c7   :  { %4834 = vmatpush1.bf16.msra.mxu1 %v6674_v42  ;;  %v6808_v42 = vld [vmem:[#allocation9 + $0x64] ss:$8 sps:$4 sm:$0xff]  }
 0x2c8   :  { %4879 = vmatpush1.bf16.msra.mxu0 %v6677_v22  ;;  %4835 = vmatprep.subr.bf16.mxu1 %v6682_v33  ;;  %v6755_v22 = vld [vmem:[#allocation6 + $0x6e8] ss:$16 sps:$4 sm:$0xff]   ;;  %v6760_v33 = vld [vmem:[#allocation6 + $0x6cc] ss:$16 sps:$4 sm:$0xff]  }
 0x2c9   :  { %4880 = vmatprep.subr.bf16.mxu0 %v6685_v35  ;;  %v6806_v35 = vld [vmem:[#allocation9 + $0x60] ss:$8 sps:$4 sm:$0xff]  }
 0x2cb   :  { %4836 = vmatpush1.bf16.msra.mxu1 %v6680_v36  ;;  %v6811_v36 = vld [vmem:[#allocation9 + $0x54] ss:$8 sps:$4 sm:$0xff]  }
 0x2cc   :  { %4881 = vmatpush1.bf16.msra.mxu0 %v6683_v15  ;;  %4837 = vmatprep.subr.bf16.mxu1 %v6688_v38  ;;  %v6758_v15 = vld [vmem:[#allocation6 + $0x6c8] ss:$16 sps:$4 sm:$0xff]   ;;  %v6763_v38 = vld [vmem:[#allocation6 + $0x6ac] ss:$16 sps:$4 sm:$0xff]  }
 0x2cd   :  { %4882 = vmatprep.subr.bf16.mxu0 %v6691_v16  ;;  %v6809_v16 = vld [vmem:[#allocation9 + $0x50] ss:$8 sps:$4 sm:$0xff]  }
 0x2cf   :  { %4838 = vmatpush1.bf16.msra.mxu1 %v6686_v52  ;;  %v6814_v52 = vld [vmem:[#allocation9 + $0x44] ss:$8 sps:$4 sm:$0xff]  }
 0x2d0   :  { %4883 = vmatpush1.bf16.msra.mxu0 %v6689_v39  ;;  %4839 = vmatprep.subr.bf16.mxu1 %v6694_v34  ;;  %v6766_v39 = vld [vmem:[#allocation6 + $0x68c] ss:$16 sps:$4 sm:$0xff]  }
 0x2d1   :  { %4884 = vmatprep.subr.bf16.mxu0 %v6697_v2  ;;  %v6812_v34 = vld [vmem:[#allocation9 + $0x40] ss:$8 sps:$4 sm:$0xff]   ;;  %v6817_v2 = vld [vmem:[#allocation9 + $0x34] ss:$8 sps:$4 sm:$0xff]  }
 0x2d3   :  { %4840 = vmatpush1.bf16.msra.mxu1 %v6692_v19  ;;  %v6769_v19 = vld [vmem:[#allocation6 + $0x66c] ss:$16 sps:$4 sm:$0xff]  }
 0x2d4   :  { %4885 = vmatpush1.bf16.msra.mxu0 %v6695_v12  ;;  %4841 = vmatprep.subr.bf16.mxu1 %v6700_v41  ;;  %v6820_v12 = vld [vmem:[#allocation9 + $0x24] ss:$8 sps:$4 sm:$0xff]  }
 0x2d5   :  { %4886 = vmatprep.subr.bf16.mxu0 %v6703_v45  ;;  %v6767_v41 = vld [vmem:[#allocation6 + $0x668] ss:$16 sps:$4 sm:$0xff]   ;;  %v6772_v45 = vld [vmem:[#allocation6 + $0x64c] ss:$16 sps:$4 sm:$0xff]  }
 0x2d7   :  { %4842 = vmatpush1.bf16.msra.mxu1 %v6698_v29  ;;  %v6818_v29 = vld [vmem:[#allocation9 + $0x20] ss:$8 sps:$4 sm:$0xff]  }
 0x2d8   :  { %4887 = vmatpush1.bf16.msra.mxu0 %v6701_v59  ;;  %4843 = vmatprep.subr.bf16.mxu1 %v6706_v48  ;;  %v6823_v59 = vld [vmem:[#allocation9 + $0x14] ss:$8 sps:$4 sm:$0xff]  }
 0x2d9   :  { %4888 = vmatprep.subr.bf16.mxu0 %v6709_v49  ;;  %v6770_v48 = vld [vmem:[#allocation6 + $0x648] ss:$16 sps:$4 sm:$0xff]   ;;  %v6775_v49 = vld [vmem:[#allocation6 + $0x62c] ss:$16 sps:$4 sm:$0xff]  }
 0x2db   :  { %4844 = vmatpush1.bf16.msra.mxu1 %v6704_v50  ;;  %v6821_v50 = vld [vmem:[#allocation9 + $0x10] ss:$8 sps:$4 sm:$0xff]  }
 0x2dc   :  { %4889 = vmatpush2.bf16.msra.mxu0 %v6707_v54  ;;  %4845 = vmatprep.subr.bf16.mxu1 %v6712_v58  ;;  %v6826_v54 = vld [vmem:[#allocation9 + $0x4] ss:$8 sps:$4 sm:$0xff]  }
 0x2dd   :  { %4890 = vmatprep.subr.bf16.mxu0 %v6715_v11  ;;  %v6773_v58 = vld [vmem:[#allocation6 + $0x628] ss:$16 sps:$4 sm:$0xff]   ;;  %v6778_v11 = vld [vmem:[#allocation6 + $0x60c] ss:$16 sps:$4 sm:$0xff]  }
 0x2df   :  { %4846 = vmatpush2.bf16.msra.mxu1 %v6710_v61  ;;  %v6824_v61 = vld [vmem:[#allocation9] ss:$8 sps:$4 sm:$0xff]  }
 0x2e0   :  { %4891 = vmatpush2.bf16.msra.mxu0 %v6713_v62  ;;  %4847 = vmatprep.subr.bf16.mxu1 %v6718_v63  ;;  %v6829_v62 = vld [vmem:[#allocation9 + $0xf4] ss:$8 sps:$4 sm:$0xff]  }
 0x2e1   :  { %4892 = vmatprep.subr.bf16.mxu0 %v6721_v0  ;;  %v6776_v63 = vld [vmem:[#allocation6 + $0x608] ss:$16 sps:$4 sm:$0xff]   ;;  %v6781_v0 = vld [vmem:[#allocation6 + $0x7ec] ss:$16 sps:$4 sm:$0xff]  }
 0x2e3   :  { %4848 = vmatpush2.bf16.msra.mxu1 %v6716_v1  ;;  %v6827_v1 = vld [vmem:[#allocation9 + $0xf0] ss:$8 sps:$4 sm:$0xff]  }
 0x2e4   :  { %4893 = vmatpush2.bf16.msra.mxu0 %v6719_v53  ;;  %4849 = vmatprep.subr.bf16.mxu1 %v6724_v3  ;;  %v6832_v53 = vld [vmem:[#allocation9 + $0xe4] ss:$8 sps:$4 sm:$0xff]  }
 0x2e5   :  { %4894 = vmatprep.subr.bf16.mxu0 %v6727_v4  ;;  %v6779_v3 = vld [vmem:[#allocation6 + $0x7e8] ss:$16 sps:$4 sm:$0xff]   ;;  %v6784_v4 = vld [vmem:[#allocation6 + $0x7cc] ss:$16 sps:$4 sm:$0xff]  }
 0x2e7   :  { %4850 = vmatpush2.bf16.msra.mxu1 %v6722_v6  ;;  %v6830_v6 = vld [vmem:[#allocation9 + $0xe0] ss:$8 sps:$4 sm:$0xff]  }
 0x2e8   :  { %4895 = vmatpush2.bf16.msra.mxu0 %v6725_v7  ;;  %4851 = vmatprep.subr.bf16.mxu1 %v6730_v8  ;;  %v6835_v7 = vld [vmem:[#allocation9 + $0xd4] ss:$8 sps:$4 sm:$0xff]  }
 0x2e9   :  { %4896 = vmatprep.subr.bf16.mxu0 %v6733_v9  ;;  %v6782_v8 = vld [vmem:[#allocation6 + $0x7c8] ss:$16 sps:$4 sm:$0xff]   ;;  %v6787_v9 = vld [vmem:[#allocation6 + $0x7ac] ss:$16 sps:$4 sm:$0xff]  }
 0x2eb   :  { %4852 = vmatpush2.bf16.msra.mxu1 %v6728_v10  ;;  %v6833_v10 = vld [vmem:[#allocation9 + $0xd0] ss:$8 sps:$4 sm:$0xff]  }
 0x2ec   :  { %4897 = vmatpush2.bf16.msra.mxu0 %v6731_v14  ;;  %4853 = vmatprep.subr.bf16.mxu1 %v6736_v18  ;;  %v6838_v14 = vld [vmem:[#allocation9 + $0xc4] ss:$8 sps:$4 sm:$0xff]  }
 0x2ed   :  { %4898 = vmatprep.subr.bf16.mxu0 %v6739_v13  ;;  %v6785_v18 = vld [vmem:[#allocation6 + $0x7a8] ss:$16 sps:$4 sm:$0xff]   ;;  %v6790_v13 = vld [vmem:[#allocation6 + $0x78c] ss:$16 sps:$4 sm:$0xff]  }
 0x2ef   :  { %4854 = vmatpush2.bf16.msra.mxu1 %v6734_v57  ;;  %v6836_v57 = vld [vmem:[#allocation9 + $0xc0] ss:$8 sps:$4 sm:$0xff]  }
 0x2f0   :  { %4899 = vmatpush2.bf16.msra.mxu0 %v6737_v20  ;;  %4855 = vmatprep.subr.bf16.mxu1 %v6742_v21  ;;  %v6841_v20 = vld [vmem:[#allocation9 + $0xb4] ss:$8 sps:$4 sm:$0xff]  }
 0x2f1   :  { %4900 = vmatprep.subr.bf16.mxu0 %v6745_v44  ;;  %v6788_v21 = vld [vmem:[#allocation6 + $0x788] ss:$16 sps:$4 sm:$0xff]   ;;  %v6793_v44 = vld [vmem:[#allocation6 + $0x76c] ss:$16 sps:$4 sm:$0xff]  }
 0x2f3   :  { %4856 = vmatpush2.bf16.msra.mxu1 %v6740_v23  ;;  %v6839_v23 = vld [vmem:[#allocation9 + $0xb0] ss:$8 sps:$4 sm:$0xff]  }
 0x2f4   :  { %4901 = vmatpush2.bf16.msra.mxu0 %v6743_v24  ;;  %4857 = vmatprep.subr.bf16.mxu1 %v6748_v25  ;;  %v6844_v24 = vld [vmem:[#allocation9 + $0xa4] ss:$8 sps:$4 sm:$0xff]  }
 0x2f5   :  { %4902 = vmatprep.subr.bf16.mxu0 %v6751_v60  ;;  %v6791_v25 = vld [vmem:[#allocation6 + $0x768] ss:$16 sps:$4 sm:$0xff]   ;;  %v6796_v60 = vld [vmem:[#allocation6 + $0x74c] ss:$16 sps:$4 sm:$0xff]  }
 0x2f7   :  { %4858 = vmatpush2.bf16.msra.mxu1 %v6746_v5  ;;  %v6842_v5 = vld [vmem:[#allocation9 + $0xa0] ss:$8 sps:$4 sm:$0xff]  }
 0x2f8   :  { %4903 = vmatpush2.bf16.msra.mxu0 %v6749_v28  ;;  %4859 = vmatprep.subr.bf16.mxu1 %v6754_v30  ;;  %v6847_v28 = vld [vmem:[#allocation9 + $0x94] ss:$8 sps:$4 sm:$0xff]  }
 0x2f9   :  { %5366 = vmatprep.subr.bf16.mxu0 %v6805_v56  ;;  %v6794_v30 = vld [vmem:[#allocation6 + $0x748] ss:$16 sps:$4 sm:$0xff]   ;;  %v6799_v56 = vld [vmem:[#allocation6 + $0x72c] ss:$16 sps:$4 sm:$0xff]  }
 0x2fb   :  { %4860 = vmatpush2.bf16.msra.mxu1 %v6752_v40  ;;  %4905 = vmatmul.mubr.bf16.vlgmr.msra.gmra.mxu0 %v7344_v37  ;;  %v6761_v37 = vld [vmem:[#allocation6 + $0x6a8] ss:$16 sps:$4 sm:$0xff]   ;;  %v6845_v40 = vld [vmem:[#allocation9 + $0x90] ss:$8 sps:$4 sm:$0xff]  }
 0x2fc   :  { %4915 = vmatprep.subr.bf16.mxu1 %v6757_v51  ;;  %5367 = vmatpush1.bf16.msra.mxu0 %v6803_v31  ;;  %v6850_v51 = vld [vmem:[#allocation9 + $0x84] ss:$8 sps:$4 sm:$0xff]  }
 0x2fd   :  { %5368 = vmatprep.subr.bf16.mxu0 %v6808_v42  ;;  %v6797_v31 = vld [vmem:[#allocation6 + $0x728] ss:$16 sps:$4 sm:$0xff]   ;;  %v6802_v42 = vld [vmem:[#allocation6 + $0x70c] ss:$16 sps:$4 sm:$0xff]  }
 0x2fe   :  { %4862 = vmatmul.mubr.bf16.vlgmr.msra.gmra.mxu1 %v7334_v26  ;;  %v6764_v26 = vld [vmem:[#allocation6 + $0x688] ss:$16 sps:$4 sm:$0xff]  }
 0x2ff   :  { %4916 = vmatpush1.bf16.msra.mxu1 %v6755_v22  ;;  %4947 = vmatprep.mubr.bf16.mxu1 %v7353_v43  ;;  %v6815_v43 = vld [vmem:[#allocation9 + $0x30] ss:$8 sps:$4 sm:$0xff]   ;;  %v6848_v22 = vld [vmem:[#allocation9 + $0x80] ss:$8 sps:$4 sm:$0xff]  }
 0x300   :  { %4917 = vmatprep.subr.bf16.mxu1 %v6760_v33  ;;  %5369 = vmatpush1.bf16.msra.mxu0 %v6806_v35  ;;  %v6800_v33 = vld [vmem:[#allocation6 + $0x708] ss:$16 sps:$4 sm:$0xff]   ;;  %v6851_v35 = vld [vmem:[#allocation9 + $0x170] ss:$8 sps:$4 sm:$0xff]  }
 0x301   :  { %5370 = vmatprep.subr.bf16.mxu0 %v6811_v36  ;;  %v6853_v36 = vld [vmem:[#allocation9 + $0x174] ss:$8 sps:$4 sm:$0xff]  }
 0x303   :  { %4918 = vmatpush1.bf16.msra.mxu1 %v6758_v15  ;;  %v6856_v15 = vld [vmem:[#allocation9 + $0x164] ss:$8 sps:$4 sm:$0xff]  }
 0x304   :  { %4919 = vmatprep.subr.bf16.mxu1 %v6763_v38  ;;  %5371 = vmatpush1.bf16.msra.mxu0 %v6809_v16  ;;  %v6854_v38 = vld [vmem:[#allocation9 + $0x160] ss:$8 sps:$4 sm:$0xff]   ;;  %v6859_v16 = vld [vmem:[#allocation9 + $0x154] ss:$8 sps:$4 sm:$0xff]  }
 0x305   :  { %5372 = vmatprep.subr.bf16.mxu0 %v6814_v52  ;;  %v6857_v52 = vld [vmem:[#allocation9 + $0x150] ss:$8 sps:$4 sm:$0xff]  }
 0x307   :  { %4920 = vmatpush1.bf16.msra.mxu1 %v6761_v37  ;;  %v6862_v37 = vld [vmem:[#allocation9 + $0x144] ss:$8 sps:$4 sm:$0xff]  }
 0x308   :  { %4921 = vmatprep.subr.bf16.mxu1 %v6766_v39  ;;  %5373 = vmatpush1.bf16.msra.mxu0 %v6812_v34  ;;  %v6860_v39 = vld [vmem:[#allocation9 + $0x140] ss:$8 sps:$4 sm:$0xff]   ;;  %v6865_v34 = vld [vmem:[#allocation9 + $0x134] ss:$8 sps:$4 sm:$0xff]  }
 0x309   :  { %5374 = vmatprep.subr.bf16.mxu0 %v6817_v2  ;;  %v6863_v2 = vld [vmem:[#allocation9 + $0x130] ss:$8 sps:$4 sm:$0xff]  }
 0x30b   :  { %4922 = vmatpush1.bf16.msra.mxu1 %v6764_v26  ;;  %v6866_v26 = vld [vmem:[#allocation9 + $0x120] ss:$8 sps:$4 sm:$0xff]  }
 0x30c   :  { %4923 = vmatprep.subr.bf16.mxu1 %v6769_v19  ;;  %5375 = vmatpush1.bf16.msra.mxu0 %v6815_v43  ;;  %v6871_v19 = vld [vmem:[#allocation9 + $0x114] ss:$8 sps:$4 sm:$0xff]   ;;  %v6869_v43 = vld [vmem:[#allocation9 + $0x110] ss:$8 sps:$4 sm:$0xff]  }
 0x30d   :  { %5376 = vmatprep.subr.bf16.mxu0 %v6820_v12  ;;  %v6874_v12 = vld [vmem:[#allocation9 + $0x104] ss:$8 sps:$4 sm:$0xff]  }
 0x30f   :  { %4924 = vmatpush1.bf16.msra.mxu1 %v6767_v41  ;;  %v6872_v41 = vld [vmem:[#allocation9 + $0x100] ss:$8 sps:$4 sm:$0xff]  }
 0x310   :  { %4925 = vmatprep.subr.bf16.mxu1 %v6772_v45  ;;  %5377 = vmatpush1.bf16.msra.mxu0 %v6818_v29  ;;  %v6877_v45 = vld [vmem:[#allocation9 + $0x1f4] ss:$8 sps:$4 sm:$0xff]   ;;  %v6875_v29 = vld [vmem:[#allocation9 + $0x1f0] ss:$8 sps:$4 sm:$0xff]  }
 0x311   :  { %5378 = vmatprep.subr.bf16.mxu0 %v6823_v59  ;;  %v6880_v59 = vld [vmem:[#allocation9 + $0x1e4] ss:$8 sps:$4 sm:$0xff]  }
 0x313   :  { %4926 = vmatpush1.bf16.msra.mxu1 %v6770_v48  ;;  %v4648_v48 = vpop.f32.mrf.mxu0 }
 0x314   :  { %4927 = vmatprep.subr.bf16.mxu1 %v6775_v49  ;;  %5379 = vmatpush1.bf16.msra.mxu0 %v6821_v50  ;;  %v6878_v49 = vld [vmem:[#allocation9 + $0x1e0] ss:$8 sps:$4 sm:$0xff]   ;;  %v6883_v50 = vld [vmem:[#allocation9 + $0x1d4] ss:$8 sps:$4 sm:$0xff]  }
 0x315   :  { %5380 = vmatprep.subr.bf16.mxu0 %v6826_v54  ;;  %v4650_v54 = vpop.f32.mrf.mxu0 }
 0x317   :  { %4928 = vmatpush1.bf16.msra.mxu1 %v6773_v58  ;;  %v6881_v58 = vld [vmem:[#allocation9 + $0x1d0] ss:$8 sps:$4 sm:$0xff]  }
 0x318   :  { %4929 = vmatprep.subr.bf16.mxu1 %v6778_v11  ;;  %5381 = vmatpush1.bf16.msra.mxu0 %v6824_v61  ;;  %v6886_v11 = vld [vmem:[#allocation9 + $0x1c4] ss:$8 sps:$4 sm:$0xff]   ;;  %v4652_v61 = vpop.f32.mrf.mxu0 }
 0x319   :  { %5382 = vmatprep.subr.bf16.mxu0 %v6829_v62  ;;  %v4691_v62 = vpop.f32.mrf.mxu1 }
 0x31b   :  { %4930 = vmatpush1.bf16.msra.mxu1 %v6776_v63  ;;  %v6884_v63 = vld [vmem:[#allocation9 + $0x1c0] ss:$8 sps:$4 sm:$0xff]  }
 0x31c   :  { %4931 = vmatprep.subr.bf16.mxu1 %v6781_v0  ;;  %5383 = vmatpush2.bf16.msra.mxu0 %v6827_v1  ;;  %v6889_v0 = vld [vmem:[#allocation9 + $0x1b4] ss:$8 sps:$4 sm:$0xff]   ;;  %v4654_v1 = vpop.f32.mrf.mxu0 }
 0x31d   :  { %5384 = vmatprep.subr.bf16.mxu0 %v6832_v53  ;;  %v4693_v53 = vpop.f32.mrf.mxu1 }
 0x31f   :  { %4932 = vmatpush2.bf16.msra.mxu1 %v6779_v3 }
 0x320   :  { %4933 = vmatprep.subr.bf16.mxu1 %v6784_v4  ;;  %5385 = vmatpush2.bf16.msra.mxu0 %v6830_v6  ;;  %v6887_v4 = vld [vmem:[#allocation9 + $0x1b0] ss:$8 sps:$4 sm:$0xff]   ;;  %v7366_v6 = vld [vmem:[#allocation7] sm:$0xf] }
 0x321   :  { %5386 = vmatprep.subr.bf16.mxu0 %v6835_v7  ;;  %v3321_v7 = vrot.slane %v7366_v6, %v7288_v55 }
 0x323   :  { %4934 = vmatpush2.bf16.msra.mxu1 %v6782_v8  ;;  %v3317_v8 = vrot.slane %v7366_v6, %v7242_v27 }
 0x324   :  { %4935 = vmatprep.subr.bf16.mxu1 %v6787_v9  ;;  %5387 = vmatpush2.bf16.msra.mxu0 %v6833_v10  ;;  %v4695_v9 = vpop.f32.mrf.mxu1 }
 0x325   :  { %5388 = vmatprep.subr.bf16.mxu0 %v6838_v14  ;;  %v4651_v14 = vadd.f32 %v4650_v54, %v3321_v7  ;;  %v6907_v54 = vld [vmem:[#allocation12 + $0x58] sm:$0xff]  }
 0x327   :  { %4936 = vmatpush2.bf16.msra.mxu1 %v6785_v18  ;;  %v4653_v18 = vadd.f32 %v4652_v61, %v3317_v8 }
 0x328   :  { %4937 = vmatprep.subr.bf16.mxu1 %v6790_v13  ;;  %5389 = vmatpush2.bf16.msra.mxu0 %v6836_v57  ;;  %v4649_v13 = vadd.f32 %v4648_v48, %v3317_v8  ;;  %v4697_v57 = vpop.f32.mrf.mxu1  ;;  %v6904_v48 = vld [vmem:[#allocation12 + $0x28] sm:$0xff]  }
 0x329   :  { %5390 = vmatprep.subr.bf16.mxu0 %v6841_v20 }
 0x32b   :  { %4938 = vmatpush2.bf16.msra.mxu1 %v6788_v21  ;;  %v4655_v21 = vadd.f32 %v4654_v1, %v3321_v7 }
 0x32c   :  { %4939 = vmatprep.subr.bf16.mxu1 %v6793_v44  ;;  %5391 = vmatpush2.bf16.msra.mxu0 %v6839_v23  ;;  %v6892_v23 = vld [vmem:[#allocation9 + $0x1a4] ss:$8 sps:$4 sm:$0xff]  }
 0x32d   :  { %5392 = vmatprep.subr.bf16.mxu0 %v6844_v24  ;;  %v4694_v24 = vadd.f32 %v4693_v53, %v4651_v14 }
 0x32f   :  { %4940 = vmatpush2.bf16.msra.mxu1 %v6791_v25  ;;  %v4696_v25 = vadd.f32 %v4695_v9, %v4653_v18 }
 0x330   :  { %4941 = vmatprep.subr.bf16.mxu1 %v6796_v60  ;;  %5393 = vmatpush2.bf16.msra.mxu0 %v6842_v5  ;;  %v6890_v60 = vld [vmem:[#allocation9 + $0x1a0] ss:$8 sps:$4 sm:$0xff]   ;;  %v4692_v5 = vadd.f32 %v4691_v62, %v4649_v13 }
 0x331   :  { %5394 = vmatprep.subr.bf16.mxu0 %v6847_v28 }
 0x333   :  { %4942 = vmatpush2.bf16.msra.mxu1 %v6794_v30 }
 0x334   :  { %4943 = vmatprep.subr.bf16.mxu1 %v6799_v56  ;;  %5395 = vmatpush2.bf16.msra.mxu0 %v6845_v40  ;;  %v4698_v56 = vadd.f32 %v4697_v57, %v4655_v21 }
 0x335   :  { %5396 = vmatprep.subr.bf16.mxu0 %v6850_v51 }
 0x337   :  { %4944 = vmatpush2.bf16.msra.mxu1 %v6797_v31 }
 0x338   :  { %4945 = vmatprep.subr.bf16.mxu1 %v6802_v42  ;;  %5397 = vmatpush2.bf16.msra.mxu0 %v6848_v22  ;;  %v6895_v22 = vld [vmem:[#allocation9 + $0x194] ss:$8 sps:$4 sm:$0xff]  }
 0x33b   :  { %4946 = vmatpush2.bf16.msra.mxu1 %v6800_v33  ;;  %v4734_v3 = vpop.f32.mrf.mxu0 }
 0x33c   :  { %5409 = vmatprep.subr.bf16.mxu1 %v6853_v36  ;;  %v4735_v31 = vadd.f32 %v4734_v3, %v4692_v5  ;;  %v3329_v3 = vrot.slane %v7366_v6, %v540_v32 }
 0x33d   :  { %v4736_v10 = vpop.f32.mrf.mxu0 }
 0x33e   :  { %4948 = vmatmul.mubr.bf16.vlgmr.msra.gmra.mxu1 %v7356_v46  ;;  %v6868_v46 = vld [vmem:[#allocation9 + $0x124] ss:$8 sps:$4 sm:$0xff]   ;;  %v4737_v40 = vadd.f32 %v4736_v10, %v4694_v24 }
 0x33f   :  { %5410 = vmatpush1.bf16.msra.mxu1 %v6851_v35  ;;  %v4738_v20 = vpop.f32.mrf.mxu0 }
 0x340   :  { %5411 = vmatprep.subr.bf16.mxu1 %v6856_v15  ;;  %v4739_v51 = vadd.f32 %v4738_v20, %v4696_v25  ;;  %v6893_v15 = vld [vmem:[#allocation9 + $0x190] ss:$8 sps:$4 sm:$0xff]  }
 0x341   :  { %v4740_v28 = vpop.f32.mrf.mxu0 }
 0x342   :  { %v4741_v33 = vadd.f32 %v4740_v28, %v4698_v56 }
 0x343   :  { %5412 = vmatpush1.bf16.msra.mxu1 %v6854_v38 }
 0x344   :  { %5413 = vmatprep.subr.bf16.mxu1 %v6859_v16 }
 0x347   :  { %5414 = vmatpush1.bf16.msra.mxu1 %v6857_v52 }
 0x348   :  { %5415 = vmatprep.subr.bf16.mxu1 %v6862_v37 }
 0x34b   :  { %5416 = vmatpush1.bf16.msra.mxu1 %v6860_v39  ;;  %v6898_v39 = vld [vmem:[#allocation9 + $0x184] ss:$8 sps:$4 sm:$0xff]  }
 0x34c   :  { %5417 = vmatprep.subr.bf16.mxu1 %v6865_v34 }
 0x34f   :  { %5418 = vmatpush1.bf16.msra.mxu1 %v6863_v2 }
 0x350   :  { %5419 = vmatprep.subr.bf16.mxu1 %v6868_v46  ;;  %v6896_v46 = vld [vmem:[#allocation9 + $0x180] ss:$8 sps:$4 sm:$0xff]  }
 0x353   :  { %5420 = vmatpush1.bf16.msra.mxu1 %v6866_v26 }
 0x354   :  { %5421 = vmatprep.subr.bf16.mxu1 %v6871_v19 }
 0x357   :  { %5422 = vmatpush1.bf16.msra.mxu1 %v6869_v43 }
 0x358   :  { %5423 = vmatprep.subr.bf16.mxu1 %v6874_v12  ;;  %v6899_v12 = vld [vmem:[#allocation12 + $0x78] sm:$0xff]  }
 0x359   :  { %6372 = vmatprep.subr.bf16.mxu0 %v6899_v12 }
 0x35b   :  { %5424 = vmatpush1.bf16.msra.mxu1 %v6872_v41  ;;  %v6900_v41 = vld [vmem:[#allocation12 + $0x38] sm:$0xff]  }
 0x35c   :  { %5425 = vmatprep.subr.bf16.mxu1 %v6877_v45  ;;  %v6901_v45 = vld [vmem:[#allocation12 + $0x70] sm:$0xff]  }
 0x35f   :  { %5426 = vmatpush2.bf16.msra.mxu1 %v6875_v29  ;;  %v6902_v29 = vld [vmem:[#allocation12 + $0x30] sm:$0xff]  }
 0x360   :  { %5427 = vmatprep.subr.bf16.mxu1 %v6880_v59  ;;  %v6903_v59 = vld [vmem:[#allocation12 + $0x68] sm:$0xff]  }
 0x363   :  { %5428 = vmatpush2.bf16.msra.mxu1 %v6878_v49  ;;  %v6905_v49 = vld [vmem:[#allocation12 + $0x60] sm:$0xff]  }
 0x364   :  { %5429 = vmatprep.subr.bf16.mxu1 %v6883_v50  ;;  %v6906_v50 = vld [vmem:[#allocation12 + $0x20] sm:$0xff]  }
 0x367   :  { %5430 = vmatpush2.bf16.msra.mxu1 %v6881_v58  ;;  %v6908_v58 = vld [vmem:[#allocation12 + $0x18] sm:$0xff]  }
 0x368   :  { %5431 = vmatprep.subr.bf16.mxu1 %v6886_v11 }
 0x36b   :  { %5432 = vmatpush2.bf16.msra.mxu1 %v6884_v63 }
 0x36c   :  { %5433 = vmatprep.subr.bf16.mxu1 %v6889_v0 }
 0x36f   :  { %5434 = vmatpush2.bf16.msra.mxu1 %v6887_v4  ;;  %v3325_v4 = vrot.slane %v7366_v6, %v536_v47 }
 0x370   :  { %5435 = vmatprep.subr.bf16.mxu1 %v6892_v23 }
 0x373   :  { %5436 = vmatpush2.bf16.msra.mxu1 %v6890_v60 }
 0x374   :  { %5437 = vmatprep.subr.bf16.mxu1 %v6895_v22 }
 0x377   :  { %5438 = vmatpush2.bf16.msra.mxu1 %v6893_v15  ;;  %v6909_v15 = vld [vmem:[#allocation12 + $0x50] sm:$0xff]  }
 0x378   :  { %5439 = vmatprep.subr.bf16.mxu1 %v6898_v39  ;;  %v6914_v39 = vld [vmem:[#allocation12] sm:$0xff]  }
 0x37b   :  { %5440 = vmatpush2.bf16.msra.mxu1 %v6896_v46  ;;  %v4820_v11 = vpop.f32.mrf.mxu0  ;;  %v5034_v46 = vld [vmem:[#allocation10] sm:$0x3] }
 0x37c   :  { %v4821_v14 = vadd.f32 %v4820_v11, %v3325_v4 }
 0x37d   :  { %v4822_v61 = vpop.f32.mrf.mxu0 }
 0x37e   :  { %v4777_v44 = vpop.f32.mrf.mxu1  ;;  %v4823_v9 = vadd.f32 %v4822_v61, %v3329_v3 }
 0x37f   :  { %v4778_v38 = vadd.f32 %v4777_v44, %v4735_v31  ;;  %v4824_v62 = vpop.f32.mrf.mxu0 }
 0x380   :  { %v4779_v30 = vpop.f32.mrf.mxu1  ;;  %v4825_v10 = vadd.f32 %v4824_v62, %v3325_v4  ;;  %v6355_v4 = vld [vmem:[#allocation13] ss:$0 sm:$0xff] }
 0x381   :  { %v4780_v35 = vadd.f32 %v4779_v30, %v4737_v40  ;;  %v4958_v26 = vmax.f32 %v4778_v38, 0.0  ;;  %v4826_v0 = vpop.f32.mrf.mxu0  ;;  %v6910_v38 = vld [vmem:[#allocation12 + $0x10] sm:$0xff]  }
 0x382   :  { %v4781_v42 = vpop.f32.mrf.mxu1  ;;  %v4827_v13 = vadd.f32 %v4826_v0, %v3329_v3 }
 0x383   :  { %v4782_v36 = vadd.f32 %v4781_v42, %v4739_v51  ;;  %v4959_v34 = vmax.f32 %v4780_v35, 0.0 }
 0x384   :  { %v4783_v16 = vpop.f32.mrf.mxu1 }
 0x385   :  { %v4784_v52 = vadd.f32 %v4783_v16, %v4741_v33  ;;  %v4962_v37 = vmax.f32 %v4782_v36, 0.0  ;;  %v6911_v16 = vld [vmem:[#allocation12 + $0x48] sm:$0xff]  }
 0x387   :  { %v4963_v2 = vmax.f32 %v4784_v52, 0.0  ;;  %v4966_v43 = vpack.c.bf16 %v4962_v37, %v4958_v26  ;;  %v6912_v52 = vld [vmem:[#allocation12 + $0x8] sm:$0xff]   ;;  %v6913_v37 = vld [vmem:[#allocation12 + $0x40] sm:$0xff]  }
 0x389   :  { %v4967_v19 = vpack.c.bf16 %v4963_v2, %v4959_v34 }
 0x38b   :  { %5398 = vmatprep.mubr.bf16.mxu0 %v4967_v19  ;;  %v5043_v19 = vrot.slane %v5034_v46, %v7288_v55 }
 0x38c   :  { %5399 = vmatmul.mubr.bf16.vlgmr.msra.gmra.mxu0 %v4966_v43  ;;  %v5039_v43 = vrot.slane %v5034_v46, %v7242_v27 }
 0x38d   :  { %6373 = vmatpush3.bf16.msra.mxu0 %v6900_v41 }
 0x38e   :  { %6374 = vmatprep.subr.bf16.mxu0 %v6901_v45 }
 0x391   :  { %6375 = vmatpush3.bf16.msra.mxu0 %v6902_v29 }
 0x392   :  { %6376 = vmatprep.subr.bf16.mxu0 %v6903_v59 }
 0x395   :  { %6377 = vmatpush3.bf16.msra.mxu0 %v6904_v48 }
 0x396   :  { %6378 = vmatprep.subr.bf16.mxu0 %v6905_v49 }
 0x399   :  { %6379 = vmatpush3.bf16.msra.mxu0 %v6906_v50 }
 0x39a   :  { %6380 = vmatprep.subr.bf16.mxu0 %v6907_v54 }
 0x39d   :  { %6381 = vmatpush3.bf16.msra.mxu0 %v6908_v58 }
 0x39e   :  { %6382 = vmatprep.subr.bf16.mxu0 %v6909_v15 }
 0x3a1   :  { %6383 = vmatpush3.bf16.msra.mxu0 %v6910_v38 }
 0x3a2   :  { %6384 = vmatprep.subr.bf16.mxu0 %v6911_v16 }
 0x3a5   :  { %6385 = vmatpush3.bf16.msra.mxu0 %v6912_v52 }
 0x3a6   :  { %6386 = vmatprep.subr.bf16.mxu0 %v6913_v37 }
 0x3a9   :  { %6387 = vmatpush3.bf16.msra.mxu0 %v6914_v39 }
 0x3bb   :  { %v4906_v53 = vpop.f32.mrf.mxu0 }
 0x3bd   :  { %v4908_v8 = vpop.f32.mrf.mxu0 }
 0x3be   :  { %v4863_v63 = vpop.f32.mrf.mxu1 }
 0x3bf   :  { %v4864_v21 = vadd.f32 %v4863_v63, %v4821_v14  ;;  %v4910_v44 = vpop.f32.mrf.mxu0 }
 0x3c0   :  { %v4865_v1 = vpop.f32.mrf.mxu1 }
 0x3c1   :  { %v4866_v57 = vadd.f32 %v4865_v1, %v4823_v9  ;;  %v4912_v5 = vpop.f32.mrf.mxu0  ;;  %v4907_v17 = vadd.f32 %v4906_v53, %v4864_v21 }
 0x3c2   :  { %v4867_v7 = vpop.f32.mrf.mxu1 }
 0x3c3   :  { %v4868_v20 = vadd.f32 %v4867_v7, %v4825_v10  ;;  %v4909_v60 = vadd.f32 %v4908_v8, %v4866_v57 }
 0x3c4   :  { %v4869_v18 = vpop.f32.mrf.mxu1 }
 0x3c5   :  { %v4870_v24 = vadd.f32 %v4869_v18, %v4827_v13  ;;  %v4911_v32 = vadd.f32 %v4910_v44, %v4868_v20 }
 0x3c7   :  { %v4913_v30 = vadd.f32 %v4912_v5, %v4870_v24 }
 0x3fe   :  { %v4949_v23 = vpop.f32.mrf.mxu1 }
 0x3ff   :  { %v4950_v56 = vadd.f32 %v4949_v23, %v4907_v17 }
 0x400   :  { %v4951_v25 = vpop.f32.mrf.mxu1 }
 0x401   :  { %v4952_v47 = vadd.f32 %v4951_v25, %v4909_v60  ;;  %v4960_v33 = vmax.f32 %v4950_v56, 0.0 }
 0x402   :  { %v4953_v28 = vpop.f32.mrf.mxu1 }
 0x403   :  { %v4954_v6 = vadd.f32 %v4953_v28, %v4911_v32  ;;  %v4961_v42 = vmax.f32 %v4952_v47, 0.0 }
 0x404   :  { %v4955_v40 = vpop.f32.mrf.mxu1 }
 0x405   :  { %v4956_v51 = vadd.f32 %v4955_v40, %v4913_v30  ;;  %v4964_v31 = vmax.f32 %v4954_v6, 0.0 }
 0x407   :  { %v4965_v22 = vmax.f32 %v4956_v51, 0.0  ;;  %v4968_v36 = vpack.c.bf16 %v4964_v31, %v4960_v33 }
 0x409   :  { %v4969_v35 = vpack.c.bf16 %v4965_v22, %v4961_v42 }
 0x40b   :  { %5441 = vmatprep.mubr.bf16.mxu1 %v4969_v35 }
 0x40c   :  { %5442 = vmatmul.mubr.bf16.vlgmr.msra.gmra.mxu1 %v4968_v36 }
 0x44c   :  { %v5400_v34 = vpop.f32.mrf.mxu0 }
 0x44d   :  { %v5401_v48 = vadd.f32 %v5400_v34, %v5039_v43 }
 0x44e   :  { %v5402_v2 = vpop.f32.mrf.mxu0 }
 0x44f   :  { %v5403_v29 = vadd.f32 %v5402_v2, %v5043_v19 }
 0x450   :  { %v5404_v26 = vpop.f32.mrf.mxu0 }
 0x451   :  { %v5405_v59 = vadd.f32 %v5404_v26, %v5039_v43 }
 0x452   :  { %v5406_v41 = vpop.f32.mrf.mxu0 }
 0x453   :  { %v5407_v50 = vadd.f32 %v5406_v41, %v5043_v19 }
 0x4cc   :  { %v5443_v12 = vpop.f32.mrf.mxu1 }
 0x4cd   :  { %v5444_v11 = vadd.f32 %v5443_v12, %v5401_v48 }
 0x4ce   :  { %v5445_v45 = vpop.f32.mrf.mxu1 }
 0x4cf   :  { %v5446_v54 = vadd.f32 %v5445_v45, %v5403_v29  ;;  %v5452_v53 = vmax.f32 %v5444_v11, 0.0 }
 0x4d0   :  { %v5447_v49 = vpop.f32.mrf.mxu1 }
 0x4d1   :  { %v5448_v58 = vadd.f32 %v5447_v49, %v5405_v59  ;;  %v5453_v0 = vmax.f32 %v5446_v54, 0.0 }
 0x4d2   :  { %v5449_v61 = vpop.f32.mrf.mxu1 }
 0x4d3   :  { %v5450_v62 = vadd.f32 %v5449_v61, %v5407_v50  ;;  %v5454_v63 = vmax.f32 %v5448_v58, 0.0 }
 0x4d5   :  { %v5455_v1 = vmax.f32 %v5450_v62, 0.0  ;;  %v5456_v3 = vpack.c.bf16 %v5454_v63, %v5452_v53 }
 0x4d7   :  { %v5457_v55 = vpack.c.bf16 %v5455_v1, %v5453_v0 }
 0x4d9   :  { %5625 = vmatprep.mubr.bf16.mxu0 %v5457_v55 }
 0x4da   :  { %5626 = vmatmul.mubr.bf16.vlgmr.msra.gmra.mxu0 %v5456_v3 }
 0x59a   :  { %v6388_v27 = vpop.f32.mrf.mxu0 }
 0x59c   :  { %v6389_v7 = vpop.f32.mrf.mxu0 }
 0x59d   :  { %v6390_v8 = vadd.f32 %v6389_v7, %v6388_v27 }
 0x59e   :  { %v6391_v9 = vpop.f32.mrf.mxu0 }
 0x59f   :  { %v5628_v10 = vadd.f32 %v6390_v8, %v6355_v4 }
 0x5a0   :  { %v6392_v14 = vpop.f32.mrf.mxu0 }
 0x5a1   :  { %5634 = vst [vmem:[%s7395_s9] sm:$0xff] %v5628_v10  ;;  %v6393_v18 = vadd.f32 %v6392_v14, %v6391_v9 }
 0x5a3   :  { %v5631_v13 = vadd.f32 %v6393_v18, %v6355_v4 }
 0x5a5   :  { %5635 = vst [vmem:[%s7395_s9 + $0x8] sm:$0xff] %v5631_v13 }
 0x5a6   :  { %5640 = vsyncpa [#allocation3], 1 }
 0x5a7   :  { %5641 = vsyncpa [#allocation5], 1 }
 0x5a8   :  { %5642 = vsyncpa [#allocation8], 1 }
 0x5a9   :  { %5643 = vsyncpa [#allocation11], 1 }
 0x5aa   :  { %5644 = vsyncpa [#allocation14], 1 }

</bundles_post_ra>
